<compile_context>
chip_gen: v6e
topology: v6e:2x2x1
jax: 0.10.0
libtpu: 0.0.40
codegen_flags: <defaults>
</compile_context>

<pallas_src>
import functools
import math

import jax
import jax.numpy as jnp
from jax import lax
from jax.experimental import pallas as pl
from jax.experimental.pallas import tpu as pltpu


# ----------------------------------------------------------------------------
# in-kernel helpers
# ----------------------------------------------------------------------------
def _add_layernorm(x, residual, gamma, beta, eps=1e-5):
    """Fused residual add + LayerNorm over the last dim (f32, PyTorch eps)."""
    y = x + residual
    mu = jnp.mean(y, axis=-1, keepdims=True)
    var = jnp.mean((y - mu) ** 2, axis=-1, keepdims=True)
    return (y - mu) * lax.rsqrt(var + jnp.float32(eps)) * gamma + beta


def _mha(xq_b, xk_b, xv_b, mask_bias, wq, bq, wk, bk, wv, bv, wo, bo,
         ctx_scratch, n_head):
    """Multi-head attention on 2-D bf16 activations.

    xq_b: (Sq, D) bf16; xk_b / xv_b: (Sk, D) bf16.
    wq/wk/wv: (H, D, dh) bf16 per-head projections (1/sqrt(dh) folded into wq/bq).
    bq/bk/bv: (H, 1, dh) f32.  wo: (D, D) bf16.  bo: (1, D) f32.
    mask_bias: (Sq, Sk) additive f32 mask (0 keep / -1e20 drop) or None.
    ctx_scratch: (Sq, D) f32 VMEM ref used to recombine heads lane-dense.
    Returns (Sq, D) f32 attention output (pre-residual, pre-LayerNorm).
    """
    H = n_head
    Sq, D = xq_b.shape
    Sk = xk_b.shape[0]
    dh = D // H

    # Head-major projections straight off the MXU — no lane slicing / stacking.
    xq_h = jnp.broadcast_to(xq_b[None], (H, Sq, D))
    xk_h = jnp.broadcast_to(xk_b[None], (H, Sk, D))
    xv_h = jnp.broadcast_to(xv_b[None], (H, Sk, D))
    q = jnp.einsum('hsd,hde->hse', xq_h, wq,
                   preferred_element_type=jnp.float32) + bq
    k = jnp.einsum('hsd,hde->hse', xk_h, wk,
                   preferred_element_type=jnp.float32) + bk
    v = jnp.einsum('hsd,hde->hse', xv_h, wv,
                   preferred_element_type=jnp.float32) + bv

    # scores (H, Sq, Sk) in f32; additive mask; f32 softmax.
    s = jnp.einsum('hqe,hke->hqk', q.astype(jnp.bfloat16),
                   k.astype(jnp.bfloat16), preferred_element_type=jnp.float32)
    if mask_bias is not None:
        s = s + mask_bias[None]
    m = jnp.max(s, axis=-1, keepdims=True)
    e = jnp.exp(s - m)
    denom = jnp.sum(e, axis=-1, keepdims=True)
    p = (e * pl.reciprocal(denom, approx=True)).astype(jnp.bfloat16)

    # per-head context (H, Sq, dh); stays f32 until the output matmul.
    ctx = jnp.einsum('hqk,hke->hqe', p, v.astype(jnp.bfloat16),
                     preferred_element_type=jnp.float32)

    # recombine heads lane-dense, then ONE full-depth output projection
    # (contraction K = D) instead of H dh-deep matmuls + an H-way reduce.
    for h in range(H):
        ctx_scratch[:, h * dh:(h + 1) * dh] = ctx[h]
    return jnp.dot(ctx_scratch[...].astype(jnp.bfloat16), wo,
                   preferred_element_type=jnp.float32) + bo


# ----------------------------------------------------------------------------
# fused DecoderBlock kernel (one grid step = one batch element)
# ----------------------------------------------------------------------------
def decoder_block_kernel(
        x_ref, kenc_ref, venc_ref, mb_ref,
        sa_wq, sa_bq, sa_wk, sa_bk, sa_wv, sa_bv, sa_wo, sa_bo, g1, be1,
        ca_wq, ca_bq, ca_wk, ca_bk, ca_wv, ca_bv, ca_wo, ca_bo, g2, be2,
        fw1, fb1, fw2, fb2, g3, be3,
        o_ref, ctx_scratch, *, n_head):
    x = x_ref[0]                                    # (S, D) f32
    x_b = x.astype(jnp.bfloat16)                    # cast once, reused for q/k/v

    # 1) masked self-attention + residual + LayerNorm1
    attn = _mha(x_b, x_b, x_b, mb_ref[...],
                sa_wq[...], sa_bq[...], sa_wk[...], sa_bk[...],
                sa_wv[...], sa_bv[...], sa_wo[...], sa_bo[...],
                ctx_scratch, n_head)
    h = _add_layernorm(attn, x, g1[...], be1[...])

    # 2) cross-attention (q = decoder state, k/v = encoder) + residual + LN2
    attn2 = _mha(h.astype(jnp.bfloat16),
                 kenc_ref[0].astype(jnp.bfloat16),
                 venc_ref[0].astype(jnp.bfloat16), None,
                 ca_wq[...], ca_bq[...], ca_wk[...], ca_bk[...],
                 ca_wv[...], ca_bv[...], ca_wo[...], ca_bo[...],
                 ctx_scratch, n_head)
    h2 = _add_layernorm(attn2, h, g2[...], be2[...])

    # 3) feed-forward + residual + LayerNorm3
    hid = jnp.dot(h2.astype(jnp.bfloat16), fw1[...],
                  preferred_element_type=jnp.float32) + fb1[...]
    hid = jnp.maximum(hid, 0.0)
    ffo = jnp.dot(hid.astype(jnp.bfloat16), fw2[...],
                  preferred_element_type=jnp.float32) + fb2[...]
    o_ref[0] = _add_layernorm(ffo, h2, g3[...], be3[...])


# ----------------------------------------------------------------------------
# wrapper
# ----------------------------------------------------------------------------
def _const_spec(a):
    # whole-array block, constant index map.  NOTE(prod): single-buffer these
    # via pipeline_mode=pl.Buffered(1) once weight blocks become large.
    zeros = (0,) * a.ndim
    return pl.BlockSpec(a.shape, lambda b, _z=zeros: _z)


def decoder_block_forward(x, k_enc, v_enc, mask_bias, prep, *, n_head):
    B, S, D = x.shape
    Sk = k_enc.shape[1]

    act_q = pl.BlockSpec((1, S, D), lambda b: (b, 0, 0))
    act_kv = pl.BlockSpec((1, Sk, D), lambda b: (b, 0, 0))

    sa, ca = prep["self_attn"], prep["cross_attn"]
    const_args = (
        sa["wq"], sa["bq"], sa["wk"], sa["bk"], sa["wv"], sa["bv"],
        sa["wo"], sa["bo"], prep["ln1_g"], prep["ln1_b"],
        ca["wq"], ca["bq"], ca["wk"], ca["bk"], ca["wv"], ca["bv"],
        ca["wo"], ca["bo"], prep["ln2_g"], prep["ln2_b"],
        prep["w1"], prep["b1"], prep["w2"], prep["b2"],
        prep["ln3_g"], prep["ln3_b"],
    )

    return pl.pallas_call(
        functools.partial(decoder_block_kernel, n_head=n_head),
        out_shape=jax.ShapeDtypeStruct((B, S, D), jnp.float32),
        grid=(B,),
        in_specs=[act_q, act_kv, act_kv, _const_spec(mask_bias)]
                 + [_const_spec(a) for a in const_args],
        out_specs=act_q,
        scratch_shapes=[pltpu.VMEM((S, D), jnp.float32)],   # head-combine buffer
        compiler_params=pltpu.CompilerParams(dimension_semantics=("parallel",)),
    )(x, k_enc, v_enc, mask_bias, *const_args)


# ----------------------------------------------------------------------------
# parameter init (PyTorch-like) and one-time kernel-layout preparation
# ----------------------------------------------------------------------------
def init_params(key, d_model, factor):
    def lin(k, fan_in, fan_out):
        k1, k2 = jax.random.split(k)
        bound = 1.0 / math.sqrt(fan_in)
        w = jax.random.uniform(k1, (fan_in, fan_out), jnp.float32, -bound, bound)
        b = jax.random.uniform(k2, (1, fan_out), jnp.float32, -bound, bound)
        return w, b

    keys = jax.random.split(key, 10)
    sa = sum([lin(keys[i], d_model, d_model) for i in range(4)], ())
    ca = sum([lin(keys[4 + i], d_model, d_model) for i in range(4)], ())
    w1, b1 = lin(keys[8], d_model, factor * d_model)
    w2, b2 = lin(keys[9], factor * d_model, d_model)
    ln = lambda: (jnp.ones((1, d_model), jnp.float32),
                  jnp.zeros((1, d_model), jnp.float32))
    return {"self_attn": sa, "cross_attn": ca, "ffn": (w1, b1, w2, b2),
            "ln1": ln(), "ln2": ln(), "ln3": ln()}


def prepare_params(params, n_head):
    """One-time (outside jit) conversion to kernel-ready layouts / dtypes:
    per-head (H, D, dh) bf16 q/k/v weights, 1/sqrt(dh) folded into Wq/bq,
    bf16 output / FFN weights, f32 biases and LayerNorm params."""
    d_model = params["self_attn"][0].shape[0]
    dh = d_model // n_head
    scale = 1.0 / math.sqrt(dh)

    def split_w(w):    # (D, D) -> (H, D, dh)
        return jnp.transpose(w.reshape(d_model, n_head, dh),
                             (1, 0, 2)).astype(jnp.bfloat16)

    def split_b(b):    # (1, D) -> (H, 1, dh)
        return b.reshape(n_head, 1, dh).astype(jnp.float32)

    def prep_attn(p):
        wq, bq, wk, bk, wv, bv, wo, bo = p
        return {"wq": split_w(wq * scale), "bq": split_b(bq * scale),
                "wk": split_w(wk), "bk": split_b(bk),
                "wv": split_w(wv), "bv": split_b(bv),
                "wo": wo.astype(jnp.bfloat16), "bo": bo.astype(jnp.float32)}

    w1, b1, w2, b2 = params["ffn"]
    return {
        "self_attn": prep_attn(params["self_attn"]),
        "cross_attn": prep_attn(params["cross_attn"]),
        "w1": w1.astype(jnp.bfloat16), "b1": b1.astype(jnp.float32),
        "w2": w2.astype(jnp.bfloat16), "b2": b2.astype(jnp.float32),
        "ln1_g": params["ln1"][0], "ln1_b": params["ln1"][1],
        "ln2_g": params["ln2"][0], "ln2_b": params["ln2"][1],
        "ln3_g": params["ln3"][0], "ln3_b": params["ln3"][1],
    }


if __name__ == "__main__":
    B, S, D, N_HEAD, FACTOR = 2, 8, 32, 8, 4   # d_model=32, n_head=8, factor=4

    key = jax.random.PRNGKey(0)
    kx, kk, kv, kp = jax.random.split(key, 4)
    x = jax.random.normal(kx, (B, S, D), jnp.float32)        # decoder input
    k_enc = jax.random.normal(kk, (B, S, D), jnp.float32)    # encoder "k"
    v_enc = jax.random.normal(kv, (B, S, D), jnp.float32)    # encoder "v"
    mask = jnp.tril(jnp.ones((S, S), jnp.float32))           # causal (1 keep / 0 drop)
    # additive mask computed once: in-kernel it is a single add per score.
    mask_bias = jnp.where(mask != 0, 0.0, -1e20).astype(jnp.float32)

    params = init_params(kp, D, FACTOR)
    prep = prepare_params(params, N_HEAD)     # bf16 / per-head layouts, once

    fwd = jax.jit(functools.partial(decoder_block_forward, n_head=N_HEAD))
    out = fwd(x, k_enc, v_enc, mask_bias, prep)
    jax.block_until_ready(out)
    assert out.shape == (B, S, D) and out.dtype == jnp.float32
    assert bool(jnp.all(jnp.isfinite(out)))
    print("KERNEL_OK")
</pallas_src>

<mosaic_0001>
module attributes {stable_mosaic.version = 11 : i64} {
  func.func @decoder_block_kernel(%arg0: i32, %arg1: memref<1x8x32xf32, #tpu.memory_space<vmem>>, %arg2: memref<1x8x32xf32, #tpu.memory_space<vmem>>, %arg3: memref<1x8x32xf32, #tpu.memory_space<vmem>>, %arg4: memref<8x8xf32, #tpu.memory_space<vmem>>, %arg5: memref<8x32x4xbf16, #tpu.memory_space<vmem>>, %arg6: memref<8x1x4xf32, #tpu.memory_space<vmem>>, %arg7: memref<8x32x4xbf16, #tpu.memory_space<vmem>>, %arg8: memref<8x1x4xf32, #tpu.memory_space<vmem>>, %arg9: memref<8x32x4xbf16, #tpu.memory_space<vmem>>, %arg10: memref<8x1x4xf32, #tpu.memory_space<vmem>>, %arg11: memref<32x32xbf16, #tpu.memory_space<vmem>>, %arg12: memref<1x32xf32, #tpu.memory_space<vmem>>, %arg13: memref<1x32xf32, #tpu.memory_space<vmem>>, %arg14: memref<1x32xf32, #tpu.memory_space<vmem>>, %arg15: memref<8x32x4xbf16, #tpu.memory_space<vmem>>, %arg16: memref<8x1x4xf32, #tpu.memory_space<vmem>>, %arg17: memref<8x32x4xbf16, #tpu.memory_space<vmem>>, %arg18: memref<8x1x4xf32, #tpu.memory_space<vmem>>, %arg19: memref<8x32x4xbf16, #tpu.memory_space<vmem>>, %arg20: memref<8x1x4xf32, #tpu.memory_space<vmem>>, %arg21: memref<32x32xbf16, #tpu.memory_space<vmem>>, %arg22: memref<1x32xf32, #tpu.memory_space<vmem>>, %arg23: memref<1x32xf32, #tpu.memory_space<vmem>>, %arg24: memref<1x32xf32, #tpu.memory_space<vmem>>, %arg25: memref<32x128xbf16, #tpu.memory_space<vmem>>, %arg26: memref<1x128xf32, #tpu.memory_space<vmem>>, %arg27: memref<128x32xbf16, #tpu.memory_space<vmem>>, %arg28: memref<1x32xf32, #tpu.memory_space<vmem>>, %arg29: memref<1x32xf32, #tpu.memory_space<vmem>>, %arg30: memref<1x32xf32, #tpu.memory_space<vmem>>, %arg31: memref<1x8x32xf32, #tpu.memory_space<vmem>>, %arg32: memref<8x32xf32, #tpu.memory_space<vmem>>) attributes {dimension_semantics = [#tpu.dimension_semantics<parallel>], iteration_bounds = array<i64: 2>, scalar_prefetch = 0 : i64, scratch_operands = 1 : i64, tpu.core_type = #tpu.core_type<tc>, window_params = [{transform_indices = @transform_0, window_bounds = array<i64: 1, 8, 32>}, {transform_indices = @transform_1, window_bounds = array<i64: 1, 8, 32>}, {transform_indices = @transform_2, window_bounds = array<i64: 1, 8, 32>}, {pipeline_mode = #tpu.pipeline_mode<synchronous>, transform_indices = @transform_3, window_bounds = array<i64: 8, 8>}, {pipeline_mode = #tpu.pipeline_mode<synchronous>, transform_indices = @transform_4, window_bounds = array<i64: 8, 32, 4>}, {pipeline_mode = #tpu.pipeline_mode<synchronous>, transform_indices = @transform_5, window_bounds = array<i64: 8, 1, 4>}, {pipeline_mode = #tpu.pipeline_mode<synchronous>, transform_indices = @transform_6, window_bounds = array<i64: 8, 32, 4>}, {pipeline_mode = #tpu.pipeline_mode<synchronous>, transform_indices = @transform_7, window_bounds = array<i64: 8, 1, 4>}, {pipeline_mode = #tpu.pipeline_mode<synchronous>, transform_indices = @transform_8, window_bounds = array<i64: 8, 32, 4>}, {pipeline_mode = #tpu.pipeline_mode<synchronous>, transform_indices = @transform_9, window_bounds = array<i64: 8, 1, 4>}, {pipeline_mode = #tpu.pipeline_mode<synchronous>, transform_indices = @transform_10, window_bounds = array<i64: 32, 32>}, {pipeline_mode = #tpu.pipeline_mode<synchronous>, transform_indices = @transform_11, window_bounds = array<i64: 1, 32>}, {pipeline_mode = #tpu.pipeline_mode<synchronous>, transform_indices = @transform_12, window_bounds = array<i64: 1, 32>}, {pipeline_mode = #tpu.pipeline_mode<synchronous>, transform_indices = @transform_13, window_bounds = array<i64: 1, 32>}, {pipeline_mode = #tpu.pipeline_mode<synchronous>, transform_indices = @transform_14, window_bounds = array<i64: 8, 32, 4>}, {pipeline_mode = #tpu.pipeline_mode<synchronous>, transform_indices = @transform_15, window_bounds = array<i64: 8, 1, 4>}, {pipeline_mode = #tpu.pipeline_mode<synchronous>, transform_indices = @transform_16, window_bounds = array<i64: 8, 32, 4>}, {pipeline_mode = #tpu.pipeline_mode<synchronous>, transform_indices = @transform_17, window_bounds = array<i64: 8, 1, 4>}, {pipeline_mode = #tpu.pipeline_mode<synchronous>, transform_indices = @transform_18, window_bounds = array<i64: 8, 32, 4>}, {pipeline_mode = #tpu.pipeline_mode<synchronous>, transform_indices = @transform_19, window_bounds = array<i64: 8, 1, 4>}, {pipeline_mode = #tpu.pipeline_mode<synchronous>, transform_indices = @transform_20, window_bounds = array<i64: 32, 32>}, {pipeline_mode = #tpu.pipeline_mode<synchronous>, transform_indices = @transform_21, window_bounds = array<i64: 1, 32>}, {pipeline_mode = #tpu.pipeline_mode<synchronous>, transform_indices = @transform_22, window_bounds = array<i64: 1, 32>}, {pipeline_mode = #tpu.pipeline_mode<synchronous>, transform_indices = @transform_23, window_bounds = array<i64: 1, 32>}, {pipeline_mode = #tpu.pipeline_mode<synchronous>, transform_indices = @transform_24, window_bounds = array<i64: 32, 128>}, {pipeline_mode = #tpu.pipeline_mode<synchronous>, transform_indices = @transform_25, window_bounds = array<i64: 1, 128>}, {pipeline_mode = #tpu.pipeline_mode<synchronous>, transform_indices = @transform_26, window_bounds = array<i64: 128, 32>}, {pipeline_mode = #tpu.pipeline_mode<synchronous>, transform_indices = @transform_27, window_bounds = array<i64: 1, 32>}, {pipeline_mode = #tpu.pipeline_mode<synchronous>, transform_indices = @transform_28, window_bounds = array<i64: 1, 32>}, {pipeline_mode = #tpu.pipeline_mode<synchronous>, transform_indices = @transform_29, window_bounds = array<i64: 1, 32>}, {transform_indices = @transform_30, window_bounds = array<i64: 1, 8, 32>}]} {
    %c0 = arith.constant 0 : index
    %c0_0 = arith.constant 0 : index
    %c0_1 = arith.constant 0 : index
    %0 = vector.load %arg1[%c0, %c0_0, %c0_1] : memref<1x8x32xf32, #tpu.memory_space<vmem>>, vector<1x8x32xf32>
    %1 = vector.shape_cast %0 : vector<1x8x32xf32> to vector<8x32xf32>
    %2 = arith.truncf %1 : vector<8x32xf32> to vector<8x32xbf16>
    %c0_2 = arith.constant 0 : index
    %c0_3 = arith.constant 0 : index
    %3 = vector.load %arg4[%c0_2, %c0_3] : memref<8x8xf32, #tpu.memory_space<vmem>>, vector<8x8xf32>
    %c0_4 = arith.constant 0 : index
    %c0_5 = arith.constant 0 : index
    %c0_6 = arith.constant 0 : index
    %4 = vector.load %arg5[%c0_4, %c0_5, %c0_6] : memref<8x32x4xbf16, #tpu.memory_space<vmem>>, vector<8x32x4xbf16>
    %c0_7 = arith.constant 0 : index
    %c0_8 = arith.constant 0 : index
    %c0_9 = arith.constant 0 : index
    %5 = vector.load %arg6[%c0_7, %c0_8, %c0_9] : memref<8x1x4xf32, #tpu.memory_space<vmem>>, vector<8x1x4xf32>
    %c0_10 = arith.constant 0 : index
    %c0_11 = arith.constant 0 : index
    %c0_12 = arith.constant 0 : index
    %6 = vector.load %arg7[%c0_10, %c0_11, %c0_12] : memref<8x32x4xbf16, #tpu.memory_space<vmem>>, vector<8x32x4xbf16>
    %c0_13 = arith.constant 0 : index
    %c0_14 = arith.constant 0 : index
    %c0_15 = arith.constant 0 : index
    %7 = vector.load %arg8[%c0_13, %c0_14, %c0_15] : memref<8x1x4xf32, #tpu.memory_space<vmem>>, vector<8x1x4xf32>
    %c0_16 = arith.constant 0 : index
    %c0_17 = arith.constant 0 : index
    %c0_18 = arith.constant 0 : index
    %8 = vector.load %arg9[%c0_16, %c0_17, %c0_18] : memref<8x32x4xbf16, #tpu.memory_space<vmem>>, vector<8x32x4xbf16>
    %c0_19 = arith.constant 0 : index
    %c0_20 = arith.constant 0 : index
    %c0_21 = arith.constant 0 : index
    %9 = vector.load %arg10[%c0_19, %c0_20, %c0_21] : memref<8x1x4xf32, #tpu.memory_space<vmem>>, vector<8x1x4xf32>
    %c0_22 = arith.constant 0 : index
    %c0_23 = arith.constant 0 : index
    %10 = vector.load %arg11[%c0_22, %c0_23] : memref<32x32xbf16, #tpu.memory_space<vmem>>, vector<32x32xbf16>
    %c0_24 = arith.constant 0 : index
    %c0_25 = arith.constant 0 : index
    %11 = vector.load %arg12[%c0_24, %c0_25] : memref<1x32xf32, #tpu.memory_space<vmem>>, vector<1x32xf32>
    %12 = vector.shape_cast %2 : vector<8x32xbf16> to vector<1x8x32xbf16>
    %13 = vector.shape_cast %12 : vector<1x8x32xbf16> to vector<1x8x32xbf16>
    %14 = vector.broadcast %13 : vector<1x8x32xbf16> to vector<8x8x32xbf16>
    %15 = vector.shape_cast %2 : vector<8x32xbf16> to vector<1x8x32xbf16>
    %16 = vector.shape_cast %15 : vector<1x8x32xbf16> to vector<1x8x32xbf16>
    %17 = vector.broadcast %16 : vector<1x8x32xbf16> to vector<8x8x32xbf16>
    %18 = vector.shape_cast %2 : vector<8x32xbf16> to vector<1x8x32xbf16>
    %19 = vector.shape_cast %18 : vector<1x8x32xbf16> to vector<1x8x32xbf16>
    %20 = vector.broadcast %19 : vector<1x8x32xbf16> to vector<8x8x32xbf16>
    "tpu.trace_start"() <{level = 10 : i32, message = "hsd,hde->hse"}> : () -> ()
    %cst = arith.constant dense<0.000000e+00> : vector<8x8x4xf32>
    %21 = tpu.matmul %14, %4, %cst {dimension_numbers = #tpu.dot_dimension_numbers<[2], [1], [1], [2], [0, 0, 0, 1, 1, 2], [0], [0]>} : vector<8x8x32xbf16>, vector<8x32x4xbf16>, vector<8x8x4xf32> -> vector<8x8x4xf32>
    "tpu.trace_stop"() : () -> ()
    %22 = vector.broadcast %5 : vector<8x1x4xf32> to vector<8x8x4xf32>
    %23 = arith.addf %21, %22 : vector<8x8x4xf32>
    "tpu.trace_start"() <{level = 10 : i32, message = "hsd,hde->hse"}> : () -> ()
    %cst_26 = arith.constant dense<0.000000e+00> : vector<8x8x4xf32>
    %24 = tpu.matmul %17, %6, %cst_26 {dimension_numbers = #tpu.dot_dimension_numbers<[2], [1], [1], [2], [0, 0, 0, 1, 1, 2], [0], [0]>} : vector<8x8x32xbf16>, vector<8x32x4xbf16>, vector<8x8x4xf32> -> vector<8x8x4xf32>
    "tpu.trace_stop"() : () -> ()
    %25 = vector.broadcast %7 : vector<8x1x4xf32> to vector<8x8x4xf32>
    %26 = arith.addf %24, %25 : vector<8x8x4xf32>
    "tpu.trace_start"() <{level = 10 : i32, message = "hsd,hde->hse"}> : () -> ()
    %cst_27 = arith.constant dense<0.000000e+00> : vector<8x8x4xf32>
    %27 = tpu.matmul %20, %8, %cst_27 {dimension_numbers = #tpu.dot_dimension_numbers<[2], [1], [1], [2], [0, 0, 0, 1, 1, 2], [0], [0]>} : vector<8x8x32xbf16>, vector<8x32x4xbf16>, vector<8x8x4xf32> -> vector<8x8x4xf32>
    "tpu.trace_stop"() : () -> ()
    %28 = vector.broadcast %9 : vector<8x1x4xf32> to vector<8x8x4xf32>
    %29 = arith.addf %27, %28 : vector<8x8x4xf32>
    %30 = arith.truncf %23 : vector<8x8x4xf32> to vector<8x8x4xbf16>
    %31 = arith.truncf %26 : vector<8x8x4xf32> to vector<8x8x4xbf16>
    "tpu.trace_start"() <{level = 10 : i32, message = "hqe,hke->hqk"}> : () -> ()
    %cst_28 = arith.constant dense<0.000000e+00> : vector<8x8x8xf32>
    %32 = tpu.matmul %30, %31, %cst_28 {dimension_numbers = #tpu.dot_dimension_numbers<[2], [2], [1], [1], [0, 0, 0, 1, 1, 1], [0], [0]>} : vector<8x8x4xbf16>, vector<8x8x4xbf16>, vector<8x8x8xf32> -> vector<8x8x8xf32>
    "tpu.trace_stop"() : () -> ()
    %33 = vector.shape_cast %3 : vector<8x8xf32> to vector<1x8x8xf32>
    %34 = vector.broadcast %33 : vector<1x8x8xf32> to vector<8x8x8xf32>
    %35 = arith.addf %32, %34 : vector<8x8x8xf32>
    %cst_29 = arith.constant dense<0xFF800000> : vector<8x8xf32>
    %36 = vector.multi_reduction <maximumf>, %35, %cst_29 [2] : vector<8x8x8xf32> to vector<8x8xf32>
    %37 = vector.shape_cast %36 : vector<8x8xf32> to vector<8x8x1xf32>
    %38 = vector.broadcast %37 : vector<8x8x1xf32> to vector<8x8x8xf32>
    %39 = arith.subf %35, %38 : vector<8x8x8xf32>
    %40 = math.exp %39 : vector<8x8x8xf32>
    %cst_30 = arith.constant dense<0.000000e+00> : vector<8x8xf32>
    %41 = vector.multi_reduction <add>, %40, %cst_30 [2] : vector<8x8x8xf32> to vector<8x8xf32>
    %42 = vector.shape_cast %41 : vector<8x8xf32> to vector<8x8x1xf32>
    %43 = tpu.reciprocal %42 {approx = true} : vector<8x8x1xf32> -> vector<8x8x1xf32>
    %44 = vector.broadcast %43 : vector<8x8x1xf32> to vector<8x8x8xf32>
    %45 = arith.mulf %40, %44 : vector<8x8x8xf32>
    %46 = arith.truncf %45 : vector<8x8x8xf32> to vector<8x8x8xbf16>
    %47 = arith.truncf %29 : vector<8x8x4xf32> to vector<8x8x4xbf16>
    "tpu.trace_start"() <{level = 10 : i32, message = "hqk,hke->hqe"}> : () -> ()
    %cst_31 = arith.constant dense<0.000000e+00> : vector<8x8x4xf32>
    %48 = tpu.matmul %46, %47, %cst_31 {dimension_numbers = #tpu.dot_dimension_numbers<[2], [1], [1], [2], [0, 0, 0, 1, 1, 2], [0], [0]>} : vector<8x8x8xbf16>, vector<8x8x4xbf16>, vector<8x8x4xf32> -> vector<8x8x4xf32>
    "tpu.trace_stop"() : () -> ()
    %49 = vector.extract_strided_slice %48 {offsets = [0, 0, 0], sizes = [1, 8, 4], strides = [1, 1, 1]} : vector<8x8x4xf32> to vector<1x8x4xf32>
    %50 = vector.shape_cast %49 : vector<1x8x4xf32> to vector<8x4xf32>
    %c0_32 = arith.constant 0 : index
    %c0_33 = arith.constant 0 : index
    %51 = vector.load %arg32[%c0_32, %c0_33] : memref<8x32xf32, #tpu.memory_space<vmem>>, vector<8x4xf32>
    tpu.vector_store %arg32[%c0_32, %c0_33], %50 {strides = array<i32>} : memref<8x32xf32, #tpu.memory_space<vmem>>, vector<8x4xf32>,
    %52 = vector.extract_strided_slice %48 {offsets = [1, 0, 0], sizes = [1, 8, 4], strides = [1, 1, 1]} : vector<8x8x4xf32> to vector<1x8x4xf32>
    %53 = vector.shape_cast %52 : vector<1x8x4xf32> to vector<8x4xf32>
    %c0_34 = arith.constant 0 : index
    %c4 = arith.constant 4 : index
    %54 = vector.load %arg32[%c0_34, %c4] : memref<8x32xf32, #tpu.memory_space<vmem>>, vector<8x4xf32>
    tpu.vector_store %arg32[%c0_34, %c4], %53 {strides = array<i32>} : memref<8x32xf32, #tpu.memory_space<vmem>>, vector<8x4xf32>,
    %55 = vector.extract_strided_slice %48 {offsets = [2, 0, 0], sizes = [1, 8, 4], strides = [1, 1, 1]} : vector<8x8x4xf32> to vector<1x8x4xf32>
    %56 = vector.shape_cast %55 : vector<1x8x4xf32> to vector<8x4xf32>
    %c0_35 = arith.constant 0 : index
    %c8 = arith.constant 8 : index
    %57 = vector.load %arg32[%c0_35, %c8] : memref<8x32xf32, #tpu.memory_space<vmem>>, vector<8x4xf32>
    tpu.vector_store %arg32[%c0_35, %c8], %56 {strides = array<i32>} : memref<8x32xf32, #tpu.memory_space<vmem>>, vector<8x4xf32>,
    %58 = vector.extract_strided_slice %48 {offsets = [3, 0, 0], sizes = [1, 8, 4], strides = [1, 1, 1]} : vector<8x8x4xf32> to vector<1x8x4xf32>
    %59 = vector.shape_cast %58 : vector<1x8x4xf32> to vector<8x4xf32>
    %c0_36 = arith.constant 0 : index
    %c12 = arith.constant 12 : index
    %60 = vector.load %arg32[%c0_36, %c12] : memref<8x32xf32, #tpu.memory_space<vmem>>, vector<8x4xf32>
    tpu.vector_store %arg32[%c0_36, %c12], %59 {strides = array<i32>} : memref<8x32xf32, #tpu.memory_space<vmem>>, vector<8x4xf32>,
    %61 = vector.extract_strided_slice %48 {offsets = [4, 0, 0], sizes = [1, 8, 4], strides = [1, 1, 1]} : vector<8x8x4xf32> to vector<1x8x4xf32>
    %62 = vector.shape_cast %61 : vector<1x8x4xf32> to vector<8x4xf32>
    %c0_37 = arith.constant 0 : index
    %c16 = arith.constant 16 : index
    %63 = vector.load %arg32[%c0_37, %c16] : memref<8x32xf32, #tpu.memory_space<vmem>>, vector<8x4xf32>
    tpu.vector_store %arg32[%c0_37, %c16], %62 {strides = array<i32>} : memref<8x32xf32, #tpu.memory_space<vmem>>, vector<8x4xf32>,
    %64 = vector.extract_strided_slice %48 {offsets = [5, 0, 0], sizes = [1, 8, 4], strides = [1, 1, 1]} : vector<8x8x4xf32> to vector<1x8x4xf32>
    %65 = vector.shape_cast %64 : vector<1x8x4xf32> to vector<8x4xf32>
    %c0_38 = arith.constant 0 : index
    %c20 = arith.constant 20 : index
    %66 = vector.load %arg32[%c0_38, %c20] : memref<8x32xf32, #tpu.memory_space<vmem>>, vector<8x4xf32>
    tpu.vector_store %arg32[%c0_38, %c20], %65 {strides = array<i32>} : memref<8x32xf32, #tpu.memory_space<vmem>>, vector<8x4xf32>,
    %67 = vector.extract_strided_slice %48 {offsets = [6, 0, 0], sizes = [1, 8, 4], strides = [1, 1, 1]} : vector<8x8x4xf32> to vector<1x8x4xf32>
    %68 = vector.shape_cast %67 : vector<1x8x4xf32> to vector<8x4xf32>
    %c0_39 = arith.constant 0 : index
    %c24 = arith.constant 24 : index
    %69 = vector.load %arg32[%c0_39, %c24] : memref<8x32xf32, #tpu.memory_space<vmem>>, vector<8x4xf32>
    tpu.vector_store %arg32[%c0_39, %c24], %68 {strides = array<i32>} : memref<8x32xf32, #tpu.memory_space<vmem>>, vector<8x4xf32>,
    %70 = vector.extract_strided_slice %48 {offsets = [7, 0, 0], sizes = [1, 8, 4], strides = [1, 1, 1]} : vector<8x8x4xf32> to vector<1x8x4xf32>
    %71 = vector.shape_cast %70 : vector<1x8x4xf32> to vector<8x4xf32>
    %c0_40 = arith.constant 0 : index
    %c28 = arith.constant 28 : index
    %72 = vector.load %arg32[%c0_40, %c28] : memref<8x32xf32, #tpu.memory_space<vmem>>, vector<8x4xf32>
    tpu.vector_store %arg32[%c0_40, %c28], %71 {strides = array<i32>} : memref<8x32xf32, #tpu.memory_space<vmem>>, vector<8x4xf32>,
    %c0_41 = arith.constant 0 : index
    %c0_42 = arith.constant 0 : index
    %73 = vector.load %arg32[%c0_41, %c0_42] : memref<8x32xf32, #tpu.memory_space<vmem>>, vector<8x32xf32>
    %74 = arith.truncf %73 : vector<8x32xf32> to vector<8x32xbf16>
    %cst_43 = arith.constant dense<0.000000e+00> : vector<8x32xf32>
    %75 = tpu.matmul %74, %10, %cst_43 {dimension_numbers = #tpu.dot_dimension_numbers<[1], [0], [0], [1], [0, 0, 1, 1], [], []>} : vector<8x32xbf16>, vector<32x32xbf16>, vector<8x32xf32> -> vector<8x32xf32>
    %76 = vector.broadcast %11 : vector<1x32xf32> to vector<8x32xf32>
    %77 = arith.addf %75, %76 : vector<8x32xf32>
    %c0_44 = arith.constant 0 : index
    %c0_45 = arith.constant 0 : index
    %78 = vector.load %arg13[%c0_44, %c0_45] : memref<1x32xf32, #tpu.memory_space<vmem>>, vector<1x32xf32>
    %c0_46 = arith.constant 0 : index
    %c0_47 = arith.constant 0 : index
    %79 = vector.load %arg14[%c0_46, %c0_47] : memref<1x32xf32, #tpu.memory_space<vmem>>, vector<1x32xf32>
    %80 = arith.addf %77, %1 : vector<8x32xf32>
    %cst_48 = arith.constant dense<0.000000e+00> : vector<8xf32>
    %81 = vector.multi_reduction <add>, %80, %cst_48 [1] : vector<8x32xf32> to vector<8xf32>
    %82 = vector.shape_cast %81 : vector<8xf32> to vector<8x1xf32>
    %cst_49 = arith.constant 3.200000e+01 : f32
    %83 = vector.broadcast %cst_49 : f32 to vector<8x1xf32>
    %84 = arith.divf %82, %83 : vector<8x1xf32>
    %85 = vector.broadcast %84 : vector<8x1xf32> to vector<8x32xf32>
    %86 = arith.subf %80, %85 : vector<8x32xf32>
    %87 = arith.mulf %86, %86 : vector<8x32xf32>
    %cst_50 = arith.constant dense<0.000000e+00> : vector<8xf32>
    %88 = vector.multi_reduction <add>, %87, %cst_50 [1] : vector<8x32xf32> to vector<8xf32>
    %89 = vector.shape_cast %88 : vector<8xf32> to vector<8x1xf32>
    %cst_51 = arith.constant 3.200000e+01 : f32
    %90 = vector.broadcast %cst_51 : f32 to vector<8x1xf32>
    %91 = arith.divf %89, %90 : vector<8x1xf32>
    %92 = vector.broadcast %84 : vector<8x1xf32> to vector<8x32xf32>
    %93 = arith.subf %80, %92 : vector<8x32xf32>
    %cst_52 = arith.constant 9.99999974E-6 : f32
    %94 = vector.broadcast %cst_52 : f32 to vector<8x1xf32>
    %95 = arith.addf %91, %94 : vector<8x1xf32>
    %96 = math.rsqrt %95 : vector<8x1xf32>
    %97 = vector.broadcast %96 : vector<8x1xf32> to vector<8x32xf32>
    %98 = arith.mulf %93, %97 : vector<8x32xf32>
    %99 = vector.broadcast %78 : vector<1x32xf32> to vector<8x32xf32>
    %100 = arith.mulf %98, %99 : vector<8x32xf32>
    %101 = vector.broadcast %79 : vector<1x32xf32> to vector<8x32xf32>
    %102 = arith.addf %100, %101 : vector<8x32xf32>
    %103 = arith.truncf %102 : vector<8x32xf32> to vector<8x32xbf16>
    %c0_53 = arith.constant 0 : index
    %c0_54 = arith.constant 0 : index
    %c0_55 = arith.constant 0 : index
    %104 = vector.load %arg2[%c0_53, %c0_54, %c0_55] : memref<1x8x32xf32, #tpu.memory_space<vmem>>, vector<1x8x32xf32>
    %105 = vector.shape_cast %104 : vector<1x8x32xf32> to vector<8x32xf32>
    %106 = arith.truncf %105 : vector<8x32xf32> to vector<8x32xbf16>
    %c0_56 = arith.constant 0 : index
    %c0_57 = arith.constant 0 : index
    %c0_58 = arith.constant 0 : index
    %107 = vector.load %arg3[%c0_56, %c0_57, %c0_58] : memref<1x8x32xf32, #tpu.memory_space<vmem>>, vector<1x8x32xf32>
    %108 = vector.shape_cast %107 : vector<1x8x32xf32> to vector<8x32xf32>
    %109 = arith.truncf %108 : vector<8x32xf32> to vector<8x32xbf16>
    %c0_59 = arith.constant 0 : index
    %c0_60 = arith.constant 0 : index
    %c0_61 = arith.constant 0 : index
    %110 = vector.load %arg15[%c0_59, %c0_60, %c0_61] : memref<8x32x4xbf16, #tpu.memory_space<vmem>>, vector<8x32x4xbf16>
    %c0_62 = arith.constant 0 : index
    %c0_63 = arith.constant 0 : index
    %c0_64 = arith.constant 0 : index
    %111 = vector.load %arg16[%c0_62, %c0_63, %c0_64] : memref<8x1x4xf32, #tpu.memory_space<vmem>>, vector<8x1x4xf32>
    %c0_65 = arith.constant 0 : index
    %c0_66 = arith.constant 0 : index
    %c0_67 = arith.constant 0 : index
    %112 = vector.load %arg17[%c0_65, %c0_66, %c0_67] : memref<8x32x4xbf16, #tpu.memory_space<vmem>>, vector<8x32x4xbf16>
    %c0_68 = arith.constant 0 : index
    %c0_69 = arith.constant 0 : index
    %c0_70 = arith.constant 0 : index
    %113 = vector.load %arg18[%c0_68, %c0_69, %c0_70] : memref<8x1x4xf32, #tpu.memory_space<vmem>>, vector<8x1x4xf32>
    %c0_71 = arith.constant 0 : index
    %c0_72 = arith.constant 0 : index
    %c0_73 = arith.constant 0 : index
    %114 = vector.load %arg19[%c0_71, %c0_72, %c0_73] : memref<8x32x4xbf16, #tpu.memory_space<vmem>>, vector<8x32x4xbf16>
    %c0_74 = arith.constant 0 : index
    %c0_75 = arith.constant 0 : index
    %c0_76 = arith.constant 0 : index
    %115 = vector.load %arg20[%c0_74, %c0_75, %c0_76] : memref<8x1x4xf32, #tpu.memory_space<vmem>>, vector<8x1x4xf32>
    %c0_77 = arith.constant 0 : index
    %c0_78 = arith.constant 0 : index
    %116 = vector.load %arg21[%c0_77, %c0_78] : memref<32x32xbf16, #tpu.memory_space<vmem>>, vector<32x32xbf16>
    %c0_79 = arith.constant 0 : index
    %c0_80 = arith.constant 0 : index
    %117 = vector.load %arg22[%c0_79, %c0_80] : memref<1x32xf32, #tpu.memory_space<vmem>>, vector<1x32xf32>
    %118 = vector.shape_cast %103 : vector<8x32xbf16> to vector<1x8x32xbf16>
    %119 = vector.shape_cast %118 : vector<1x8x32xbf16> to vector<1x8x32xbf16>
    %120 = vector.broadcast %119 : vector<1x8x32xbf16> to vector<8x8x32xbf16>
    %121 = vector.shape_cast %106 : vector<8x32xbf16> to vector<1x8x32xbf16>
    %122 = vector.shape_cast %121 : vector<1x8x32xbf16> to vector<1x8x32xbf16>
    %123 = vector.broadcast %122 : vector<1x8x32xbf16> to vector<8x8x32xbf16>
    %124 = vector.shape_cast %109 : vector<8x32xbf16> to vector<1x8x32xbf16>
    %125 = vector.shape_cast %124 : vector<1x8x32xbf16> to vector<1x8x32xbf16>
    %126 = vector.broadcast %125 : vector<1x8x32xbf16> to vector<8x8x32xbf16>
    "tpu.trace_start"() <{level = 10 : i32, message = "hsd,hde->hse"}> : () -> ()
    %cst_81 = arith.constant dense<0.000000e+00> : vector<8x8x4xf32>
    %127 = tpu.matmul %120, %110, %cst_81 {dimension_numbers = #tpu.dot_dimension_numbers<[2], [1], [1], [2], [0, 0, 0, 1, 1, 2], [0], [0]>} : vector<8x8x32xbf16>, vector<8x32x4xbf16>, vector<8x8x4xf32> -> vector<8x8x4xf32>
    "tpu.trace_stop"() : () -> ()
    %128 = vector.broadcast %111 : vector<8x1x4xf32> to vector<8x8x4xf32>
    %129 = arith.addf %127, %128 : vector<8x8x4xf32>
    "tpu.trace_start"() <{level = 10 : i32, message = "hsd,hde->hse"}> : () -> ()
    %cst_82 = arith.constant dense<0.000000e+00> : vector<8x8x4xf32>
    %130 = tpu.matmul %123, %112, %cst_82 {dimension_numbers = #tpu.dot_dimension_numbers<[2], [1], [1], [2], [0, 0, 0, 1, 1, 2], [0], [0]>} : vector<8x8x32xbf16>, vector<8x32x4xbf16>, vector<8x8x4xf32> -> vector<8x8x4xf32>
    "tpu.trace_stop"() : () -> ()
    %131 = vector.broadcast %113 : vector<8x1x4xf32> to vector<8x8x4xf32>
    %132 = arith.addf %130, %131 : vector<8x8x4xf32>
    "tpu.trace_start"() <{level = 10 : i32, message = "hsd,hde->hse"}> : () -> ()
    %cst_83 = arith.constant dense<0.000000e+00> : vector<8x8x4xf32>
    %133 = tpu.matmul %126, %114, %cst_83 {dimension_numbers = #tpu.dot_dimension_numbers<[2], [1], [1], [2], [0, 0, 0, 1, 1, 2], [0], [0]>} : vector<8x8x32xbf16>, vector<8x32x4xbf16>, vector<8x8x4xf32> -> vector<8x8x4xf32>
    "tpu.trace_stop"() : () -> ()
    %134 = vector.broadcast %115 : vector<8x1x4xf32> to vector<8x8x4xf32>
    %135 = arith.addf %133, %134 : vector<8x8x4xf32>
    %136 = arith.truncf %129 : vector<8x8x4xf32> to vector<8x8x4xbf16>
    %137 = arith.truncf %132 : vector<8x8x4xf32> to vector<8x8x4xbf16>
    "tpu.trace_start"() <{level = 10 : i32, message = "hqe,hke->hqk"}> : () -> ()
    %cst_84 = arith.constant dense<0.000000e+00> : vector<8x8x8xf32>
    %138 = tpu.matmul %136, %137, %cst_84 {dimension_numbers = #tpu.dot_dimension_numbers<[2], [2], [1], [1], [0, 0, 0, 1, 1, 1], [0], [0]>} : vector<8x8x4xbf16>, vector<8x8x4xbf16>, vector<8x8x8xf32> -> vector<8x8x8xf32>
    "tpu.trace_stop"() : () -> ()
    %cst_85 = arith.constant dense<0xFF800000> : vector<8x8xf32>
    %139 = vector.multi_reduction <maximumf>, %138, %cst_85 [2] : vector<8x8x8xf32> to vector<8x8xf32>
    %140 = vector.shape_cast %139 : vector<8x8xf32> to vector<8x8x1xf32>
    %141 = vector.broadcast %140 : vector<8x8x1xf32> to vector<8x8x8xf32>
    %142 = arith.subf %138, %141 : vector<8x8x8xf32>
    %143 = math.exp %142 : vector<8x8x8xf32>
    %cst_86 = arith.constant dense<0.000000e+00> : vector<8x8xf32>
    %144 = vector.multi_reduction <add>, %143, %cst_86 [2] : vector<8x8x8xf32> to vector<8x8xf32>
    %145 = vector.shape_cast %144 : vector<8x8xf32> to vector<8x8x1xf32>
    %146 = tpu.reciprocal %145 {approx = true} : vector<8x8x1xf32> -> vector<8x8x1xf32>
    %147 = vector.broadcast %146 : vector<8x8x1xf32> to vector<8x8x8xf32>
    %148 = arith.mulf %143, %147 : vector<8x8x8xf32>
    %149 = arith.truncf %148 : vector<8x8x8xf32> to vector<8x8x8xbf16>
    %150 = arith.truncf %135 : vector<8x8x4xf32> to vector<8x8x4xbf16>
    "tpu.trace_start"() <{level = 10 : i32, message = "hqk,hke->hqe"}> : () -> ()
    %cst_87 = arith.constant dense<0.000000e+00> : vector<8x8x4xf32>
    %151 = tpu.matmul %149, %150, %cst_87 {dimension_numbers = #tpu.dot_dimension_numbers<[2], [1], [1], [2], [0, 0, 0, 1, 1, 2], [0], [0]>} : vector<8x8x8xbf16>, vector<8x8x4xbf16>, vector<8x8x4xf32> -> vector<8x8x4xf32>
    "tpu.trace_stop"() : () -> ()
    %152 = vector.extract_strided_slice %151 {offsets = [0, 0, 0], sizes = [1, 8, 4], strides = [1, 1, 1]} : vector<8x8x4xf32> to vector<1x8x4xf32>
    %153 = vector.shape_cast %152 : vector<1x8x4xf32> to vector<8x4xf32>
    %c0_88 = arith.constant 0 : index
    %c0_89 = arith.constant 0 : index
    %154 = vector.load %arg32[%c0_88, %c0_89] : memref<8x32xf32, #tpu.memory_space<vmem>>, vector<8x4xf32>
    tpu.vector_store %arg32[%c0_88, %c0_89], %153 {strides = array<i32>} : memref<8x32xf32, #tpu.memory_space<vmem>>, vector<8x4xf32>,
    %155 = vector.extract_strided_slice %151 {offsets = [1, 0, 0], sizes = [1, 8, 4], strides = [1, 1, 1]} : vector<8x8x4xf32> to vector<1x8x4xf32>
    %156 = vector.shape_cast %155 : vector<1x8x4xf32> to vector<8x4xf32>
    %c0_90 = arith.constant 0 : index
    %c4_91 = arith.constant 4 : index
    %157 = vector.load %arg32[%c0_90, %c4_91] : memref<8x32xf32, #tpu.memory_space<vmem>>, vector<8x4xf32>
    tpu.vector_store %arg32[%c0_90, %c4_91], %156 {strides = array<i32>} : memref<8x32xf32, #tpu.memory_space<vmem>>, vector<8x4xf32>,
    %158 = vector.extract_strided_slice %151 {offsets = [2, 0, 0], sizes = [1, 8, 4], strides = [1, 1, 1]} : vector<8x8x4xf32> to vector<1x8x4xf32>
    %159 = vector.shape_cast %158 : vector<1x8x4xf32> to vector<8x4xf32>
    %c0_92 = arith.constant 0 : index
    %c8_93 = arith.constant 8 : index
    %160 = vector.load %arg32[%c0_92, %c8_93] : memref<8x32xf32, #tpu.memory_space<vmem>>, vector<8x4xf32>
    tpu.vector_store %arg32[%c0_92, %c8_93], %159 {strides = array<i32>} : memref<8x32xf32, #tpu.memory_space<vmem>>, vector<8x4xf32>,
    %161 = vector.extract_strided_slice %151 {offsets = [3, 0, 0], sizes = [1, 8, 4], strides = [1, 1, 1]} : vector<8x8x4xf32> to vector<1x8x4xf32>
    %162 = vector.shape_cast %161 : vector<1x8x4xf32> to vector<8x4xf32>
    %c0_94 = arith.constant 0 : index
    %c12_95 = arith.constant 12 : index
    %163 = vector.load %arg32[%c0_94, %c12_95] : memref<8x32xf32, #tpu.memory_space<vmem>>, vector<8x4xf32>
    tpu.vector_store %arg32[%c0_94, %c12_95], %162 {strides = array<i32>} : memref<8x32xf32, #tpu.memory_space<vmem>>, vector<8x4xf32>,
    %164 = vector.extract_strided_slice %151 {offsets = [4, 0, 0], sizes = [1, 8, 4], strides = [1, 1, 1]} : vector<8x8x4xf32> to vector<1x8x4xf32>
    %165 = vector.shape_cast %164 : vector<1x8x4xf32> to vector<8x4xf32>
    %c0_96 = arith.constant 0 : index
    %c16_97 = arith.constant 16 : index
    %166 = vector.load %arg32[%c0_96, %c16_97] : memref<8x32xf32, #tpu.memory_space<vmem>>, vector<8x4xf32>
    tpu.vector_store %arg32[%c0_96, %c16_97], %165 {strides = array<i32>} : memref<8x32xf32, #tpu.memory_space<vmem>>, vector<8x4xf32>,
    %167 = vector.extract_strided_slice %151 {offsets = [5, 0, 0], sizes = [1, 8, 4], strides = [1, 1, 1]} : vector<8x8x4xf32> to vector<1x8x4xf32>
    %168 = vector.shape_cast %167 : vector<1x8x4xf32> to vector<8x4xf32>
    %c0_98 = arith.constant 0 : index
    %c20_99 = arith.constant 20 : index
    %169 = vector.load %arg32[%c0_98, %c20_99] : memref<8x32xf32, #tpu.memory_space<vmem>>, vector<8x4xf32>
    tpu.vector_store %arg32[%c0_98, %c20_99], %168 {strides = array<i32>} : memref<8x32xf32, #tpu.memory_space<vmem>>, vector<8x4xf32>,
    %170 = vector.extract_strided_slice %151 {offsets = [6, 0, 0], sizes = [1, 8, 4], strides = [1, 1, 1]} : vector<8x8x4xf32> to vector<1x8x4xf32>
    %171 = vector.shape_cast %170 : vector<1x8x4xf32> to vector<8x4xf32>
    %c0_100 = arith.constant 0 : index
    %c24_101 = arith.constant 24 : index
    %172 = vector.load %arg32[%c0_100, %c24_101] : memref<8x32xf32, #tpu.memory_space<vmem>>, vector<8x4xf32>
    tpu.vector_store %arg32[%c0_100, %c24_101], %171 {strides = array<i32>} : memref<8x32xf32, #tpu.memory_space<vmem>>, vector<8x4xf32>,
    %173 = vector.extract_strided_slice %151 {offsets = [7, 0, 0], sizes = [1, 8, 4], strides = [1, 1, 1]} : vector<8x8x4xf32> to vector<1x8x4xf32>
    %174 = vector.shape_cast %173 : vector<1x8x4xf32> to vector<8x4xf32>
    %c0_102 = arith.constant 0 : index
    %c28_103 = arith.constant 28 : index
    %175 = vector.load %arg32[%c0_102, %c28_103] : memref<8x32xf32, #tpu.memory_space<vmem>>, vector<8x4xf32>
    tpu.vector_store %arg32[%c0_102, %c28_103], %174 {strides = array<i32>} : memref<8x32xf32, #tpu.memory_space<vmem>>, vector<8x4xf32>,
    %c0_104 = arith.constant 0 : index
    %c0_105 = arith.constant 0 : index
    %176 = vector.load %arg32[%c0_104, %c0_105] : memref<8x32xf32, #tpu.memory_space<vmem>>, vector<8x32xf32>
    %177 = arith.truncf %176 : vector<8x32xf32> to vector<8x32xbf16>
    %cst_106 = arith.constant dense<0.000000e+00> : vector<8x32xf32>
    %178 = tpu.matmul %177, %116, %cst_106 {dimension_numbers = #tpu.dot_dimension_numbers<[1], [0], [0], [1], [0, 0, 1, 1], [], []>} : vector<8x32xbf16>, vector<32x32xbf16>, vector<8x32xf32> -> vector<8x32xf32>
    %179 = vector.broadcast %117 : vector<1x32xf32> to vector<8x32xf32>
    %180 = arith.addf %178, %179 : vector<8x32xf32>
    %c0_107 = arith.constant 0 : index
    %c0_108 = arith.constant 0 : index
    %181 = vector.load %arg23[%c0_107, %c0_108] : memref<1x32xf32, #tpu.memory_space<vmem>>, vector<1x32xf32>
    %c0_109 = arith.constant 0 : index
    %c0_110 = arith.constant 0 : index
    %182 = vector.load %arg24[%c0_109, %c0_110] : memref<1x32xf32, #tpu.memory_space<vmem>>, vector<1x32xf32>
    %183 = arith.addf %180, %102 : vector<8x32xf32>
    %cst_111 = arith.constant dense<0.000000e+00> : vector<8xf32>
    %184 = vector.multi_reduction <add>, %183, %cst_111 [1] : vector<8x32xf32> to vector<8xf32>
    %185 = vector.shape_cast %184 : vector<8xf32> to vector<8x1xf32>
    %cst_112 = arith.constant 3.200000e+01 : f32
    %186 = vector.broadcast %cst_112 : f32 to vector<8x1xf32>
    %187 = arith.divf %185, %186 : vector<8x1xf32>
    %188 = vector.broadcast %187 : vector<8x1xf32> to vector<8x32xf32>
    %189 = arith.subf %183, %188 : vector<8x32xf32>
    %190 = arith.mulf %189, %189 : vector<8x32xf32>
    %cst_113 = arith.constant dense<0.000000e+00> : vector<8xf32>
    %191 = vector.multi_reduction <add>, %190, %cst_113 [1] : vector<8x32xf32> to vector<8xf32>
    %192 = vector.shape_cast %191 : vector<8xf32> to vector<8x1xf32>
    %cst_114 = arith.constant 3.200000e+01 : f32
    %193 = vector.broadcast %cst_114 : f32 to vector<8x1xf32>
    %194 = arith.divf %192, %193 : vector<8x1xf32>
    %195 = vector.broadcast %187 : vector<8x1xf32> to vector<8x32xf32>
    %196 = arith.subf %183, %195 : vector<8x32xf32>
    %cst_115 = arith.constant 9.99999974E-6 : f32
    %197 = vector.broadcast %cst_115 : f32 to vector<8x1xf32>
    %198 = arith.addf %194, %197 : vector<8x1xf32>
    %199 = math.rsqrt %198 : vector<8x1xf32>
    %200 = vector.broadcast %199 : vector<8x1xf32> to vector<8x32xf32>
    %201 = arith.mulf %196, %200 : vector<8x32xf32>
    %202 = vector.broadcast %181 : vector<1x32xf32> to vector<8x32xf32>
    %203 = arith.mulf %201, %202 : vector<8x32xf32>
    %204 = vector.broadcast %182 : vector<1x32xf32> to vector<8x32xf32>
    %205 = arith.addf %203, %204 : vector<8x32xf32>
    %206 = arith.truncf %205 : vector<8x32xf32> to vector<8x32xbf16>
    %c0_116 = arith.constant 0 : index
    %c0_117 = arith.constant 0 : index
    %207 = vector.load %arg25[%c0_116, %c0_117] : memref<32x128xbf16, #tpu.memory_space<vmem>>, vector<32x128xbf16>
    %cst_118 = arith.constant dense<0.000000e+00> : vector<8x128xf32>
    %208 = tpu.matmul %206, %207, %cst_118 {dimension_numbers = #tpu.dot_dimension_numbers<[1], [0], [0], [1], [0, 0, 1, 1], [], []>} : vector<8x32xbf16>, vector<32x128xbf16>, vector<8x128xf32> -> vector<8x128xf32>
    %c0_119 = arith.constant 0 : index
    %c0_120 = arith.constant 0 : index
    %209 = vector.load %arg26[%c0_119, %c0_120] : memref<1x128xf32, #tpu.memory_space<vmem>>, vector<1x128xf32>
    %210 = vector.broadcast %209 : vector<1x128xf32> to vector<8x128xf32>
    %211 = arith.addf %208, %210 : vector<8x128xf32>
    %cst_121 = arith.constant 0.000000e+00 : f32
    %212 = vector.broadcast %cst_121 : f32 to vector<8x128xf32>
    %213 = arith.maximumf %211, %212 : vector<8x128xf32>
    %214 = arith.truncf %213 : vector<8x128xf32> to vector<8x128xbf16>
    %c0_122 = arith.constant 0 : index
    %c0_123 = arith.constant 0 : index
    %215 = vector.load %arg27[%c0_122, %c0_123] : memref<128x32xbf16, #tpu.memory_space<vmem>>, vector<128x32xbf16>
    %cst_124 = arith.constant dense<0.000000e+00> : vector<8x32xf32>
    %216 = tpu.matmul %214, %215, %cst_124 {dimension_numbers = #tpu.dot_dimension_numbers<[1], [0], [0], [1], [0, 0, 1, 1], [], []>} : vector<8x128xbf16>, vector<128x32xbf16>, vector<8x32xf32> -> vector<8x32xf32>
    %c0_125 = arith.constant 0 : index
    %c0_126 = arith.constant 0 : index
    %217 = vector.load %arg28[%c0_125, %c0_126] : memref<1x32xf32, #tpu.memory_space<vmem>>, vector<1x32xf32>
    %218 = vector.broadcast %217 : vector<1x32xf32> to vector<8x32xf32>
    %219 = arith.addf %216, %218 : vector<8x32xf32>
    %c0_127 = arith.constant 0 : index
    %c0_128 = arith.constant 0 : index
    %220 = vector.load %arg29[%c0_127, %c0_128] : memref<1x32xf32, #tpu.memory_space<vmem>>, vector<1x32xf32>
    %c0_129 = arith.constant 0 : index
    %c0_130 = arith.constant 0 : index
    %221 = vector.load %arg30[%c0_129, %c0_130] : memref<1x32xf32, #tpu.memory_space<vmem>>, vector<1x32xf32>
    %222 = arith.addf %219, %205 : vector<8x32xf32>
    %cst_131 = arith.constant dense<0.000000e+00> : vector<8xf32>
    %223 = vector.multi_reduction <add>, %222, %cst_131 [1] : vector<8x32xf32> to vector<8xf32>
    %224 = vector.shape_cast %223 : vector<8xf32> to vector<8x1xf32>
    %cst_132 = arith.constant 3.200000e+01 : f32
    %225 = vector.broadcast %cst_132 : f32 to vector<8x1xf32>
    %226 = arith.divf %224, %225 : vector<8x1xf32>
    %227 = vector.broadcast %226 : vector<8x1xf32> to vector<8x32xf32>
    %228 = arith.subf %222, %227 : vector<8x32xf32>
    %229 = arith.mulf %228, %228 : vector<8x32xf32>
    %cst_133 = arith.constant dense<0.000000e+00> : vector<8xf32>
    %230 = vector.multi_reduction <add>, %229, %cst_133 [1] : vector<8x32xf32> to vector<8xf32>
    %231 = vector.shape_cast %230 : vector<8xf32> to vector<8x1xf32>
    %cst_134 = arith.constant 3.200000e+01 : f32
    %232 = vector.broadcast %cst_134 : f32 to vector<8x1xf32>
    %233 = arith.divf %231, %232 : vector<8x1xf32>
    %234 = vector.broadcast %226 : vector<8x1xf32> to vector<8x32xf32>
    %235 = arith.subf %222, %234 : vector<8x32xf32>
    %cst_135 = arith.constant 9.99999974E-6 : f32
    %236 = vector.broadcast %cst_135 : f32 to vector<8x1xf32>
    %237 = arith.addf %233, %236 : vector<8x1xf32>
    %238 = math.rsqrt %237 : vector<8x1xf32>
    %239 = vector.broadcast %238 : vector<8x1xf32> to vector<8x32xf32>
    %240 = arith.mulf %235, %239 : vector<8x32xf32>
    %241 = vector.broadcast %220 : vector<1x32xf32> to vector<8x32xf32>
    %242 = arith.mulf %240, %241 : vector<8x32xf32>
    %243 = vector.broadcast %221 : vector<1x32xf32> to vector<8x32xf32>
    %244 = arith.addf %242, %243 : vector<8x32xf32>
    %c0_136 = arith.constant 0 : index
    %c0_137 = arith.constant 0 : index
    %c0_138 = arith.constant 0 : index
    %245 = vector.load %arg31[%c0_136, %c0_137, %c0_138] : memref<1x8x32xf32, #tpu.memory_space<vmem>>, vector<1x8x32xf32>
    %246 = vector.shape_cast %245 : vector<1x8x32xf32> to vector<8x32xf32>
    %247 = vector.shape_cast %244 : vector<8x32xf32> to vector<1x8x32xf32>
    tpu.vector_store %arg31[%c0_136, %c0_137, %c0_138], %247 {strides = array<i32>} : memref<1x8x32xf32, #tpu.memory_space<vmem>>, vector<1x8x32xf32>,
    return
  }
  func.func @transform_0(%arg0: i32) -> (i32, i32, i32) {
    %c0_i32 = arith.constant 0 : i32
    %c0_i32_0 = arith.constant 0 : i32
    %c0_i32_1 = arith.constant 0 : i32
    return %arg0, %c0_i32, %c0_i32_0 : i32, i32, i32
  }
  func.func @transform_1(%arg0: i32) -> (i32, i32, i32) {
    %c0_i32 = arith.constant 0 : i32
    %c0_i32_0 = arith.constant 0 : i32
    %c0_i32_1 = arith.constant 0 : i32
    return %arg0, %c0_i32, %c0_i32_0 : i32, i32, i32
  }
  func.func @transform_2(%arg0: i32) -> (i32, i32, i32) {
    %c0_i32 = arith.constant 0 : i32
    %c0_i32_0 = arith.constant 0 : i32
    %c0_i32_1 = arith.constant 0 : i32
    return %arg0, %c0_i32, %c0_i32_0 : i32, i32, i32
  }
  func.func @transform_3(%arg0: i32) -> (i32, i32) {
    %c0_i32 = arith.constant 0 : i32
    %c0_i32_0 = arith.constant 0 : i32
    %c0_i32_1 = arith.constant 0 : i32
    return %c0_i32, %c0_i32_0 : i32, i32
  }
  func.func @transform_4(%arg0: i32) -> (i32, i32, i32) {
    %c0_i32 = arith.constant 0 : i32
    %c0_i32_0 = arith.constant 0 : i32
    %c0_i32_1 = arith.constant 0 : i32
    %c0_i32_2 = arith.constant 0 : i32
    return %c0_i32, %c0_i32_0, %c0_i32_1 : i32, i32, i32
  }
  func.func @transform_5(%arg0: i32) -> (i32, i32, i32) {
    %c0_i32 = arith.constant 0 : i32
    %c0_i32_0 = arith.constant 0 : i32
    %c0_i32_1 = arith.constant 0 : i32
    %c0_i32_2 = arith.constant 0 : i32
    return %c0_i32, %c0_i32_0, %c0_i32_1 : i32, i32, i32
  }
  func.func @transform_6(%arg0: i32) -> (i32, i32, i32) {
    %c0_i32 = arith.constant 0 : i32
    %c0_i32_0 = arith.constant 0 : i32
    %c0_i32_1 = arith.constant 0 : i32
    %c0_i32_2 = arith.constant 0 : i32
    return %c0_i32, %c0_i32_0, %c0_i32_1 : i32, i32, i32
  }
  func.func @transform_7(%arg0: i32) -> (i32, i32, i32) {
    %c0_i32 = arith.constant 0 : i32
    %c0_i32_0 = arith.constant 0 : i32
    %c0_i32_1 = arith.constant 0 : i32
    %c0_i32_2 = arith.constant 0 : i32
    return %c0_i32, %c0_i32_0, %c0_i32_1 : i32, i32, i32
  }
  func.func @transform_8(%arg0: i32) -> (i32, i32, i32) {
    %c0_i32 = arith.constant 0 : i32
    %c0_i32_0 = arith.constant 0 : i32
    %c0_i32_1 = arith.constant 0 : i32
    %c0_i32_2 = arith.constant 0 : i32
    return %c0_i32, %c0_i32_0, %c0_i32_1 : i32, i32, i32
  }
  func.func @transform_9(%arg0: i32) -> (i32, i32, i32) {
    %c0_i32 = arith.constant 0 : i32
    %c0_i32_0 = arith.constant 0 : i32
    %c0_i32_1 = arith.constant 0 : i32
    %c0_i32_2 = arith.constant 0 : i32
    return %c0_i32, %c0_i32_0, %c0_i32_1 : i32, i32, i32
  }
  func.func @transform_10(%arg0: i32) -> (i32, i32) {
    %c0_i32 = arith.constant 0 : i32
    %c0_i32_0 = arith.constant 0 : i32
    %c0_i32_1 = arith.constant 0 : i32
    return %c0_i32, %c0_i32_0 : i32, i32
  }
  func.func @transform_11(%arg0: i32) -> (i32, i32) {
    %c0_i32 = arith.constant 0 : i32
    %c0_i32_0 = arith.constant 0 : i32
    %c0_i32_1 = arith.constant 0 : i32
    return %c0_i32, %c0_i32_0 : i32, i32
  }
  func.func @transform_12(%arg0: i32) -> (i32, i32) {
    %c0_i32 = arith.constant 0 : i32
    %c0_i32_0 = arith.constant 0 : i32
    %c0_i32_1 = arith.constant 0 : i32
    return %c0_i32, %c0_i32_0 : i32, i32
  }
  func.func @transform_13(%arg0: i32) -> (i32, i32) {
    %c0_i32 = arith.constant 0 : i32
    %c0_i32_0 = arith.constant 0 : i32
    %c0_i32_1 = arith.constant 0 : i32
    return %c0_i32, %c0_i32_0 : i32, i32
  }
  func.func @transform_14(%arg0: i32) -> (i32, i32, i32) {
    %c0_i32 = arith.constant 0 : i32
    %c0_i32_0 = arith.constant 0 : i32
    %c0_i32_1 = arith.constant 0 : i32
    %c0_i32_2 = arith.constant 0 : i32
    return %c0_i32, %c0_i32_0, %c0_i32_1 : i32, i32, i32
  }
  func.func @transform_15(%arg0: i32) -> (i32, i32, i32) {
    %c0_i32 = arith.constant 0 : i32
    %c0_i32_0 = arith.constant 0 : i32
    %c0_i32_1 = arith.constant 0 : i32
    %c0_i32_2 = arith.constant 0 : i32
    return %c0_i32, %c0_i32_0, %c0_i32_1 : i32, i32, i32
  }
  func.func @transform_16(%arg0: i32) -> (i32, i32, i32) {
    %c0_i32 = arith.constant 0 : i32
    %c0_i32_0 = arith.constant 0 : i32
    %c0_i32_1 = arith.constant 0 : i32
    %c0_i32_2 = arith.constant 0 : i32
    return %c0_i32, %c0_i32_0, %c0_i32_1 : i32, i32, i32
  }
  func.func @transform_17(%arg0: i32) -> (i32, i32, i32) {
    %c0_i32 = arith.constant 0 : i32
    %c0_i32_0 = arith.constant 0 : i32
    %c0_i32_1 = arith.constant 0 : i32
    %c0_i32_2 = arith.constant 0 : i32
    return %c0_i32, %c0_i32_0, %c0_i32_1 : i32, i32, i32
  }
  func.func @transform_18(%arg0: i32) -> (i32, i32, i32) {
    %c0_i32 = arith.constant 0 : i32
    %c0_i32_0 = arith.constant 0 : i32
    %c0_i32_1 = arith.constant 0 : i32
    %c0_i32_2 = arith.constant 0 : i32
    return %c0_i32, %c0_i32_0, %c0_i32_1 : i32, i32, i32
  }
  func.func @transform_19(%arg0: i32) -> (i32, i32, i32) {
    %c0_i32 = arith.constant 0 : i32
    %c0_i32_0 = arith.constant 0 : i32
    %c0_i32_1 = arith.constant 0 : i32
    %c0_i32_2 = arith.constant 0 : i32
    return %c0_i32, %c0_i32_0, %c0_i32_1 : i32, i32, i32
  }
  func.func @transform_20(%arg0: i32) -> (i32, i32) {
    %c0_i32 = arith.constant 0 : i32
    %c0_i32_0 = arith.constant 0 : i32
    %c0_i32_1 = arith.constant 0 : i32
    return %c0_i32, %c0_i32_0 : i32, i32
  }
  func.func @transform_21(%arg0: i32) -> (i32, i32) {
    %c0_i32 = arith.constant 0 : i32
    %c0_i32_0 = arith.constant 0 : i32
    %c0_i32_1 = arith.constant 0 : i32
    return %c0_i32, %c0_i32_0 : i32, i32
  }
  func.func @transform_22(%arg0: i32) -> (i32, i32) {
    %c0_i32 = arith.constant 0 : i32
    %c0_i32_0 = arith.constant 0 : i32
    %c0_i32_1 = arith.constant 0 : i32
    return %c0_i32, %c0_i32_0 : i32, i32
  }
  func.func @transform_23(%arg0: i32) -> (i32, i32) {
    %c0_i32 = arith.constant 0 : i32
    %c0_i32_0 = arith.constant 0 : i32
    %c0_i32_1 = arith.constant 0 : i32
    return %c0_i32, %c0_i32_0 : i32, i32
  }
  func.func @transform_24(%arg0: i32) -> (i32, i32) {
    %c0_i32 = arith.constant 0 : i32
    %c0_i32_0 = arith.constant 0 : i32
    %c0_i32_1 = arith.constant 0 : i32
    return %c0_i32, %c0_i32_0 : i32, i32
  }
  func.func @transform_25(%arg0: i32) -> (i32, i32) {
    %c0_i32 = arith.constant 0 : i32
    %c0_i32_0 = arith.constant 0 : i32
    %c0_i32_1 = arith.constant 0 : i32
    return %c0_i32, %c0_i32_0 : i32, i32
  }
  func.func @transform_26(%arg0: i32) -> (i32, i32) {
    %c0_i32 = arith.constant 0 : i32
    %c0_i32_0 = arith.constant 0 : i32
    %c0_i32_1 = arith.constant 0 : i32
    return %c0_i32, %c0_i32_0 : i32, i32
  }
  func.func @transform_27(%arg0: i32) -> (i32, i32) {
    %c0_i32 = arith.constant 0 : i32
    %c0_i32_0 = arith.constant 0 : i32
    %c0_i32_1 = arith.constant 0 : i32
    return %c0_i32, %c0_i32_0 : i32, i32
  }
  func.func @transform_28(%arg0: i32) -> (i32, i32) {
    %c0_i32 = arith.constant 0 : i32
    %c0_i32_0 = arith.constant 0 : i32
    %c0_i32_1 = arith.constant 0 : i32
    return %c0_i32, %c0_i32_0 : i32, i32
  }
  func.func @transform_29(%arg0: i32) -> (i32, i32) {
    %c0_i32 = arith.constant 0 : i32
    %c0_i32_0 = arith.constant 0 : i32
    %c0_i32_1 = arith.constant 0 : i32
    return %c0_i32, %c0_i32_0 : i32, i32
  }
  func.func @transform_30(%arg0: i32) -> (i32, i32, i32) {
    %c0_i32 = arith.constant 0 : i32
    %c0_i32_0 = arith.constant 0 : i32
    %c0_i32_1 = arith.constant 0 : i32
    return %arg0, %c0_i32, %c0_i32_0 : i32, i32, i32
  }
}

</mosaic_0001>

<bundles_post_ra>
// kernel: decoder_block_forward.1
= control target key start
LH: loop header
LB: loop body
LE: loop exit
PB: predicated region body
PF: predicated region fallthrough
CT: control target
= control target key end

     0   :  { %s7765_s6 = smov 1   ;;  %s7766_s10 = smov 2   ;;  %s8861_s0 = inlined_call_operand.smem [shape: u32[31], index: -1, kind: input, shape index: {}] }
   0x1   :  { %s7813_s5 = sld [smem:[%s8861_s0]]   ;;  %s7767_s14 = smov 3  }
   0x2   :  { %s7818_s9 = sld [smem:[%s8861_s0 + %s7765_s6]]   ;;  %s7768_s18 = smov 4  }
   0x3   :  { %s7823_s13 = sld [smem:[%s8861_s0 + %s7766_s10]]   ;;  %s7769_s22 = smov 5  }
   0x4   :  { %s7828_s17 = sld [smem:[%s8861_s0 + %s7767_s14]]   ;;  %s7770_s26 = smov 6  }
   0x5   :  { %s7833_s21 = sld [smem:[%s8861_s0 + %s7768_s18]]   ;;  %s7771_s30 = smov 7  }
   0x6   :  { %s7838_s25 = sld [smem:[%s8861_s0 + %s7769_s22]]   ;;  %s7772_s4 = smov 8  }
   0x7   :  { %8886 = sst [smem:[#allocation6_spill]] %s7813_s5  ;;  %s7773_s10 = smov 9  }
   0x8   :  { %8887 = sst [smem:[#allocation7_spill]] %s7818_s9  ;;  %s7774_s15 = smov 10  }
   0x9   :  { %8888 = sst [smem:[#allocation8_spill]] %s7823_s13  ;;  %s7775_s20 = smov 11  }
   0xa   :  { %8889 = sst [smem:[#allocation9_spill]] %s7828_s17  ;;  %s7777_s1 = smov 13  }
   0xb   :  { %s7843_s29 = sld [smem:[%s8861_s0 + %s7770_s26]]   ;;  %s7776_s26 = smov 12  }
   0xc   :  { %s7848_s3 = sld [smem:[%s8861_s0 + %s7771_s30]]   ;;  %s7778_s7 = smov 14  }
   0xd   :  { %s7853_s8 = sld [smem:[%s8861_s0 + %s7772_s4]]   ;;  %s7780_s22 = smov 16  }
   0xe   :  { %s7858_s14 = sld [smem:[%s8861_s0 + %s7773_s10]]   ;;  %s7781_s28 = smov 17  }
   0xf   :  { %s7863_s19 = sld [smem:[%s8861_s0 + %s7774_s15]]   ;;  %s7779_s15 = smov 15  }
  0x10   :  { %s7868_s24 = sld [smem:[%s8861_s0 + %s7775_s20]]  }
  0x11   :  { %s7873_s30 = sld [smem:[%s8861_s0 + %s7776_s26]]  }
  0x12   :  { %8890 = sst [smem:[#allocation10_spill]] %s7848_s3 }
  0x13   :  { %8891 = sst [smem:[#allocation11_spill]] %s7853_s8 }
  0x14   :  { %8892 = sst [smem:[#allocation12_spill]] %s7858_s14 }
  0x15   :  { %8893 = sst [smem:[#allocation13_spill]] %s7863_s19 }
  0x16   :  { %s7878_s6 = sld [smem:[%s8861_s0 + %s7777_s1]]  }
  0x17   :  { %s7883_s12 = sld [smem:[%s8861_s0 + %s7778_s7]]   ;;  %s7782_s7 = smov 18  }
  0x18   :  { %s7888_s20 = sld [smem:[%s8861_s0 + %s7779_s15]]   ;;  %s7783_s15 = smov 19  }
  0x19   :  { %s7893_s27 = sld [smem:[%s8861_s0 + %s7780_s22]]   ;;  %s7784_s22 = smov 20  }
  0x1a   :  { %s7898_s4 = sld [smem:[%s8861_s0 + %s7781_s28]]   ;;  %s7785_s28 = smov 21  }
  0x1b   :  { %s7903_s13 = sld [smem:[%s8861_s0 + %s7782_s7]]   ;;  %s7786_s7 = smov 22  }
  0x1c   :  { %8894 = sst [smem:[#allocation14_spill]] %s7878_s6 }
  0x1d   :  { %8895 = sst [smem:[#allocation15_spill]] %s7883_s12 }
  0x1e   :  { %8896 = sst [smem:[#allocation16_spill]] %s7888_s20 }
  0x1f   :  { %s7908_s20 = sld [smem:[%s8861_s0 + %s7783_s15]]   ;;  %s7787_s15 = smov 23  }
  0x20   :  { %8897 = sst [smem:[#allocation17_spill]] %s7898_s4 }
  0x21   :  { %8898 = sst [smem:[#allocation18_spill]] %s7903_s13 }
  0x22   :  { %s7913_s9 = sld [smem:[%s8861_s0 + %s7784_s22]]   ;;  %s7788_s22 = smov 24  }
  0x23   :  { %s7918_s4 = sld [smem:[%s8861_s0 + %s7785_s28]]   ;;  %s7789_s28 = smov 25  }
  0x24   :  { %s7923_s13 = sld [smem:[%s8861_s0 + %s7786_s7]]   ;;  %s7790_s7 = smov 26  }
  0x25   :  { %8899 = sst [smem:[#allocation19_spill]] %s7908_s20 }
  0x26   :  { %s7928_s20 = sld [smem:[%s8861_s0 + %s7787_s15]]   ;;  %s7791_s15 = smov 27  }
  0x28   :  { %8900 = sst [smem:[#allocation20_spill]] %s7913_s9 }
  0x29   :  { %8901 = sst [smem:[#allocation21_spill]] %s7918_s4 }
  0x2a   :  { %8902 = sst [smem:[#allocation22_spill]] %s7923_s13 }
  0x2b   :  { %s7933_s9 = sld [smem:[%s8861_s0 + %s7788_s22]]   ;;  %s7792_s22 = smov 28  }
  0x2c   :  { %8903 = sst [smem:[#allocation23_spill]] %s7928_s20 }
  0x2d   :  { %s7938_s4 = sld [smem:[%s8861_s0 + %s7789_s28]]   ;;  %s7793_s28 = smov 29  }
  0x2e   :  { %s7943_s13 = sld [smem:[%s8861_s0 + %s7790_s7]]   ;;  %s7794_s7 = smov 30  }
  0x2f   :  { %s7948_s20 = sld [smem:[%s8861_s0 + %s7791_s15]]  }
  0x31   :  { %8904 = sst [smem:[#allocation24_spill]] %s7933_s9 }
  0x32   :  { %s7953_s9 = sld [smem:[%s8861_s0 + %s7792_s22]]  }
  0x33   :  { %8905 = sst [smem:[#allocation25_spill]] %s7938_s4 }
  0x34   :  { %8906 = sst [smem:[#allocation26_spill]] %s7943_s13 }
  0x35   :  { %s7958_s4 = sld [smem:[%s8861_s0 + %s7793_s28]]  }
  0x36   :  { %s7963_s13 = sld [smem:[%s8861_s0 + %s7794_s7]]  }
  0x38   :  { %8907 = sst [smem:[#allocation27_spill]] %s7953_s9 }
  0x39   :  { %66 = vsyncpa [#allocation4], 0 }
  0x3a   :  { %68 = vsyncpa [#allocation4 + $0x1], 0  ;;  %s7965_s15 = smov 0   ;;  %s7967_s16 = smov 0  }
  0x3b   :  { %s7969_s18 = smov 0   ;;  %s7971_s22 = smov 0  }
  0x3c LB: > { %s8908_s19 = sld [smem:[#allocation13_spill]]  ;;  %s7986_s0 = sadd.s32 4294967295, %s7763_s22   ;;  %s7751_s15 = sphi %s7965_s15, %s8939_s15   ;;  %s7763_s22 = sphi %s7971_s22, %s8942_s22   ;;  %s7759_s18 = sphi %s7969_s18, %s8941_s18   ;;  %s7755_s16 = sphi %s7967_s16, %s8940_s16  }
  0x3d   : > { %s8909_s14 = sld [smem:[#allocation12_spill]]  ;;  %s6335_s23 = sadd.s32 4294967294, %s7763_s22  }
  0x3e   : > { %s8910_s12 = sld [smem:[#allocation15_spill]]  ;;  %s7990_s26 = sadd.s32 1, %s7763_s22  }
  0x3f   : > { %s8911_s8 = sld [smem:[#allocation11_spill]]  ;;  %s726_s28 = sadd.s32 1, %s7759_s18 }
  0x40   : > { %s8912_s3 = sld [smem:[#allocation10_spill]]  ;;  %s723_s1 = ssub.s32 %s7763_s22, %s7990_s26 }
  0x41   : > { %p736_p0 = scmp.ne.s32.totalorder %s7759_s18, %s7755_s16  ;;  %p724_p1 = scmp.eq.s32.totalorder %s723_s1, 0 }
  0x42   : > { %p737_p2 = scmp.eq.s32.totalorder %s7986_s0, 1  ;;  %p742_p3 = scmp.ne.s32.totalorder %s7755_s16, %s7751_s15 }
  0x43   : > { %p743_p4 = scmp.eq.s32.totalorder %s6335_s23, 1  ;;  %p6338_p7 = scmp.ge.s32.totalorder %s7763_s22, 1 }
  0x44   : > { %s8001_s2 = scalar_select %p724_p1, %s7759_s18, %s726_s28  }
  0x45   : > { %p8003_p5 = por %p737_p2, %p736_p0  ;;  %p8007_p6 = por %p743_p4, %p742_p3 }
  0x46   : > { %p863_p8 = scmp.lt.s32.totalorder %s7763_s22, 3 }
  0x48   : > { %p864_p9 = pnand %p6338_p7, %p863_p8 }
  0x49   : > { %s8915_s5 = sld [smem:[#allocation6_spill]] (!%p864_p9)  ;;  %p948_p10 = scmp.lt.s32.totalorder (!%p864_p9), %s7986_s0, 1 }
  0x4a   : > { %867 = sbr.rel (%p864_p9) target bundleno = 4009 (0xfa9), region = 140  ;;  %s8916_s17 = sld [smem:[#allocation9_spill]] (!%p864_p9) }
  0x4b   : > { %s8870_s1 = smov (!%p864_p9), 4   ;;  %s8917_s6 = sld [smem:[#allocation14_spill]] (!%p864_p9) }
  0x4c   : > { %s8938_s9 = sld [smem:[#allocation27_spill]] (!%p864_p9) }
  0x4f   : > { %v7522_v0 = vld [vmem:[%s7833_s21 + $0x8] sm:$0xff]   ;;  %v7795_v1 = vmov 0.0   ;;  %v7523_v2 = vld [vmem:[%s7833_s21 + $0x38] sm:$0xff]   ;;  %v7524_v3 = vld [vmem:[%s7833_s21] sm:$0xff]   ;;  %vm7796_vm0 = vmmov 0   ;;  %s949_s11 = scalar_select %p948_p10, %s7986_s0, 1 }
  0x50   : > { %6824 = vmatprep.subr.bf16.mxu0 %v7795_v1  ;;  %6848 = vmatprep.subr.bf16.mxu1 %v7795_v1  ;;  %v7525_v4 = vld [vmem:[%s7833_s21 + $0x30] sm:$0xff]   ;;  %v7526_v5 = vld [vmem:[%s7833_s21 + $0x18] sm:$0xff]   ;;  %vm1149_vm1 = vcmask 261120   ;;  %v7530_v11 = vld [vmem:[%s7833_s21 + $0x28] sm:$0xff]   ;;  %vm2501_vm2 = vcmask 31744   ;;  %vm2978_vm3 = vcmask 1043456  }
  0x51   : > { %6825 = vmatpush3.bf16.msra.mxu0 %v7522_v0  ;;  %6828 = vmatprep.mubr.msk.bf16.mxu0 %vm7796_vm0, %v7795_v1  ;;  %s8027_s23 = sshll.u32 %s949_s11, 3  ;;  %v7527_v6 = vld [vmem:[%s7833_s21 + $0x58] sm:$0xff]   ;;  %v7528_v9 = vld [vmem:[%s7833_s21 + $0x10] sm:$0xff]   ;;  %v7532_v13 = vld [vmem:[%s7833_s21 + $0x20] sm:$0xff]   ;;  %vm2870_vm4 = vcmask 64512   ;;  %s8871_s11 = smov 12  }
  0x52   : > { %6849 = vmatpush3.bf16.msra.mxu1 %v7523_v2  ;;  %6826 = vmatprep.subr.bf16.mxu0 %v7795_v1  ;;  %s8032_s28 = scalar_lea.vmem %s8915_s5, %s8027_s23  ;;  %v7529_v10 = vld [vmem:[%s7833_s21 + $0x50] sm:$0xff]   ;;  %v7531_v12 = vld [vmem:[%s7833_s21 + $0x78] sm:$0xff]   ;;  %v7534_v15 = vld [vmem:[%s7833_s21 + $0x48] sm:$0xff]   ;;  %s8873_s5 = smov 28   ;;  %vm3349_vm5 = vcmask 64544   ;;  %vm3355_vm6 = vcmask 97344  }
  0x53   : > { %6850 = vmatprep.subr.bf16.mxu1 %v7795_v1  ;;  %6852 = vmatprep.mubr.msk.bf16.mxu1 %vm7796_vm0, %v7795_v1  ;;  %v961_v7 = vld [vmem:[%s8032_s28] sm:$0xff]  ;;  %v7533_v14 = vld [vmem:[%s7833_s21 + $0x70] sm:$0xff]   ;;  %v7535_v16 = vld [vmem:[%s7843_s29 + $0x18] sm:$0xff]   ;;  %vm3361_vm7 = vcmask 130144   ;;  %vm3367_vm8 = vcmask 162944   ;;  %vm3373_vm9 = vcmask 195744  }
  0x54   : > { %v8038_v8 = vpack.c.bf16 %v961_v7, %v961_v7  ;;  %v7536_v17 = vld [vmem:[%s7833_s21 + $0x40] sm:$0xff]   ;;  %v7537_v18 = vld [vmem:[%s7843_s29 + $0x10] sm:$0xff]   ;;  %v7538_v19 = vld [vmem:[%s7833_s21 + $0x68] sm:$0xff]   ;;  %vm3379_vm10 = vcmask 228544   ;;  %vm3385_vm11 = vcmask 261344  }
  0x55   : > { %6827 = vmatpush3.bf16.msra.mxu0 %v7524_v3  ;;  %v7539_v20 = vld [vmem:[%s7843_s29 + $0x38] sm:$0xff]   ;;  %v7540_v21 = vld [vmem:[%s7833_s21 + $0x60] sm:$0xff]   ;;  %v7541_v22 = vld [vmem:[%s7843_s29 + $0x30] sm:$0xff]  }
  0x56   : > { %6851 = vmatpush3.bf16.msra.mxu1 %v7525_v4  ;;  %6832 = vmatprep.subr.bf16.mxu0 %v7795_v1  ;;  %v7542_v23 = vld [vmem:[%s7843_s29 + $0x8] sm:$0xff]   ;;  %v7543_v24 = vld [vmem:[%s7843_s29 + $0x58] sm:$0xff]   ;;  %v7544_v25 = vld [vmem:[%s7843_s29] sm:$0xff]  }
  0x57   : > { %6864 = vmatprep.subr.bf16.mxu1 %v7795_v1  ;;  %v7545_v26 = vld [vmem:[%s7843_s29 + $0x50] sm:$0xff]   ;;  %v7546_v27 = vld [vmem:[%s7843_s29 + $0x28] sm:$0xff]   ;;  %v7547_v28 = vld [vmem:[%s7843_s29 + $0x78] sm:$0xff]  }
  0x58   : > { %6829 = vmatmul.mubr.msk.bf16.vlgmr.msra.gmra.mxu0 %vm1149_vm1, %v8038_v8  ;;  %v7548_v29 = vld [vmem:[%s7843_s29 + $0x20] sm:$0xff]   ;;  %v7549_v30 = vld [vmem:[%s7843_s29 + $0x70] sm:$0xff]   ;;  %v7550_v31 = vld [vmem:[%s7843_s29 + $0x48] sm:$0xff]  }
  0x59   : > { %6853 = vmatmul.mubr.msk.bf16.vlgmr.msra.gmra.mxu1 %vm1149_vm1, %v8038_v8  ;;  %6833 = vmatpush3.bf16.msra.mxu0 %v7526_v5  ;;  %v7554_v32 = vld [vmem:[%s8911_s8 + $0x18] sm:$0xff]   ;;  %v7551_v33 = vld [vmem:[%s7843_s29 + $0x40] sm:$0xff]   ;;  %v7552_v34 = vld [vmem:[%s7843_s29 + $0x68] sm:$0xff]  }
  0x5a   : > { %6865 = vmatpush3.bf16.msra.mxu1 %v7527_v6  ;;  %6834 = vmatprep.subr.bf16.mxu0 %v7795_v1  ;;  %v7553_v35 = vld [vmem:[%s7843_s29 + $0x60] sm:$0xff]   ;;  %v7555_v36 = vld [vmem:[%s8911_s8 + $0x10] sm:$0xff]   ;;  %v7556_v37 = vld [vmem:[%s8911_s8 + $0x38] sm:$0xff]  }
  0x5b   : > { %6866 = vmatprep.subr.bf16.mxu1 %v7795_v1  ;;  %6836 = vmatprep.mubr.msk.bf16.mxu0 %vm7796_vm0, %v7795_v1  ;;  %v7557_v38 = vld [vmem:[%s8911_s8 + $0x8] sm:$0xff]   ;;  %v7558_v39 = vld [vmem:[%s8911_s8 + $0x30] sm:$0xff]   ;;  %v7559_v40 = vld [vmem:[%s8911_s8] sm:$0xff]  }
  0x5c   : > { %6868 = vmatprep.mubr.msk.bf16.mxu1 %vm7796_vm0, %v7795_v1  ;;  %v7560_v41 = vld [vmem:[%s8911_s8 + $0x58] sm:$0xff]   ;;  %v7561_v42 = vld [vmem:[%s8911_s8 + $0x28] sm:$0xff]   ;;  %v7562_v43 = vld [vmem:[%s8911_s8 + $0x50] sm:$0xff]  }
  0x5d   : > { %6835 = vmatpush3.bf16.msra.mxu0 %v7528_v9  ;;  %v7563_v44 = vld [vmem:[%s8911_s8 + $0x20] sm:$0xff]   ;;  %v7564_v45 = vld [vmem:[%s8911_s8 + $0x78] sm:$0xff]   ;;  %v7565_v46 = vld [vmem:[%s8911_s8 + $0x48] sm:$0xff]  }
  0x5e   : > { %6867 = vmatpush3.bf16.msra.mxu1 %v7529_v10  ;;  %6840 = vmatprep.subr.bf16.mxu0 %v7795_v1  ;;  %v7566_v47 = vld [vmem:[%s8911_s8 + $0x70] sm:$0xff]   ;;  %v7567_v48 = vld [vmem:[%s8911_s8 + $0x40] sm:$0xff]   ;;  %v7568_v49 = vld [vmem:[%s8911_s8 + $0x68] sm:$0xff]  }
  0x5f   : > { %6880 = vmatprep.subr.bf16.mxu1 %v7795_v1  ;;  %v7569_v50 = vld [vmem:[%s8911_s8 + $0x60] sm:$0xff]  }
  0x60   : > { %6837 = vmatmul.mubr.msk.bf16.vlgmr.msra.gmra.mxu0 %vm1149_vm1, %v8038_v8 }
  0x61   : > { %6869 = vmatmul.mubr.msk.bf16.vlgmr.msra.gmra.mxu1 %vm1149_vm1, %v8038_v8  ;;  %6841 = vmatpush3.bf16.msra.mxu0 %v7530_v11 }
  0x62   : > { %6881 = vmatpush3.bf16.msra.mxu1 %v7531_v12  ;;  %6842 = vmatprep.subr.bf16.mxu0 %v7795_v1  ;;  %v6376_v12 = vld [vmem:[%s8912_s3 + $0x1] ss:$0 sm:$0xff] }
  0x63   : > { %6882 = vmatprep.subr.bf16.mxu1 %v7795_v1  ;;  %6844 = vmatprep.mubr.msk.bf16.mxu0 %vm7796_vm0, %v7795_v1 }
  0x64   : > { %6884 = vmatprep.mubr.msk.bf16.mxu1 %vm7796_vm0, %v7795_v1 }
  0x65   : > { %6843 = vmatpush3.bf16.msra.mxu0 %v7532_v13 }
  0x66   : > { %6883 = vmatpush3.bf16.msra.mxu1 %v7533_v14  ;;  %6856 = vmatprep.subr.bf16.mxu0 %v7795_v1 }
  0x67   : > { %6896 = vmatprep.subr.bf16.mxu1 %v7795_v1 }
  0x68   : > { %6845 = vmatmul.mubr.msk.bf16.vlgmr.msra.gmra.mxu0 %vm1149_vm1, %v8038_v8 }
  0x69   : > { %6885 = vmatmul.mubr.msk.bf16.vlgmr.msra.gmra.mxu1 %vm1149_vm1, %v8038_v8  ;;  %6857 = vmatpush3.bf16.msra.mxu0 %v7534_v15 }
  0x6a   : > { %6897 = vmatpush3.bf16.msra.mxu1 %v7535_v16  ;;  %6858 = vmatprep.subr.bf16.mxu0 %v7795_v1 }
  0x6b   : > { %6898 = vmatprep.subr.bf16.mxu1 %v7795_v1  ;;  %6860 = vmatprep.mubr.msk.bf16.mxu0 %vm7796_vm0, %v7795_v1 }
  0x6c   : > { %6900 = vmatprep.mubr.msk.bf16.mxu1 %vm7796_vm0, %v7795_v1 }
  0x6d   : > { %6859 = vmatpush3.bf16.msra.mxu0 %v7536_v17 }
  0x6e   : > { %6899 = vmatpush3.bf16.msra.mxu1 %v7537_v18  ;;  %6872 = vmatprep.subr.bf16.mxu0 %v7795_v1 }
  0x6f   : > { %6912 = vmatprep.subr.bf16.mxu1 %v7795_v1 }
  0x70   : > { %6861 = vmatmul.mubr.msk.bf16.vlgmr.msra.gmra.mxu0 %vm1149_vm1, %v8038_v8 }
  0x71   : > { %6901 = vmatmul.mubr.msk.bf16.vlgmr.msra.gmra.mxu1 %vm1149_vm1, %v8038_v8  ;;  %6873 = vmatpush3.bf16.msra.mxu0 %v7538_v19  ;;  %v6344_v19 = vld [vmem:[%s7838_s25 + $0x1] ss:$0 sm:$0xff] }
  0x72   : > { %6913 = vmatpush3.bf16.msra.mxu1 %v7539_v20  ;;  %6874 = vmatprep.subr.bf16.mxu0 %v7795_v1 }
  0x73   : > { %6914 = vmatprep.subr.bf16.mxu1 %v7795_v1  ;;  %6876 = vmatprep.mubr.msk.bf16.mxu0 %vm7796_vm0, %v7795_v1 }
  0x74   : > { %6916 = vmatprep.mubr.msk.bf16.mxu1 %vm7796_vm0, %v7795_v1 }
  0x75   : > { %6875 = vmatpush3.bf16.msra.mxu0 %v7540_v21 }
  0x76   : > { %6915 = vmatpush3.bf16.msra.mxu1 %v7541_v22  ;;  %6888 = vmatprep.subr.bf16.mxu0 %v7795_v1 }
  0x77   : > { %6928 = vmatprep.subr.bf16.mxu1 %v7795_v1 }
  0x78   : > { %6877 = vmatmul.mubr.msk.bf16.vlgmr.msra.gmra.mxu0 %vm1149_vm1, %v8038_v8 }
  0x79   : > { %6917 = vmatmul.mubr.msk.bf16.vlgmr.msra.gmra.mxu1 %vm1149_vm1, %v8038_v8  ;;  %6889 = vmatpush3.bf16.msra.mxu0 %v7542_v23 }
  0x7a   : > { %6929 = vmatpush3.bf16.msra.mxu1 %v7543_v24  ;;  %6890 = vmatprep.subr.bf16.mxu0 %v7795_v1 }
  0x7b   : > { %6930 = vmatprep.subr.bf16.mxu1 %v7795_v1  ;;  %6892 = vmatprep.mubr.msk.bf16.mxu0 %vm7796_vm0, %v7795_v1 }
  0x7c   : > { %6932 = vmatprep.mubr.msk.bf16.mxu1 %vm7796_vm0, %v7795_v1 }
  0x7d   : > { %6891 = vmatpush3.bf16.msra.mxu0 %v7544_v25  ;;  %v6378_v25 = vld [vmem:[%s8912_s3 + $0x3] ss:$0 sm:$0xff] }
  0x7e   : > { %6931 = vmatpush3.bf16.msra.mxu1 %v7545_v26  ;;  %6904 = vmatprep.subr.bf16.mxu0 %v7795_v1 }
  0x7f   : > { %6944 = vmatprep.subr.bf16.mxu1 %v7795_v1 }
  0x80   : > { %6893 = vmatmul.mubr.msk.bf16.vlgmr.msra.gmra.mxu0 %vm1149_vm1, %v8038_v8 }
  0x81   : > { %6933 = vmatmul.mubr.msk.bf16.vlgmr.msra.gmra.mxu1 %vm1149_vm1, %v8038_v8  ;;  %6905 = vmatpush3.bf16.msra.mxu0 %v7546_v27 }
  0x82   : > { %6945 = vmatpush3.bf16.msra.mxu1 %v7547_v28  ;;  %6906 = vmatprep.subr.bf16.mxu0 %v7795_v1 }
  0x83   : > { %6946 = vmatprep.subr.bf16.mxu1 %v7795_v1  ;;  %6908 = vmatprep.mubr.msk.bf16.mxu0 %vm7796_vm0, %v7795_v1 }
  0x84   : > { %6948 = vmatprep.mubr.msk.bf16.mxu1 %vm7796_vm0, %v7795_v1 }
  0x85   : > { %6907 = vmatpush3.bf16.msra.mxu0 %v7548_v29 }
  0x86   : > { %6947 = vmatpush3.bf16.msra.mxu1 %v7549_v30  ;;  %6920 = vmatprep.subr.bf16.mxu0 %v7795_v1 }
  0x87   : > { %6960 = vmatprep.subr.bf16.mxu1 %v7795_v1 }
  0x88   : > { %6909 = vmatmul.mubr.msk.bf16.vlgmr.msra.gmra.mxu0 %vm1149_vm1, %v8038_v8 }
  0x89   : > { %6949 = vmatmul.mubr.msk.bf16.vlgmr.msra.gmra.mxu1 %vm1149_vm1, %v8038_v8  ;;  %6921 = vmatpush3.bf16.msra.mxu0 %v7550_v31 }
  0x8a   : > { %6924 = vmatprep.mubr.msk.bf16.mxu0 %vm7796_vm0, %v7795_v1  ;;  %6922 = vmatprep.subr.bf16.mxu0 %v7795_v1 }
  0x8b   : > { %6961 = vmatpush3.bf16.msra.mxu1 %v7554_v32  ;;  %6964 = vmatprep.mubr.msk.bf16.mxu1 %vm7796_vm0, %v7795_v1 }
  0x8c   : > { %6962 = vmatprep.subr.bf16.mxu1 %v7795_v1 }
  0x8d   : > { %6923 = vmatpush3.bf16.msra.mxu0 %v7551_v33 }
  0x8e   : > { %6936 = vmatprep.subr.bf16.mxu0 %v7795_v1 }
  0x8f   : > { %6963 = vmatpush3.bf16.msra.mxu1 %v7555_v36 }
  0x90   : > { %6925 = vmatmul.mubr.msk.bf16.vlgmr.msra.gmra.mxu0 %vm1149_vm1, %v8038_v8  ;;  %6976 = vmatprep.subr.bf16.mxu1 %v7795_v1 }
  0x91   : > { %6937 = vmatpush3.bf16.msra.mxu0 %v7552_v34  ;;  %6940 = vmatprep.mubr.msk.bf16.mxu0 %vm7796_vm0, %v7795_v1  ;;  %v6346_v34 = vld [vmem:[%s7838_s25 + $0x3] ss:$0 sm:$0xff] }
  0x92   : > { %6938 = vmatprep.subr.bf16.mxu0 %v7795_v1  ;;  %6965 = vmatmul.mubr.msk.bf16.vlgmr.msra.gmra.mxu1 %vm1149_vm1, %v8038_v8 }
  0x93   : > { %6977 = vmatpush3.bf16.msra.mxu1 %v7556_v37  ;;  %6980 = vmatprep.mubr.msk.bf16.mxu1 %vm7796_vm0, %v7795_v1 }
  0x94   : > { %6978 = vmatprep.subr.bf16.mxu1 %v7795_v1 }
  0x95   : > { %6939 = vmatpush3.bf16.msra.mxu0 %v7553_v35 }
  0x96   : > { %6952 = vmatprep.subr.bf16.mxu0 %v7795_v1 }
  0x97   : > { %6979 = vmatpush3.bf16.msra.mxu1 %v7558_v39 }
  0x98   : > { %6941 = vmatmul.mubr.msk.bf16.vlgmr.msra.gmra.mxu0 %vm1149_vm1, %v8038_v8  ;;  %6992 = vmatprep.subr.bf16.mxu1 %v7795_v1 }
  0x99   : > { %6956 = vmatprep.mubr.msk.bf16.mxu0 %vm7796_vm0, %v7795_v1  ;;  %6953 = vmatpush3.bf16.msra.mxu0 %v7557_v38 }
  0x9a   : > { %6954 = vmatprep.subr.bf16.mxu0 %v7795_v1  ;;  %6981 = vmatmul.mubr.msk.bf16.vlgmr.msra.gmra.mxu1 %vm1149_vm1, %v8038_v8 }
  0x9b   : > { %6993 = vmatpush3.bf16.msra.mxu1 %v7560_v41  ;;  %6996 = vmatprep.mubr.msk.bf16.mxu1 %vm7796_vm0, %v7795_v1  ;;  %v6380_v41 = vld [vmem:[%s8912_s3 + $0x5] ss:$0 sm:$0xff] }
  0x9c   : > { %6994 = vmatprep.subr.bf16.mxu1 %v7795_v1 }
  0x9d   : > { %6955 = vmatpush3.bf16.msra.mxu0 %v7559_v40  ;;  %v6375_v40 = vld [vmem:[%s8912_s3] ss:$0 sm:$0xff] }
  0x9e   : > { %6968 = vmatprep.subr.bf16.mxu0 %v7795_v1 }
  0x9f   : > { %6995 = vmatpush3.bf16.msra.mxu1 %v7562_v43 }
  0xa0   : > { %6957 = vmatmul.mubr.msk.bf16.vlgmr.msra.gmra.mxu0 %vm1149_vm1, %v8038_v8  ;;  %7008 = vmatprep.subr.bf16.mxu1 %v7795_v1 }
  0xa1   : > { %6969 = vmatpush3.bf16.msra.mxu0 %v7561_v42  ;;  %6972 = vmatprep.mubr.msk.bf16.mxu0 %vm7796_vm0, %v7795_v1 }
  0xa2   : > { %6970 = vmatprep.subr.bf16.mxu0 %v7795_v1  ;;  %6997 = vmatmul.mubr.msk.bf16.vlgmr.msra.gmra.mxu1 %vm1149_vm1, %v8038_v8 }
  0xa3   : > { %7009 = vmatpush3.bf16.msra.mxu1 %v7564_v45  ;;  %7012 = vmatprep.mubr.msk.bf16.mxu1 %vm7796_vm0, %v7795_v1 }
  0xa4   : > { %7010 = vmatprep.subr.bf16.mxu1 %v7795_v1 }
  0xa5   : > { %6971 = vmatpush3.bf16.msra.mxu0 %v7563_v44 }
  0xa6   : > { %6984 = vmatprep.subr.bf16.mxu0 %v7795_v1 }
  0xa7   : > { %7011 = vmatpush3.bf16.msra.mxu1 %v7566_v47 }
  0xa8   : > { %6973 = vmatmul.mubr.msk.bf16.vlgmr.msra.gmra.mxu0 %vm1149_vm1, %v8038_v8  ;;  %7022 = vmatprep.subr.bf16.mxu1 %v7795_v1 }
  0xa9   : > { %6985 = vmatpush3.bf16.msra.mxu0 %v7565_v46  ;;  %6988 = vmatprep.mubr.msk.bf16.mxu0 %vm7796_vm0, %v7795_v1 }
  0xaa   : > { %6986 = vmatprep.subr.bf16.mxu0 %v7795_v1  ;;  %7013 = vmatmul.mubr.msk.bf16.vlgmr.msra.gmra.mxu1 %vm1149_vm1, %v8038_v8 }
  0xab   : > { %7024 = vmatprep.mubr.msk.bf16.mxu1 %vm7796_vm0, %v7795_v1 }
  0xad   : > { %6987 = vmatpush3.bf16.msra.mxu0 %v7567_v48 }
  0xae   : > { %7000 = vmatprep.subr.bf16.mxu0 %v7795_v1 }
  0xb0   : > { %6989 = vmatmul.mubr.msk.bf16.vlgmr.msra.gmra.mxu0 %vm1149_vm1, %v8038_v8 }
  0xb1   : > { %7001 = vmatpush3.bf16.msra.mxu0 %v7568_v49  ;;  %7004 = vmatprep.mubr.msk.bf16.mxu0 %vm7796_vm0, %v7795_v1 }
  0xb2   : > { %7002 = vmatprep.subr.bf16.mxu0 %v7795_v1 }
  0xb5   : > { %7003 = vmatpush3.bf16.msra.mxu0 %v7569_v50 }
  0xb6   : > { %7016 = vmatprep.subr.bf16.mxu0 %v7795_v1 }
  0xb8   : > { %7005 = vmatmul.mubr.msk.bf16.vlgmr.msra.gmra.mxu0 %vm1149_vm1, %v8038_v8 }
  0xb9   : > { %7018 = vmatprep.mubr.msk.bf16.mxu0 %vm7796_vm0, %v7795_v1 }
 0x118   : > { %v8222_v51 = vpop.f32.mrf.mxu0 }
 0x119   : > { %v1343_v52 = vpop.f32.mrf.mxu1 }
 0x11a   : > { %v6830_v53 = vpop.f32.mrf.mxu0  ;;  %v1344_v42 = vadd.f32 %v6346_v34, %v1343_v52  ;;  %v6381_v34 = vld [vmem:[%s8912_s3 + $0x6] ss:$0 sm:$0xff] }
 0x11b   : > { %v6854_v54 = vpop.f32.mrf.mxu1 }
 0x11c   : > { %v1190_v55 = vpop.f32.mrf.mxu0  ;;  %v2488_v49 = vpack.c.bf16 %v1344_v42, %v1344_v42  ;;  %v6343_v54 = vld [vmem:[%s7838_s25] ss:$0 sm:$0xff]  ;;  %v6349_v42 = vld [vmem:[%s7838_s25 + $0x6] ss:$0 sm:$0xff] }
 0x11d   : > { %v1346_v56 = vpop.f32.mrf.mxu1  ;;  %v6348_v55 = vld [vmem:[%s7838_s25 + $0x5] ss:$0 sm:$0xff] }
 0x11e   : > { %v6831_v57 = vpop.f32.mrf.mxu0 }
 0x11f   : > { %v6855_v58 = vpop.f32.mrf.mxu1 }
 0x120   : > { %v1239_v59 = vpop.f32.mrf.mxu0 }
 0x121   : > { %v8224_v60 = vpop.f32.mrf.mxu1  ;;  %v1240_v26 = vadd.f32 %v6344_v19, %v1239_v59 }
 0x122   : > { %v6838_v61 = vpop.f32.mrf.mxu0 }
 0x123   : > { %v6870_v62 = vpop.f32.mrf.mxu1  ;;  %v2486_v32 = vpack.c.bf16 %v1240_v26, %v1240_v26 }
 0x124   : > { %v1242_v63 = vpop.f32.mrf.mxu0  ;;  %v6377_v62 = vld [vmem:[%s8912_s3 + $0x2] ss:$0 sm:$0xff] }
 0x125   : > { %v1450_v0 = vpop.f32.mrf.mxu1  ;;  %v6382_v63 = vld [vmem:[%s8912_s3 + $0x7] ss:$0 sm:$0xff] }
 0x126   : > { %v6839_v2 = vpop.f32.mrf.mxu0  ;;  %v1188_v0 = vadd.f32 %v6343_v54, %v8222_v51 }
 0x127   : > { %v6871_v3 = vpop.f32.mrf.mxu1  ;;  %v1448_v2 = vadd.f32 %v6348_v55, %v8224_v60  ;;  %v6350_v60 = vld [vmem:[%s7838_s25 + $0x7] ss:$0 sm:$0xff] }
 0x128   : > { %v8226_v4 = vpop.f32.mrf.mxu0 }
 0x129   : > { %v8228_v5 = vpop.f32.mrf.mxu1 }
 0x12a   : > { %v6846_v6 = vpop.f32.mrf.mxu0 }
 0x12b   : > { %v6886_v7 = vpop.f32.mrf.mxu1 }
 0x12c   : > { %v1294_v8 = vpop.f32.mrf.mxu0 }
 0x12d   : > { %v1554_v9 = vpop.f32.mrf.mxu1 }
 0x12e   : > { %v6847_v10 = vpop.f32.mrf.mxu0 }
 0x12f   : > { %v6887_v11 = vpop.f32.mrf.mxu1 }
 0x130   : > { %v8231_v13 = vpop.f32.mrf.mxu0  ;;  %v2485_v11 = vpack.c.bf16 %v1188_v0, %v1188_v0 }
 0x131   : > { %v1703_v14 = vpop.f32.mrf.mxu1 }
 0x132   : > { %v1704_v15 = vadd.f32 %v6376_v12, %v1703_v14  ;;  %v6862_v16 = vpop.f32.mrf.mxu0  ;;  %v2490_v12 = vpack.c.bf16 %v1448_v2, %v1448_v2 }
 0x133   : > { %v6902_v17 = vpop.f32.mrf.mxu1 }
 0x134   : > { %v2494_v18 = vpack.c.bf16 %v1704_v15, %v1704_v15  ;;  %v1398_v20 = vpop.f32.mrf.mxu0  ;;  %v6345_v15 = vld [vmem:[%s7838_s25 + $0x2] ss:$0 sm:$0xff] }
 0x135   : > { %v1706_v21 = vpop.f32.mrf.mxu1 }
 0x136   : > { %v2552_v22 = vsel %vm2501_vm2, %v2494_v18, 0  ;;  %v6863_v23 = vpop.f32.mrf.mxu0  ;;  %v6379_v21 = vld [vmem:[%s8912_s3 + $0x4] ss:$0 sm:$0xff]  ;;  %s8872_s3 = smov 8  }
 0x137   : > { %v6903_v24 = vpop.f32.mrf.mxu1  ;;  %7023 = vmatpush3.bf16.xpose.msra.mxu1 %v2552_v22  ;;  %v1292_v23 = vadd.f32 %v6345_v15, %v8226_v4  ;;  %v6347_v4 = vld [vmem:[%s7838_s25 + $0x4] ss:$0 sm:$0xff] }
 0x138   : > { %7034 = vmatprep.subr.bf16.mxu1 %v7795_v1  ;;  %v8237_v27 = vpop.f32.mrf.mxu0  ;;  %v1552_v24 = vadd.f32 %v6350_v60, %v8228_v5 }
 0x139   : > { %v1807_v28 = vpop.f32.mrf.mxu1 }
 0x13a   : > { %v1808_v29 = vadd.f32 %v6378_v25, %v1807_v28  ;;  %v6878_v30 = vpop.f32.mrf.mxu0 }
 0x13b   : > { %v6918_v31 = vpop.f32.mrf.mxu1  ;;  %v2492_v30 = vpack.c.bf16 %v1552_v24, %v1552_v24 }
 0x13c   : > { %v2496_v33 = vpack.c.bf16 %v1808_v29, %v1808_v29  ;;  %v1502_v35 = vpop.f32.mrf.mxu0  ;;  %v2487_v29 = vpack.c.bf16 %v1292_v23, %v1292_v23 }
 0x13d   : > { %v1810_v36 = vpop.f32.mrf.mxu1  ;;  %v1396_v35 = vadd.f32 %v6347_v4, %v8231_v13 }
 0x13e   : > { %v2644_v37 = vsel %vm2501_vm2, %v2496_v33, 0  ;;  %7025 = vmatmul.mubr.msk.bf16.vlgmr.msra.gmra.mxu1 %vm2501_vm2, %v2486_v32  ;;  %v6879_v38 = vpop.f32.mrf.mxu0 }
 0x13f   : > { %v6919_v39 = vpop.f32.mrf.mxu1  ;;  %7035 = vmatpush3.bf16.xpose.msra.mxu1 %v2644_v37  ;;  %7036 = vmatprep.mubr.msk.bf16.mxu1 %vm7796_vm0, %v7795_v1 }
 0x140   : > { %7046 = vmatprep.subr.bf16.mxu1 %v7795_v1  ;;  %v1651_v43 = vpop.f32.mrf.mxu0  ;;  %v2489_v39 = vpack.c.bf16 %v1396_v35, %v1396_v35 }
 0x141   : > { %v1911_v44 = vpop.f32.mrf.mxu1  ;;  %v1652_v45 = vadd.f32 %v6375_v40, %v1651_v43 }
 0x142   : > { %v1912_v46 = vadd.f32 %v6380_v41, %v1911_v44  ;;  %v6894_v47 = vpop.f32.mrf.mxu0  ;;  %v6408_v41 = vld [vmem:[%s8909_s14 + $0x1] ss:$0 sm:$0xff] }
 0x143   : > { %v6934_v48 = vpop.f32.mrf.mxu1  ;;  %v2493_v50 = vpack.c.bf16 %v1652_v45, %v1652_v45  ;;  %v1500_v47 = vadd.f32 %v6349_v42, %v8237_v27 }
 0x144   : > { %v2498_v53 = vpack.c.bf16 %v1912_v46, %v1912_v46  ;;  %v1654_v56 = vpop.f32.mrf.mxu0 }
 0x145   : > { %v1914_v57 = vpop.f32.mrf.mxu1  ;;  %v2506_v58 = vsel %vm2501_vm2, %v2493_v50, 0  ;;  %v2491_v54 = vpack.c.bf16 %v1500_v47, %v1500_v47 }
 0x146   : > { %v2736_v52 = vsel %vm2501_vm2, %v2498_v53, 0  ;;  %7037 = vmatmul.mubr.msk.bf16.vlgmr.msra.gmra.mxu1 %vm2501_vm2, %v2488_v49  ;;  %v6895_v59 = vpop.f32.mrf.mxu0  ;;  %7017 = vmatpush3.bf16.xpose.msra.mxu0 %v2506_v58  ;;  %v6407_v57 = vld [vmem:[%s8909_s14] ss:$0 sm:$0xff] }
 0x147   : > { %v6935_v61 = vpop.f32.mrf.mxu1  ;;  %7047 = vmatpush3.bf16.xpose.msra.mxu1 %v2736_v52  ;;  %7048 = vmatprep.mubr.msk.bf16.mxu1 %vm7796_vm0, %v7795_v1 }
 0x148   : > { %7028 = vmatprep.subr.bf16.mxu0 %v7795_v1  ;;  %v1755_v3 = vpop.f32.mrf.mxu0  ;;  %7058 = vmatprep.subr.bf16.mxu1 %v7795_v1 }
 0x149   : > { %v2015_v6 = vpop.f32.mrf.mxu1  ;;  %v1756_v7 = vadd.f32 %v6377_v62, %v1755_v3 }
 0x14a   : > { %v2016_v8 = vadd.f32 %v6382_v63, %v2015_v6  ;;  %v6910_v9 = vpop.f32.mrf.mxu0 }
 0x14b   : > { %v6950_v10 = vpop.f32.mrf.mxu1  ;;  %v2495_v51 = vpack.c.bf16 %v1756_v7, %v1756_v7 }
 0x14c   : > { %v2500_v14 = vpack.c.bf16 %v2016_v8, %v2016_v8  ;;  %v1758_v16 = vpop.f32.mrf.mxu0 }
 0x14d   : > { %v2018_v17 = vpop.f32.mrf.mxu1  ;;  %v2598_v18 = vsel %vm2501_vm2, %v2495_v51, 0  ;;  %7019 = vmatmul.mubr.msk.bf16.vlgmr.msra.gmra.mxu0 %vm2501_vm2, %v2485_v11 }
 0x14e   : > { %v2828_v19 = vsel %vm2501_vm2, %v2500_v14, 0  ;;  %7049 = vmatmul.mubr.msk.bf16.vlgmr.msra.gmra.mxu1 %vm2501_vm2, %v2490_v12  ;;  %v6911_v20 = vpop.f32.mrf.mxu0  ;;  %7029 = vmatpush3.bf16.xpose.msra.mxu0 %v2598_v18 }
 0x14f   : > { %7059 = vmatpush3.bf16.xpose.msra.mxu1 %v2828_v19  ;;  %v6951_v22 = vpop.f32.mrf.mxu1  ;;  %7030 = vmatprep.mubr.msk.bf16.mxu0 %vm7796_vm0, %v7795_v1 }
 0x150   : > { %7060 = vmatprep.mubr.msk.bf16.mxu1 %vm7796_vm0, %v7795_v1  ;;  %v1859_v25 = vpop.f32.mrf.mxu0  ;;  %7040 = vmatprep.subr.bf16.mxu0 %v7795_v1 }
 0x151   : > { %7070 = vmatprep.subr.bf16.mxu1 %v7795_v1  ;;  %v1860_v26 = vadd.f32 %v6379_v21, %v1859_v25 }
 0x152   : > { %v6926_v28 = vpop.f32.mrf.mxu0  ;;  %v2167_v45 = vpop.f32.mrf.mxu1 }
 0x153   : > { %v2497_v31 = vpack.c.bf16 %v1860_v26, %v1860_v26  ;;  %v2168_v13 = vadd.f32 %v6408_v41, %v2167_v45 }
 0x154   : > { %v1862_v32 = vpop.f32.mrf.mxu0  ;;  %v6966_v48 = vpop.f32.mrf.mxu1 }
 0x155   : > { %v2690_v5 = vsel %vm2501_vm2, %v2497_v31, 0  ;;  %7031 = vmatmul.mubr.msk.bf16.vlgmr.msra.gmra.mxu0 %vm2501_vm2, %v2487_v29  ;;  %v2968_v49 = vpack.c.bf16 %v2168_v13, %v2168_v13 }
 0x156   : > { %7061 = vmatmul.mubr.msk.bf16.vlgmr.msra.gmra.mxu1 %vm2501_vm2, %v2492_v30  ;;  %v6927_v33 = vpop.f32.mrf.mxu0  ;;  %7041 = vmatpush3.bf16.xpose.msra.mxu0 %v2690_v5  ;;  %v2170_v50 = vpop.f32.mrf.mxu1  ;;  %v963_v5 = vld [vmem:[%s8916_s17] sm:$0xff]  ;;  %s7804_s17 = smov [#allocation3]  }
 0x157   : > { %7042 = vmatprep.mubr.msk.bf16.mxu0 %vm7796_vm0, %v7795_v1  ;;  %7052 = vmatprep.subr.bf16.mxu0 %v7795_v1  ;;  %v3026_v53 = vsel %vm2978_vm3, %v2968_v49, 0 }
 0x158   : > { %7072 = vmatprep.mubr.msk.bf16.mxu1 %vm7796_vm0, %v7795_v1  ;;  %v1963_v36 = vpop.f32.mrf.mxu0  ;;  %v6967_v55 = vpop.f32.mrf.mxu1  ;;  %7071 = vmatpush3.bf16.msra.mxu1 %v3026_v53 }
 0x159   : > { %v1964_v37 = vadd.f32 %v6381_v34, %v1963_v36  ;;  %7082 = vmatprep.subr.bf16.mxu1 %v7795_v1 }
 0x15a   : > { %v6942_v38 = vpop.f32.mrf.mxu0  ;;  %v8297_v56 = vpop.f32.mrf.mxu1 }
 0x15b   : > { %v2499_v40 = vpack.c.bf16 %v1964_v37, %v1964_v37 }
 0x15c   : > { %v1966_v43 = vpop.f32.mrf.mxu0  ;;  %v6982_v58 = vpop.f32.mrf.mxu1 }
 0x15d   : > { %v2782_v44 = vsel %vm2501_vm2, %v2499_v40, 0  ;;  %7043 = vmatmul.mubr.msk.bf16.vlgmr.msra.gmra.mxu0 %vm2501_vm2, %v2489_v39 }
 0x15e   : > { %v6943_v46 = vpop.f32.mrf.mxu0  ;;  %7053 = vmatpush3.bf16.xpose.msra.mxu0 %v2782_v44  ;;  %7054 = vmatprep.mubr.msk.bf16.mxu0 %vm7796_vm0, %v7795_v1  ;;  %v2274_v61 = vpop.f32.mrf.mxu1 }
 0x15f   : > { %7064 = vmatprep.subr.bf16.mxu0 %v7795_v1 }
 0x160   : > { %v2115_v27 = vpop.f32.mrf.mxu0  ;;  %v6983_v0 = vpop.f32.mrf.mxu1 }
 0x161   : > { %v2116_v52 = vadd.f32 %v6407_v57, %v2115_v27 }
 0x162   : > { %v6958_v59 = vpop.f32.mrf.mxu0  ;;  %v8303_v6 = vpop.f32.mrf.mxu1 }
 0x163   : > { %v2967_v62 = vpack.c.bf16 %v2116_v52, %v2116_v52 }
 0x164   : > { %v2118_v63 = vpop.f32.mrf.mxu0  ;;  %v6998_v8 = vpop.f32.mrf.mxu1 }
 0x165   : > { %7055 = vmatmul.mubr.msk.bf16.vlgmr.msra.gmra.mxu0 %vm2501_vm2, %v2491_v54  ;;  %v2980_v2 = vsel %vm2978_vm3, %v2967_v62, 0 }
 0x166   : > { %7066 = vmatprep.mubr.msk.bf16.mxu0 %vm7796_vm0, %v7795_v1  ;;  %v6959_v3 = vpop.f32.mrf.mxu0  ;;  %7065 = vmatpush3.bf16.msra.mxu0 %v2980_v2  ;;  %v2378_v10 = vpop.f32.mrf.mxu1 }
 0x167   : > { %7076 = vmatprep.subr.bf16.mxu0 %v7795_v1 }
 0x168   : > { %v8306_v7 = vpop.f32.mrf.mxu0  ;;  %v6999_v12 = vpop.f32.mrf.mxu1 }
 0x16a   : > { %v6974_v9 = vpop.f32.mrf.mxu0  ;;  %v8308_v14 = vpop.f32.mrf.mxu1 }
 0x16c   : > { %v2222_v11 = vpop.f32.mrf.mxu0  ;;  %v7014_v60 = vpop.f32.mrf.mxu1 }
 0x16e   : > { %v6975_v51 = vpop.f32.mrf.mxu0  ;;  %v2482_v17 = vpop.f32.mrf.mxu1 }
 0x170   : > { %v8310_v15 = vpop.f32.mrf.mxu0  ;;  %v7015_v19 = vpop.f32.mrf.mxu1 }
 0x172   : > { %v6990_v16 = vpop.f32.mrf.mxu0 }
 0x174   : > { %v2326_v18 = vpop.f32.mrf.mxu0 }
 0x176   : > { %v6991_v20 = vpop.f32.mrf.mxu0 }
 0x178   : > { %v8312_v21 = vpop.f32.mrf.mxu0 }
 0x17a   : > { %v7006_v22 = vpop.f32.mrf.mxu0 }
 0x17c   : > { %v2430_v23 = vpop.f32.mrf.mxu0 }
 0x17e   : > { %v7007_v24 = vpop.f32.mrf.mxu0 }
 0x1fe   : > { %v2588_v25 = vpop.f32.mrf.mxu1 }
 0x1ff   : > { %v2589_v38 = vadd.f32 %v2588_v25, %v963_v5 }
 0x200   : > { %v7026_v26 = vpop.f32.mrf.mxu1 }
 0x201   : > { %v2874_v44 = vsel %vm2870_vm4, %v2589_v38, -inf }
 0x202   : > { %v2591_v28 = vpop.f32.mrf.mxu1 }
 0x204   : > { %v7027_v29 = vpop.f32.mrf.mxu1 }
 0x206   : > { %v2680_v30 = vpop.f32.mrf.mxu1 }
 0x207   : > { %v2681_v49 = vadd.f32 %v2680_v30, %v963_v5 }
 0x208   : > { %v7038_v31 = vpop.f32.mrf.mxu1 }
 0x209   : > { %v2880_v58 = vsel %vm2870_vm4, %v2681_v49, -inf }
 0x20a   : > { %v2683_v4 = vpop.f32.mrf.mxu1 }
 0x20c   : > { %v7039_v32 = vpop.f32.mrf.mxu1 }
 0x20d   : > { %v2542_v33 = vpop.f32.mrf.mxu0 }
 0x20e   : > { %v2772_v34 = vpop.f32.mrf.mxu1  ;;  %v2543_v35 = vadd.f32 %v2542_v33, %v963_v5 }
 0x20f   : > { %v7020_v36 = vpop.f32.mrf.mxu0  ;;  %v2773_v27 = vadd.f32 %v2772_v34, %v963_v5 }
 0x210   : > { %v7050_v37 = vpop.f32.mrf.mxu1  ;;  %v2871_v39 = vsel %vm2870_vm4, %v2543_v35, -inf }
 0x211   : > { %2872 = vmax.xlane.f32.xlu0 %v2871_v39  ;;  %v2545_v41 = vpop.f32.mrf.mxu0  ;;  %v2886_v63 = vsel %vm2870_vm4, %v2773_v27, -inf }
 0x212   : > { %v2775_v40 = vpop.f32.mrf.mxu1 }
 0x213   : > { %v7021_v42 = vpop.f32.mrf.mxu0 }
 0x214   : > { %v7051_v43 = vpop.f32.mrf.mxu1 }
 0x215   : > { %2875 = vmax.xlane.f32.xlu0 %v2874_v44  ;;  %v2634_v46 = vpop.f32.mrf.mxu0 }
 0x216   : > { %v2864_v45 = vpop.f32.mrf.mxu1  ;;  %v2635_v13 = vadd.f32 %v2634_v46, %v963_v5 }
 0x217   : > { %v7032_v47 = vpop.f32.mrf.mxu0  ;;  %v2865_v62 = vadd.f32 %v2864_v45, %v963_v5 }
 0x218   : > { %v7062_v48 = vpop.f32.mrf.mxu1  ;;  %v2877_v50 = vsel %vm2870_vm4, %v2635_v13, -inf }
 0x219   : > { %2878 = vmax.xlane.f32.xlu1 %v2877_v50  ;;  %v2637_v54 = vpop.f32.mrf.mxu0  ;;  %v2892_v8 = vsel %vm2870_vm4, %v2865_v62, -inf }
 0x21a   : > { %v2867_v53 = vpop.f32.mrf.mxu1 }
 0x21b   : > { %v7033_v55 = vpop.f32.mrf.mxu0 }
 0x21c   : > { %v7063_v57 = vpop.f32.mrf.mxu1 }
 0x21d   : > { %2881 = vmax.xlane.f32.xlu1 %v2880_v58  ;;  %v2726_v52 = vpop.f32.mrf.mxu0 }
 0x21e   : > { %v2727_v59 = vadd.f32 %v2726_v52, %v963_v5  ;;  %v6409_v52 = vld [vmem:[%s8909_s14 + $0x2] ss:$0 sm:$0xff] }
 0x21f   : > { %v7044_v61 = vpop.f32.mrf.mxu0 }
 0x220   : > { %v2883_v0 = vsel %vm2870_vm4, %v2727_v59, -inf  ;;  %v2220_v61 = vadd.f32 %v6409_v52, %v8306_v7 }
 0x221   : > { %2887 = vmax.xlane.f32.xlu1 %v2886_v63  ;;  %2884 = vmax.xlane.f32.xlu0 %v2883_v0  ;;  %v2729_v2 = vpop.f32.mrf.mxu0 }
 0x223   : > { %v7045_v3 = vpop.f32.mrf.mxu0 }
 0x224   : > { %v2969_v3 = vpack.c.bf16 %v2220_v61, %v2220_v61 }
 0x225   : > { %2893 = vmax.xlane.f32.xlu1 %v2892_v8  ;;  %v2818_v9 = vpop.f32.mrf.mxu0 }
 0x226   : > { %v2819_v10 = vadd.f32 %v2818_v9, %v963_v5  ;;  %v6411_v9 = vld [vmem:[%s8909_s14 + $0x4] ss:$0 sm:$0xff] }
 0x227   : > { %v7056_v11 = vpop.f32.mrf.mxu0  ;;  %v2324_v7 = vadd.f32 %v6411_v9, %v8310_v15  ;;  %v7571_v9 = vld [vmem:[%s8908_s19] sm:$0xff]  }
 0x228   : > { %v2889_v12 = vsel %vm2870_vm4, %v2819_v10, -inf }
 0x229   : > { %2890 = vmax.xlane.f32.xlu0 %v2889_v12  ;;  %v2821_v51 = vpop.f32.mrf.mxu0 }
 0x22b   : > { %v7057_v60 = vpop.f32.mrf.mxu0 }
 0x29a   : > { %v2873_v16 = vpop.xlane.xlu0 %2872 }
 0x29b   : > { %v2895_v17 = vsub.f32 %v2543_v35, %v2873_v16  ;;  %v3072_v16 = vsel %vm2978_vm3, %v2969_v3, 0 }
 0x29d   : > { %v2903_v18 = vmul.f32 1.442695, %v2895_v17 }
 0x29e   : > { %v2876_v19 = vpop.xlane.xlu0 %2875 }
 0x29f   : > { %7632 = vpow2.f32 %v2903_v18  ;;  %v2896_v20 = vsub.f32 %v2589_v38, %v2876_v19  ;;  %v6412_v18 = vld [vmem:[%s8909_s14 + $0x5] ss:$0 sm:$0xff] }
 0x2a1   : > { %v2905_v22 = vmul.f32 1.442695, %v2896_v20 }
 0x2a2   : > { %v2879_v23 = vpop.xlane.xlu1 %2878 }
 0x2a3   : > { %7634 = vpow2.f32 %v2905_v22  ;;  %v2897_v24 = vsub.f32 %v2635_v13, %v2879_v23  ;;  %v2376_v23 = vadd.f32 %v6412_v18, %v8303_v6 }
 0x2a5   : > { %v2907_v25 = vmul.f32 1.442695, %v2897_v24  ;;  %v2971_v24 = vpack.c.bf16 %v2324_v7, %v2324_v7 }
 0x2a6   : > { %v2882_v26 = vpop.xlane.xlu1 %2881 }
 0x2a7   : > { %7636 = vpow2.f32 %v2907_v25  ;;  %v2898_v28 = vsub.f32 %v2681_v49, %v2882_v26  ;;  %v6413_v26 = vld [vmem:[%s8909_s14 + $0x6] ss:$0 sm:$0xff]  ;;  %v3164_v6 = vsel %vm2978_vm3, %v2971_v24, 0 }
 0x2a9   : > { %v2909_v29 = vmul.f32 1.442695, %v2898_v28 }
 0x2aa   : > { %v2888_v30 = vpop.xlane.xlu1 %2887  ;;  %v2885_v31 = vpop.xlane.xlu0 %2884 }
 0x2ab   : > { %7638 = vpow2.f32 %v2909_v29  ;;  %v2900_v4 = vsub.f32 %v2773_v27, %v2888_v30  ;;  %v2899_v32 = vsub.f32 %v2727_v59, %v2885_v31  ;;  %v2972_v30 = vpack.c.bf16 %v2376_v23, %v2376_v23 }
 0x2ac   : > { %v7633_v5 = vpop.eup %7632 }
 0x2ad   : > { %v2913_v33 = vmul.f32 1.442695, %v2900_v4  ;;  %v2911_v34 = vmul.f32 1.442695, %v2899_v32  ;;  %v2919_v35 = vsel %vm2870_vm4, %v7633_v5, 0.0  ;;  %v2428_v32 = vadd.f32 %v6413_v26, %v8312_v21 }
 0x2ae   : > { %v2894_v36 = vpop.xlane.xlu1 %2893  ;;  %2920 = vadd.xlane.f32.xlu0 %v2919_v35  ;;  %v6414_v4 = vld [vmem:[%s8909_s14 + $0x7] ss:$0 sm:$0xff]  ;;  %v3210_v35 = vsel %vm2978_vm3, %v2972_v30, 0 }
 0x2af   : > { %7640 = vpow2.f32 %v2913_v33  ;;  %v2902_v37 = vsub.f32 %v2865_v62, %v2894_v36  ;;  %v6410_v62 = vld [vmem:[%s8909_s14 + $0x3] ss:$0 sm:$0xff]  ;;  %v2480_v36 = vadd.f32 %v6414_v4, %v8308_v14 }
 0x2b0   : > { %v7635_v38 = vpop.eup %7634  ;;  %7642 = vpow2.f32 %v2911_v34  ;;  %v2272_v2 = vadd.f32 %v6410_v62, %v8297_v56 }
 0x2b1   : > { %v2917_v39 = vmul.f32 1.442695, %v2902_v37  ;;  %v2922_v40 = vsel %vm2870_vm4, %v7635_v38, 0.0  ;;  %v2973_v37 = vpack.c.bf16 %v2428_v32, %v2428_v32  ;;  %v6455_v32 = vld [vmem:[%s7868_s24] ss:$0 sm:$0xff] }
 0x2b2   : > { %2923 = vadd.xlane.f32.xlu1 %v2922_v40  ;;  %v2891_v41 = vpop.xlane.xlu0 %2890  ;;  %v2970_v60 = vpack.c.bf16 %v2272_v2, %v2272_v2  ;;  %v2974_v40 = vpack.c.bf16 %v2480_v36, %v2480_v36  ;;  %v7570_v2 = vld [vmem:[%s8908_s19 + $0x8] sm:$0xff]   ;;  %s7707_s19 = sshll.u32 %s7804_s17, 4  ;;  %s7708_s19 = int_to_ptr.vmem [resolvable:$false] %s7707_s19 }
 0x2b3   : > { %7644 = vpow2.f32 %v2917_v39  ;;  %v2901_v42 = vsub.f32 %v2819_v10, %v2891_v41  ;;  %v3256_v41 = vsel %vm2978_vm3, %v2973_v37, 0 }
 0x2b4   : > { %v7637_v43 = vpop.eup %7636  ;;  %v3118_v22 = vsel %vm2978_vm3, %v2970_v60, 0 }
 0x2b5   : > { %v2915_v44 = vmul.f32 1.442695, %v2901_v42  ;;  %v2925_v45 = vsel %vm2870_vm4, %v7637_v43, 0.0 }
 0x2b6   : > { %2926 = vadd.xlane.f32.xlu0 %v2925_v45 }
 0x2b7   : > { %7646 = vpow2.f32 %v2915_v44  ;;  %v3302_v44 = vsel %vm2978_vm3, %v2974_v40, 0 }
 0x2b8   : > { %v8326_v46 = vpop.eup %7638 }
 0x2b9   : > { %v2928_v13 = vsel %vm2870_vm4, %v8326_v46, 0.0 }
 0x2ba   : > { %2929 = vadd.xlane.f32.xlu1 %v2928_v13 }
 0x2bc   : > { %v8330_v47 = vpop.eup %7640 }
 0x2bd   : > { %v8332_v48 = vpop.eup %7642  ;;  %v2934_v49 = vsel %vm2870_vm4, %v8330_v47, 0.0 }
 0x2be   : > { %2935 = vadd.xlane.f32.xlu1 %v2934_v49  ;;  %v2931_v50 = vsel %vm2870_vm4, %v8332_v48, 0.0 }
 0x2bf   : > { %2932 = vadd.xlane.f32.xlu0 %v2931_v50 }
 0x2c0   : > { %v8338_v53 = vpop.eup %7644 }
 0x2c1   : > { %v2940_v54 = vsel %vm2870_vm4, %v8338_v53, 0.0 }
 0x2c2   : > { %2941 = vadd.xlane.f32.xlu1 %v2940_v54 }
 0x2c4   : > { %v8342_v55 = vpop.eup %7646 }
 0x2c5   : > { %v2937_v57 = vsel %vm2870_vm4, %v8342_v55, 0.0 }
 0x2c6   : > { %2938 = vadd.xlane.f32.xlu0 %v2937_v57 }
 0x337   : > { %v2921_v27 = vpop.xlane.xlu0 %2920 }
 0x338   : > { %7648 = vrcp.f32 %v2921_v27 }
 0x33b   : > { %v2924_v58 = vpop.xlane.xlu1 %2923 }
 0x33c   : > { %7650 = vrcp.f32 %v2924_v58 }
 0x33f   : > { %v2927_v59 = vpop.xlane.xlu0 %2926 }
 0x340   : > { %7652 = vrcp.f32 %v2927_v59 }
 0x343   : > { %v2930_v63 = vpop.xlane.xlu1 %2929 }
 0x344   : > { %7654 = vrcp.f32 %v2930_v63 }
 0x345   : > { %v7649_v0 = vpop.eup %7648 }
 0x346   : > { %v2951_v8 = vmul.f32 %v7649_v0, %v7633_v5 }
 0x347   : > { %v2936_v10 = vpop.xlane.xlu1 %2935 }
 0x348   : > { %7656 = vrcp.f32 %v2936_v10  ;;  %v2933_v11 = vpop.xlane.xlu0 %2932  ;;  %v2959_v12 = vpack.c.bf16 %v2951_v8, %v2951_v8 }
 0x349   : > { %v7651_v51 = vpop.eup %7650  ;;  %7658 = vrcp.f32 %v2933_v11 }
 0x34a   : > { %7067 = vmatmul.mubr.msk.bf16.vlgmr.msra.gmra.mxu0 %vm2870_vm4, %v2959_v12  ;;  %v2952_v17 = vmul.f32 %v7651_v51, %v7635_v38 }
 0x34b   : > { %7077 = vmatpush3.bf16.msra.mxu0 %v3072_v16  ;;  %7078 = vmatprep.mubr.msk.bf16.mxu0 %vm7796_vm0, %v7795_v1  ;;  %v2942_v56 = vpop.xlane.xlu1 %2941 }
 0x34c   : > { %v2960_v19 = vpack.c.bf16 %v2952_v17, %v2952_v17  ;;  %7088 = vmatprep.subr.bf16.mxu0 %v7795_v1  ;;  %7660 = vrcp.f32 %v2942_v56 }
 0x34d   : > { %v7653_v20 = vpop.eup %7652 }
 0x34e   : > { %7073 = vmatmul.mubr.msk.bf16.vlgmr.msra.gmra.mxu1 %vm2870_vm4, %v2960_v19  ;;  %v2953_v15 = vmul.f32 %v7653_v20, %v7637_v43 }
 0x34f   : > { %7083 = vmatpush3.bf16.msra.mxu1 %v3118_v22  ;;  %v2939_v25 = vpop.xlane.xlu0 %2938  ;;  %7084 = vmatprep.mubr.msk.bf16.mxu1 %vm7796_vm0, %v7795_v1 }
 0x350   : > { %7662 = vrcp.f32 %v2939_v25  ;;  %v2961_v28 = vpack.c.bf16 %v2953_v15, %v2953_v15  ;;  %7094 = vmatprep.subr.bf16.mxu1 %v7795_v1 }
 0x351   : > { %v7655_v29 = vpop.eup %7654 }
 0x352   : > { %7079 = vmatmul.mubr.msk.bf16.vlgmr.msra.gmra.mxu0 %vm2870_vm4, %v2961_v28  ;;  %v2954_v31 = vmul.f32 %v7655_v29, %v8326_v46 }
 0x353   : > { %7089 = vmatpush3.bf16.msra.mxu0 %v3164_v6  ;;  %7090 = vmatprep.mubr.msk.bf16.mxu0 %vm7796_vm0, %v7795_v1 }
 0x354   : > { %v2962_v5 = vpack.c.bf16 %v2954_v31, %v2954_v31  ;;  %7100 = vmatprep.subr.bf16.mxu0 %v7795_v1 }
 0x355   : > { %v7657_v33 = vpop.eup %7656 }
 0x356   : > { %v7659_v34 = vpop.eup %7658  ;;  %7085 = vmatmul.mubr.msk.bf16.vlgmr.msra.gmra.mxu1 %vm2870_vm4, %v2962_v5  ;;  %v2956_v21 = vmul.f32 %v7657_v33, %v8330_v47 }
 0x357   : > { %7095 = vmatpush3.bf16.msra.mxu1 %v3210_v35  ;;  %v2955_v38 = vmul.f32 %v7659_v34, %v8332_v48  ;;  %7096 = vmatprep.mubr.msk.bf16.mxu1 %vm7796_vm0, %v7795_v1  ;;  %v7702_v35 = vld [vmem:[%s8032_s28] sm:$0xff]  ;;  %s8918_s28 = sld [smem:[#allocation7_spill]] }
 0x358   : > { %7106 = vmatprep.subr.bf16.mxu1 %v7795_v1  ;;  %v2964_v42 = vpack.c.bf16 %v2956_v21, %v2956_v21 }
 0x359   : > { %v2963_v39 = vpack.c.bf16 %v2955_v38, %v2955_v38  ;;  %v7661_v14 = vpop.eup %7660 }
 0x35a   : > { %v2958_v13 = vmul.f32 %v7661_v14, %v8338_v53 }
 0x35b   : > { %7091 = vmatmul.mubr.msk.bf16.vlgmr.msra.gmra.mxu0 %vm2870_vm4, %v2963_v39 }
 0x35c   : > { %7101 = vmatpush3.bf16.msra.mxu0 %v3256_v41  ;;  %7102 = vmatprep.mubr.msk.bf16.mxu0 %vm7796_vm0, %v7795_v1  ;;  %v2966_v47 = vpack.c.bf16 %v2958_v13, %v2958_v13 }
 0x35d   : > { %v7663_v43 = vpop.eup %7662  ;;  %7112 = vmatprep.subr.bf16.mxu0 %v7795_v1 }
 0x35e   : > { %7097 = vmatmul.mubr.msk.bf16.vlgmr.msra.gmra.mxu1 %vm2870_vm4, %v2964_v42  ;;  %v2957_v45 = vmul.f32 %v7663_v43, %v8342_v55  ;;  %v7572_v43 = vld [vmem:[%s8910_s12 + $0x8] sm:$0xff]  }
 0x35f   : > { %7107 = vmatpush3.bf16.msra.mxu1 %v3302_v44  ;;  %7108 = vmatprep.mubr.msk.bf16.mxu1 %vm7796_vm0, %v7795_v1  ;;  %v7573_v44 = vld [vmem:[%s8910_s12 + $0x18] sm:$0xff]  }
 0x360   : > { %v2965_v46 = vpack.c.bf16 %v2957_v45, %v2957_v45  ;;  %7120 = vmatprep.subr.bf16.mxu1 %v7795_v1  ;;  %v7574_v45 = vld [vmem:[%s8910_s12] sm:$0xff]  }
 0x363   : > { %7103 = vmatmul.mubr.msk.bf16.vlgmr.msra.gmra.mxu0 %vm2870_vm4, %v2965_v46  ;;  %v7575_v46 = vld [vmem:[%s8910_s12 + $0x10] sm:$0xff]  }
 0x364   : > { %7116 = vmatprep.mubr.msk.bf16.mxu0 %vm7796_vm0, %v7795_v1  ;;  %7113 = vmatpush3.bf16.msra.mxu0 %v7570_v2  ;;  %v7583_v2 = vld [vmem:[%s8910_s12 + $0x50] sm:$0xff]  }
 0x365   : > { %7114 = vmatprep.subr.bf16.mxu0 %v7795_v1 }
 0x366   : > { %7109 = vmatmul.mubr.msk.bf16.vlgmr.msra.gmra.mxu1 %vm2870_vm4, %v2966_v47 }
 0x367   : > { %7124 = vmatprep.mubr.msk.bf16.mxu1 %vm7796_vm0, %v7795_v1  ;;  %7121 = vmatpush3.bf16.msra.mxu1 %v7572_v43 }
 0x368   : > { %7115 = vmatpush3.bf16.msra.mxu0 %v7571_v9  ;;  %7122 = vmatprep.subr.bf16.mxu1 %v7795_v1  ;;  %v7586_v9 = vld [vmem:[%s8910_s12 + $0x60] sm:$0xff]  }
 0x369   : > { %7128 = vmatprep.subr.bf16.mxu0 %v7795_v1 }
 0x36b   : > { %7123 = vmatpush3.bf16.msra.mxu1 %v7574_v45 }
 0x36c   : > { %7136 = vmatprep.subr.bf16.mxu1 %v7795_v1 }
 0x40a   : > { %v3016_v48 = vpop.f32.mrf.mxu0 }
 0x40b   : > { %3344 = vst.msk [vmem:[#allocation2] sm:$0xff] %vm2501_vm2, %v3016_v48 }
 0x40c   : > { %v7068_v49 = vpop.f32.mrf.mxu0 }
 0x40e   : > { %v3019_v50 = vpop.f32.mrf.mxu0  ;;  %v3062_v54 = vpop.f32.mrf.mxu1 }
 0x40f   : > { %3346 = vrot.lane.b32.xlu0 %v3062_v54, %s8870_s1  ;;  %s8875_s1 = smov 20   ;;  %v6459_v50 = vld [vmem:[%s7873_s30] ss:$0 sm:$0xff] }
 0x410   : > { %v7069_v53 = vpop.f32.mrf.mxu0  ;;  %v7074_v55 = vpop.f32.mrf.mxu1 }
 0x411   : > { %v6460_v53 = vld [vmem:[%s8917_s6] ss:$0 sm:$0xff]  ;;  %s8928_s6 = smov 16  }
 0x412   : > { %v3065_v57 = vpop.f32.mrf.mxu1  ;;  %v3108_v27 = vpop.f32.mrf.mxu0 }
 0x414   : > { %v7075_v58 = vpop.f32.mrf.mxu1  ;;  %v7080_v52 = vpop.f32.mrf.mxu0 }
 0x415   : > { %v7577_v58 = vld [vmem:[%s8910_s12 + $0x38] sm:$0xff]  }
 0x416   : > { %v3111_v59 = vpop.f32.mrf.mxu0  ;;  %v3154_v61 = vpop.f32.mrf.mxu1 }
 0x417   : > { %3358 = vrot.lane.b32.xlu1 %v3154_v61, %s8871_s11  ;;  %s8876_s11 = smov 16   ;;  %v7578_v59 = vld [vmem:[%s8910_s12 + $0x20] sm:$0xff]   ;;  %v7579_v61 = vld [vmem:[%s8910_s12 + $0x30] sm:$0xff]  }
 0x418   : > { %v7081_v62 = vpop.f32.mrf.mxu0  ;;  %v7086_v63 = vpop.f32.mrf.mxu1 }
 0x419   : > { %v7580_v62 = vld [vmem:[%s8910_s12 + $0x48] sm:$0xff]   ;;  %v7581_v63 = vld [vmem:[%s8910_s12 + $0x58] sm:$0xff]  }
 0x41a   : > { %v3157_v0 = vpop.f32.mrf.mxu1 }
 0x41b   : > { %v3200_v3 = vpop.f32.mrf.mxu0  ;;  %3352 = vrot.lane.b32.xlu1 %v3108_v27, %s8872_s3  ;;  %s8874_s3 = smov 24   ;;  %v7576_v27 = vld [vmem:[%s8910_s12 + $0x28] sm:$0xff]   ;;  %v7582_v0 = vld [vmem:[%s8910_s12 + $0x40] sm:$0xff]  }
 0x41c   : > { %v7087_v8 = vpop.f32.mrf.mxu1 }
 0x41d   : > { %v7092_v10 = vpop.f32.mrf.mxu0  ;;  %v7585_v8 = vld [vmem:[%s8910_s12 + $0x78] sm:$0xff]  }
 0x41e   : > { %v3246_v11 = vpop.f32.mrf.mxu1  ;;  %v7587_v10 = vld [vmem:[%s8910_s12 + $0x70] sm:$0xff]  }
 0x41f   : > { %v3203_v12 = vpop.f32.mrf.mxu0  ;;  %3370 = vrot.lane.b32.xlu0 %v3246_v11, %s8875_s1  ;;  %3364 = vrot.lane.b32.xlu1 %v3200_v3, %s8876_s11  ;;  %v7584_v3 = vld [vmem:[%s8910_s12 + $0x68] sm:$0xff]   ;;  %s8924_s1 = smov 4   ;;  %s8925_s11 = sld [smem:[#allocation20_spill]] }
 0x420   : > { %v7098_v51 = vpop.f32.mrf.mxu1  ;;  %v7588_v11 = vld [vmem:[%s7893_s27 + $0x8] sm:$0xff]   ;;  %v7589_v12 = vld [vmem:[%s7893_s27 + $0x18] sm:$0xff]  }
 0x421   : > { %v7093_v60 = vpop.f32.mrf.mxu0  ;;  %v7590_v51 = vld [vmem:[%s7893_s27] sm:$0xff]  }
 0x422   : > { %v3249_v16 = vpop.f32.mrf.mxu1  ;;  %v7591_v60 = vld [vmem:[%s7893_s27 + $0x10] sm:$0xff]  }
 0x423   : > { %v3292_v7 = vpop.f32.mrf.mxu0 }
 0x424   : > { %3376 = vrot.lane.b32.xlu1 %v3292_v7, %s8874_s3  ;;  %v7099_v17 = vpop.f32.mrf.mxu1 }
 0x425   : > { %v7104_v18 = vpop.f32.mrf.mxu0  ;;  %v7592_v17 = vld [vmem:[%s7893_s27 + $0x28] sm:$0xff]  }
 0x426   : > { %v3338_v56 = vpop.f32.mrf.mxu1  ;;  %v7593_v18 = vld [vmem:[%s7893_s27 + $0x38] sm:$0xff]  }
 0x427   : > { %v3295_v19 = vpop.f32.mrf.mxu0  ;;  %3382 = vrot.lane.b32.xlu0 %v3338_v56, %s8873_s5  ;;  %s955_s5 = scalar_lea.vmem %s8918_s28, %s8027_s23  ;;  %v7594_v56 = vld [vmem:[%s7893_s27 + $0x20] sm:$0xff]   ;;  %s8920_s28 = sld [smem:[#allocation8_spill]] }
 0x428   : > { %v7110_v20 = vpop.f32.mrf.mxu1  ;;  %v3482_v16 = vld [vmem:[%s955_s5] sm:$0xff]  ;;  %v7595_v19 = vld [vmem:[%s7893_s27 + $0x30] sm:$0xff]   ;;  %s8919_s5 = sld [smem:[#allocation18_spill]] }
 0x429   : > { %v7105_v22 = vpop.f32.mrf.mxu0  ;;  %v3483_v7 = vpack.c.bf16 %v3482_v16, %v3482_v16  ;;  %v7596_v20 = vld [vmem:[%s7893_s27 + $0x48] sm:$0xff]  }
 0x42a   : > { %v3341_v23 = vpop.f32.mrf.mxu1  ;;  %v7597_v22 = vld [vmem:[%s7893_s27 + $0x58] sm:$0xff]  }
 0x42b   : > { %v7598_v23 = vld [vmem:[%s7893_s27 + $0x40] sm:$0xff]  }
 0x42c   : > { %v7111_v24 = vpop.f32.mrf.mxu1 }
 0x42d   : > { %v7599_v24 = vld [vmem:[%s7893_s27 + $0x50] sm:$0xff]   ;;  %s959_s3 = scalar_lea.vmem %s8920_s28, %s8027_s23  ;;  %s8922_s23 = sld [smem:[#allocation16_spill]] }
 0x42e   : > { %s8923_s28 = sld [smem:[#allocation19_spill]] }
 0x481   : > { %v3347_v15 = vpop.permute.xlu0 %3346 }
 0x482   : > { %3350 = vst.msk [vmem:[#allocation2] sm:$0xff] %vm3349_vm5, %v3347_v15  ;;  %v7600_v15 = vld [vmem:[%s7893_s27 + $0x68] sm:$0xff]  }
 0x489   : > { %v3359_v25 = vpop.permute.xlu1 %3358 }
 0x48d   : > { %v3353_v26 = vpop.permute.xlu1 %3352 }
 0x48e   : > { %3356 = vst.msk [vmem:[#allocation2] sm:$0xff] %vm3355_vm6, %v3353_v26  ;;  %v7602_v26 = vld [vmem:[%s7893_s27 + $0x60] sm:$0xff]  }
 0x48f   : > { %3362 = vst.msk [vmem:[#allocation2] sm:$0xff] %vm3361_vm7, %v3359_v25  ;;  %v7601_v25 = vld [vmem:[%s7893_s27 + $0x78] sm:$0xff]  }
 0x491   : > { %v3371_v28 = vpop.permute.xlu0 %3370  ;;  %v3365_v29 = vpop.permute.xlu1 %3364 }
 0x492   : > { %3368 = vst.msk [vmem:[#allocation2] sm:$0xff] %vm3367_vm8, %v3365_v29  ;;  %v7604_v29 = vld [vmem:[%s8919_s5 + $0x8] sm:$0xff]  }
 0x493   : > { %3374 = vst.msk [vmem:[#allocation2] sm:$0xff] %vm3373_vm9, %v3371_v28  ;;  %v7603_v28 = vld [vmem:[%s7893_s27 + $0x70] sm:$0xff]  }
 0x496   : > { %v3377_v30 = vpop.permute.xlu1 %3376 }
 0x497   : > { %3380 = vst.msk [vmem:[#allocation2] sm:$0xff] %vm3379_vm10, %v3377_v30  ;;  %v7605_v30 = vld [vmem:[%s8919_s5] sm:$0xff]  }
 0x499   : > { %v3383_v6 = vpop.permute.xlu0 %3382 }
 0x49a   : > { %3386 = vst.msk [vmem:[#allocation2] sm:$0xff] %vm3385_vm11, %v3383_v6  ;;  %v7606_v6 = vld [vmem:[%s8919_s5 + $0x18] sm:$0xff]  }
 0x4a1   : > { %v3387_v31 = vld [vmem:[#allocation2] sm:$0xff] }
 0x4a2   : > { %v3388_v4 = vpack.c.bf16 %v3387_v31, %v3387_v31  ;;  %v3484_v31 = vld [vmem:[%s959_s3] sm:$0xff]  ;;  %s8921_s3 = sld [smem:[#allocation17_spill]] }
 0x4a4   : > { %7117 = vmatmul.mubr.msk.bf16.vlgmr.msra.gmra.mxu0 %vm1149_vm1, %v3388_v4  ;;  %v3485_v4 = vpack.c.bf16 %v3484_v31, %v3484_v31 }
 0x4a5   : > { %7132 = vmatprep.mubr.msk.bf16.mxu0 %vm7796_vm0, %v7795_v1  ;;  %7129 = vmatpush3.bf16.msra.mxu0 %v7573_v44 }
 0x4a6   : > { %7130 = vmatprep.subr.bf16.mxu0 %v7795_v1 }
 0x4a9   : > { %7131 = vmatpush3.bf16.msra.mxu0 %v7575_v46 }
 0x4aa   : > { %7144 = vmatprep.subr.bf16.mxu0 %v7795_v1 }
 0x564   : > { %v3444_v5 = vpop.f32.mrf.mxu0 }
 0x565   : > { %v3445_v33 = vadd.f32 %v6455_v32, %v3444_v5  ;;  %v7607_v32 = vld [vmem:[%s8919_s5 + $0x10] sm:$0xff]   ;;  %v7608_v5 = vld [vmem:[%s8919_s5 + $0x28] sm:$0xff]  }
 0x566   : > { %v7118_v34 = vpop.f32.mrf.mxu0 }
 0x567   : > { %v3452_v36 = vadd.f32 %v7702_v35, %v3445_v33  ;;  %v7609_v33 = vld [vmem:[%s8919_s5 + $0x20] sm:$0xff]   ;;  %v7610_v34 = vld [vmem:[%s8919_s5 + $0x38] sm:$0xff]   ;;  %v7611_v35 = vld [vmem:[%s8919_s5 + $0x30] sm:$0xff]  }
 0x568   : > { %v3447_v37 = vpop.f32.mrf.mxu0 }
 0x569   : > { %v3453_v38 = vsel %vm1149_vm1, %v3452_v36, 0.0  ;;  %v7613_v37 = vld [vmem:[%s8919_s5 + $0x40] sm:$0xff]  }
 0x56a   : > { %3454 = vadd.xlane.f32.xlu1 %v3453_v38  ;;  %v7119_v21 = vpop.f32.mrf.mxu0  ;;  %v7614_v38 = vld [vmem:[%s8919_s5 + $0x58] sm:$0xff]  }
 0x56b   : > { %v7615_v21 = vld [vmem:[%s8919_s5 + $0x50] sm:$0xff]  }
 0x5f3   : > { %v3455_v39 = vpop.xlane.xlu1 %3454 }
 0x5f4   : > { %v3457_v40 = vmul.f32 0.03125, %v3455_v39  ;;  %v7616_v39 = vld [vmem:[%s8919_s5 + $0x68] sm:$0xff]  }
 0x5f6   : > { %v3458_v41 = vsub.f32 %v3452_v36, %v3457_v40  ;;  %v7612_v36 = vld [vmem:[%s8919_s5 + $0x48] sm:$0xff]   ;;  %v7617_v40 = vld [vmem:[%s8919_s5 + $0x60] sm:$0xff]  }
 0x5f8   : > { %v3459_v14 = vmul.f32 %v3458_v41, %v3458_v41 }
 0x5fa   : > { %v3460_v42 = vsel %vm1149_vm1, %v3459_v14, 0.0  ;;  %v7619_v14 = vld [vmem:[%s8919_s5 + $0x70] sm:$0xff]  }
 0x5fb   : > { %3461 = vadd.xlane.f32.xlu0 %v3460_v42 }
 0x684   : > { %v3462_v13 = vpop.xlane.xlu0 %3461 }
 0x685   : > { %v3463_v47 = vmul.f32 0.03125, %v3462_v13 }
 0x687   : > { %v3464_v48 = vadd.f32 1e-05, %v3463_v47 }
 0x689   : > { %7664 = vrsqrt.f32 %v3464_v48 }
 0x696   : > { %v7665_v49 = vpop.eup %7664 }
 0x697   : > { %v3466_v54 = vmul.f32 %v7665_v49, %v3458_v41  ;;  %v7618_v41 = vld [vmem:[%s8919_s5 + $0x78] sm:$0xff]   ;;  %s8927_s5 = smov 12  }
 0x699   : > { %v3473_v55 = vmul.f32 %v6459_v50, %v3466_v54 }
 0x69b   : > { %v8435_v57 = vadd.f32 %v6460_v53, %v3473_v55 }
 0x69d   : > { %v3481_v52 = vpack.c.bf16 %v8435_v57, %v8435_v57 }
 0x69f   : > { %7125 = vmatmul.mubr.msk.bf16.vlgmr.msra.gmra.mxu1 %vm1149_vm1, %v3481_v52  ;;  %7133 = vmatmul.mubr.msk.bf16.vlgmr.msra.gmra.mxu0 %vm1149_vm1, %v3481_v52 }
 0x6a0   : > { %7137 = vmatpush3.bf16.msra.mxu1 %v7576_v27  ;;  %7145 = vmatpush3.bf16.msra.mxu0 %v7577_v58 }
 0x6a1   : > { %7138 = vmatprep.subr.bf16.mxu1 %v7795_v1  ;;  %7146 = vmatprep.subr.bf16.mxu0 %v7795_v1 }
 0x6a2   : > { %7140 = vmatprep.mubr.msk.bf16.mxu1 %vm7796_vm0, %v7795_v1  ;;  %7148 = vmatprep.mubr.msk.bf16.mxu0 %vm7796_vm0, %v7795_v1 }
 0x6a4   : > { %7139 = vmatpush3.bf16.msra.mxu1 %v7578_v59  ;;  %7147 = vmatpush3.bf16.msra.mxu0 %v7579_v61 }
 0x6a5   : > { %7152 = vmatprep.subr.bf16.mxu1 %v7795_v1  ;;  %7160 = vmatprep.subr.bf16.mxu0 %v7795_v1 }
 0x6a7   : > { %7141 = vmatmul.mubr.msk.bf16.vlgmr.msra.gmra.mxu1 %vm1149_vm1, %v3481_v52  ;;  %7149 = vmatmul.mubr.msk.bf16.vlgmr.msra.gmra.mxu0 %vm1149_vm1, %v3481_v52 }
 0x6a8   : > { %7153 = vmatpush3.bf16.msra.mxu1 %v7580_v62  ;;  %7161 = vmatpush3.bf16.msra.mxu0 %v7581_v63 }
 0x6a9   : > { %7154 = vmatprep.subr.bf16.mxu1 %v7795_v1  ;;  %7162 = vmatprep.subr.bf16.mxu0 %v7795_v1 }
 0x6aa   : > { %7156 = vmatprep.mubr.msk.bf16.mxu1 %vm7796_vm0, %v7795_v1  ;;  %7164 = vmatprep.mubr.msk.bf16.mxu0 %vm7796_vm0, %v7795_v1 }
 0x6ac   : > { %7155 = vmatpush3.bf16.msra.mxu1 %v7582_v0  ;;  %7163 = vmatpush3.bf16.msra.mxu0 %v7583_v2 }
 0x6ad   : > { %7168 = vmatprep.subr.bf16.mxu1 %v7795_v1  ;;  %7176 = vmatprep.subr.bf16.mxu0 %v7795_v1 }
 0x6af   : > { %7157 = vmatmul.mubr.msk.bf16.vlgmr.msra.gmra.mxu1 %vm1149_vm1, %v3481_v52  ;;  %7165 = vmatmul.mubr.msk.bf16.vlgmr.msra.gmra.mxu0 %vm1149_vm1, %v3481_v52 }
 0x6b0   : > { %7169 = vmatpush3.bf16.msra.mxu1 %v7584_v3  ;;  %7177 = vmatpush3.bf16.msra.mxu0 %v7585_v8 }
 0x6b1   : > { %7170 = vmatprep.subr.bf16.mxu1 %v7795_v1  ;;  %7178 = vmatprep.subr.bf16.mxu0 %v7795_v1 }
 0x6b2   : > { %7172 = vmatprep.mubr.msk.bf16.mxu1 %vm7796_vm0, %v7795_v1  ;;  %7180 = vmatprep.mubr.msk.bf16.mxu0 %vm7796_vm0, %v7795_v1 }
 0x6b4   : > { %7171 = vmatpush3.bf16.msra.mxu1 %v7586_v9  ;;  %7179 = vmatpush3.bf16.msra.mxu0 %v7587_v10 }
 0x6b5   : > { %7184 = vmatprep.subr.bf16.mxu1 %v7795_v1  ;;  %7192 = vmatprep.subr.bf16.mxu0 %v7795_v1 }
 0x6b7   : > { %7173 = vmatmul.mubr.msk.bf16.vlgmr.msra.gmra.mxu1 %vm1149_vm1, %v3481_v52  ;;  %7181 = vmatmul.mubr.msk.bf16.vlgmr.msra.gmra.mxu0 %vm1149_vm1, %v3481_v52 }
 0x6b8   : > { %7185 = vmatpush3.bf16.msra.mxu1 %v7588_v11  ;;  %7193 = vmatpush3.bf16.msra.mxu0 %v7589_v12 }
 0x6b9   : > { %7186 = vmatprep.subr.bf16.mxu1 %v7795_v1  ;;  %7194 = vmatprep.subr.bf16.mxu0 %v7795_v1 }
 0x6ba   : > { %7188 = vmatprep.mubr.msk.bf16.mxu1 %vm7796_vm0, %v7795_v1  ;;  %7196 = vmatprep.mubr.msk.bf16.mxu0 %vm7796_vm0, %v7795_v1 }
 0x6bc   : > { %7187 = vmatpush3.bf16.msra.mxu1 %v7590_v51  ;;  %7195 = vmatpush3.bf16.msra.mxu0 %v7591_v60 }
 0x6bd   : > { %7200 = vmatprep.subr.bf16.mxu1 %v7795_v1  ;;  %7208 = vmatprep.subr.bf16.mxu0 %v7795_v1 }
 0x6bf   : > { %7189 = vmatmul.mubr.msk.bf16.vlgmr.msra.gmra.mxu1 %vm1149_vm1, %v3483_v7  ;;  %7197 = vmatmul.mubr.msk.bf16.vlgmr.msra.gmra.mxu0 %vm1149_vm1, %v3483_v7 }
 0x6c0   : > { %7201 = vmatpush3.bf16.msra.mxu1 %v7592_v17  ;;  %7209 = vmatpush3.bf16.msra.mxu0 %v7593_v18  ;;  %v6493_v17 = vld [vmem:[%s8921_s3] ss:$0 sm:$0xff]  ;;  %v6494_v18 = vld [vmem:[%s8921_s3 + $0x1] ss:$0 sm:$0xff] }
 0x6c1   : > { %7202 = vmatprep.subr.bf16.mxu1 %v7795_v1  ;;  %7210 = vmatprep.subr.bf16.mxu0 %v7795_v1 }
 0x6c2   : > { %7204 = vmatprep.mubr.msk.bf16.mxu1 %vm7796_vm0, %v7795_v1  ;;  %7212 = vmatprep.mubr.msk.bf16.mxu0 %vm7796_vm0, %v7795_v1 }
 0x6c4   : > { %7203 = vmatpush3.bf16.msra.mxu1 %v7594_v56  ;;  %7211 = vmatpush3.bf16.msra.mxu0 %v7595_v19 }
 0x6c5   : > { %7216 = vmatprep.subr.bf16.mxu1 %v7795_v1  ;;  %7224 = vmatprep.subr.bf16.mxu0 %v7795_v1 }
 0x6c7   : > { %7205 = vmatmul.mubr.msk.bf16.vlgmr.msra.gmra.mxu1 %vm1149_vm1, %v3483_v7  ;;  %7213 = vmatmul.mubr.msk.bf16.vlgmr.msra.gmra.mxu0 %vm1149_vm1, %v3483_v7 }
 0x6c8   : > { %7217 = vmatpush3.bf16.msra.mxu1 %v7596_v20  ;;  %7225 = vmatpush3.bf16.msra.mxu0 %v7597_v22 }
 0x6c9   : > { %7218 = vmatprep.subr.bf16.mxu1 %v7795_v1  ;;  %7226 = vmatprep.subr.bf16.mxu0 %v7795_v1 }
 0x6ca   : > { %7220 = vmatprep.mubr.msk.bf16.mxu1 %vm7796_vm0, %v7795_v1  ;;  %7228 = vmatprep.mubr.msk.bf16.mxu0 %vm7796_vm0, %v7795_v1 }
 0x6cc   : > { %7219 = vmatpush3.bf16.msra.mxu1 %v7598_v23  ;;  %7227 = vmatpush3.bf16.msra.mxu0 %v7599_v24 }
 0x6cd   : > { %7232 = vmatprep.subr.bf16.mxu1 %v7795_v1  ;;  %7240 = vmatprep.subr.bf16.mxu0 %v7795_v1 }
 0x6cf   : > { %7221 = vmatmul.mubr.msk.bf16.vlgmr.msra.gmra.mxu1 %vm1149_vm1, %v3483_v7  ;;  %7229 = vmatmul.mubr.msk.bf16.vlgmr.msra.gmra.mxu0 %vm1149_vm1, %v3483_v7 }
 0x6d0   : > { %7233 = vmatpush3.bf16.msra.mxu1 %v7600_v15  ;;  %7241 = vmatpush3.bf16.msra.mxu0 %v7601_v25 }
 0x6d1   : > { %7234 = vmatprep.subr.bf16.mxu1 %v7795_v1  ;;  %7242 = vmatprep.subr.bf16.mxu0 %v7795_v1 }
 0x6d2   : > { %7236 = vmatprep.mubr.msk.bf16.mxu1 %vm7796_vm0, %v7795_v1  ;;  %7244 = vmatprep.mubr.msk.bf16.mxu0 %vm7796_vm0, %v7795_v1 }
 0x6d4   : > { %7235 = vmatpush3.bf16.msra.mxu1 %v7602_v26  ;;  %7243 = vmatpush3.bf16.msra.mxu0 %v7603_v28  ;;  %v6461_v26 = vld [vmem:[%s8922_s23] ss:$0 sm:$0xff]  ;;  %v6462_v28 = vld [vmem:[%s8922_s23 + $0x1] ss:$0 sm:$0xff] }
 0x6d5   : > { %7248 = vmatprep.subr.bf16.mxu1 %v7795_v1  ;;  %7256 = vmatprep.subr.bf16.mxu0 %v7795_v1 }
 0x6d7   : > { %7237 = vmatmul.mubr.msk.bf16.vlgmr.msra.gmra.mxu1 %vm1149_vm1, %v3483_v7  ;;  %7245 = vmatmul.mubr.msk.bf16.vlgmr.msra.gmra.mxu0 %vm1149_vm1, %v3483_v7 }
 0x6d8   : > { %7252 = vmatprep.mubr.msk.bf16.mxu1 %vm7796_vm0, %v7795_v1  ;;  %7260 = vmatprep.mubr.msk.bf16.mxu0 %vm7796_vm0, %v7795_v1 }
 0x6d9   : > { %7249 = vmatpush3.bf16.msra.mxu1 %v7604_v29  ;;  %7257 = vmatpush3.bf16.msra.mxu0 %v7606_v6 }
 0x6da   : > { %7250 = vmatprep.subr.bf16.mxu1 %v7795_v1  ;;  %7258 = vmatprep.subr.bf16.mxu0 %v7795_v1 }
 0x6dd   : > { %7251 = vmatpush3.bf16.msra.mxu1 %v7605_v30  ;;  %7259 = vmatpush3.bf16.msra.mxu0 %v7607_v32 }
 0x6de   : > { %7264 = vmatprep.subr.bf16.mxu1 %v7795_v1  ;;  %7272 = vmatprep.subr.bf16.mxu0 %v7795_v1 }
 0x6e0   : > { %7253 = vmatmul.mubr.msk.bf16.vlgmr.msra.gmra.mxu1 %vm1149_vm1, %v3485_v4  ;;  %7261 = vmatmul.mubr.msk.bf16.vlgmr.msra.gmra.mxu0 %vm1149_vm1, %v3485_v4 }
 0x6e1   : > { %7265 = vmatpush3.bf16.msra.mxu1 %v7608_v5  ;;  %7268 = vmatprep.mubr.msk.bf16.mxu1 %vm7796_vm0, %v7795_v1  ;;  %v6495_v5 = vld [vmem:[%s8921_s3 + $0x2] ss:$0 sm:$0xff] }
 0x6e2   : > { %7266 = vmatprep.subr.bf16.mxu1 %v7795_v1  ;;  %7273 = vmatpush3.bf16.msra.mxu0 %v7610_v34 }
 0x6e3   : > { %7274 = vmatprep.subr.bf16.mxu0 %v7795_v1  ;;  %7276 = vmatprep.mubr.msk.bf16.mxu0 %vm7796_vm0, %v7795_v1 }
 0x6e5   : > { %7267 = vmatpush3.bf16.msra.mxu1 %v7609_v33  ;;  %v6496_v33 = vld [vmem:[%s8921_s3 + $0x3] ss:$0 sm:$0xff] }
 0x6e6   : > { %7280 = vmatprep.subr.bf16.mxu1 %v7795_v1  ;;  %7275 = vmatpush3.bf16.msra.mxu0 %v7611_v35 }
 0x6e7   : > { %7288 = vmatprep.subr.bf16.mxu0 %v7795_v1 }
 0x6e8   : > { %7269 = vmatmul.mubr.msk.bf16.vlgmr.msra.gmra.mxu1 %vm1149_vm1, %v3485_v4 }
 0x6e9   : > { %7281 = vmatpush3.bf16.msra.mxu1 %v7612_v36  ;;  %7284 = vmatprep.mubr.msk.bf16.mxu1 %vm7796_vm0, %v7795_v1 }
 0x6ea   : > { %7282 = vmatprep.subr.bf16.mxu1 %v7795_v1  ;;  %7277 = vmatmul.mubr.msk.bf16.vlgmr.msra.gmra.mxu0 %vm1149_vm1, %v3485_v4 }
 0x6eb   : > { %7289 = vmatpush3.bf16.msra.mxu0 %v7614_v38  ;;  %7292 = vmatprep.mubr.msk.bf16.mxu0 %vm7796_vm0, %v7795_v1 }
 0x6ec   : > { %7290 = vmatprep.subr.bf16.mxu0 %v7795_v1 }
 0x6ed   : > { %7283 = vmatpush3.bf16.msra.mxu1 %v7613_v37 }
 0x6ee   : > { %7296 = vmatprep.subr.bf16.mxu1 %v7795_v1 }
 0x6ef   : > { %7291 = vmatpush3.bf16.msra.mxu0 %v7615_v21 }
 0x6f0   : > { %7285 = vmatmul.mubr.msk.bf16.vlgmr.msra.gmra.mxu1 %vm1149_vm1, %v3485_v4  ;;  %7304 = vmatprep.subr.bf16.mxu0 %v7795_v1 }
 0x6f1   : > { %7297 = vmatpush3.bf16.msra.mxu1 %v7616_v39  ;;  %7300 = vmatprep.mubr.msk.bf16.mxu1 %vm7796_vm0, %v7795_v1 }
 0x6f2   : > { %7298 = vmatprep.subr.bf16.mxu1 %v7795_v1  ;;  %7293 = vmatmul.mubr.msk.bf16.vlgmr.msra.gmra.mxu0 %vm1149_vm1, %v3485_v4 }
 0x6f3   : > { %7305 = vmatpush3.bf16.msra.mxu0 %v7618_v41  ;;  %7308 = vmatprep.mubr.msk.bf16.mxu0 %vm7796_vm0, %v7795_v1 }
 0x6f4   : > { %7306 = vmatprep.subr.bf16.mxu0 %v7795_v1 }
 0x6f5   : > { %7299 = vmatpush3.bf16.msra.mxu1 %v7617_v40 }
 0x6f6   : > { %7312 = vmatprep.subr.bf16.mxu1 %v7795_v1 }
 0x6f7   : > { %7307 = vmatpush3.bf16.msra.mxu0 %v7619_v14 }
 0x6f8   : > { %7301 = vmatmul.mubr.msk.bf16.vlgmr.msra.gmra.mxu1 %vm1149_vm1, %v3485_v4  ;;  %7318 = vmatprep.subr.bf16.mxu0 %v7795_v1 }
 0x6f9   : > { %7314 = vmatprep.mubr.msk.bf16.mxu1 %vm7796_vm0, %v7795_v1 }
 0x6fa   : > { %7309 = vmatmul.mubr.msk.bf16.vlgmr.msra.gmra.mxu0 %vm1149_vm1, %v3485_v4 }
 0x6fb   : > { %7320 = vmatprep.mubr.msk.bf16.mxu0 %vm7796_vm0, %v7795_v1 }
 0x75f   : > { %v3708_v42 = vpop.f32.mrf.mxu1  ;;  %v3760_v43 = vpop.f32.mrf.mxu0 }
 0x760   : > { %v3709_v34 = vadd.f32 %v6461_v26, %v3708_v42  ;;  %v3761_v35 = vadd.f32 %v6462_v28, %v3760_v43 }
 0x761   : > { %v7126_v44 = vpop.f32.mrf.mxu1  ;;  %v7134_v45 = vpop.f32.mrf.mxu0 }
 0x762   : > { %v5012_v41 = vpack.c.bf16 %v3709_v34, %v3709_v34  ;;  %v5013_v14 = vpack.c.bf16 %v3761_v35, %v3761_v35 }
 0x763   : > { %v3711_v46 = vpop.f32.mrf.mxu1  ;;  %v3763_v13 = vpop.f32.mrf.mxu0 }
 0x764   : > { %v6463_v46 = vld [vmem:[%s8922_s23 + $0x2] ss:$0 sm:$0xff]  ;;  %v6464_v13 = vld [vmem:[%s8922_s23 + $0x3] ss:$0 sm:$0xff] }
 0x765   : > { %v7127_v47 = vpop.f32.mrf.mxu1  ;;  %v7135_v48 = vpop.f32.mrf.mxu0 }
 0x767   : > { %v8603_v49 = vpop.f32.mrf.mxu1  ;;  %v8605_v50 = vpop.f32.mrf.mxu0 }
 0x769   : > { %v7142_v54 = vpop.f32.mrf.mxu1  ;;  %v7150_v53 = vpop.f32.mrf.mxu0 }
 0x76b   : > { %v3815_v55 = vpop.f32.mrf.mxu1  ;;  %v3867_v27 = vpop.f32.mrf.mxu0 }
 0x76c   : > { %v6497_v55 = vld [vmem:[%s8921_s3 + $0x4] ss:$0 sm:$0xff]  ;;  %v6498_v27 = vld [vmem:[%s8921_s3 + $0x5] ss:$0 sm:$0xff] }
 0x76d   : > { %v7143_v58 = vpop.f32.mrf.mxu1  ;;  %v7151_v52 = vpop.f32.mrf.mxu0 }
 0x76e   : > { %v3813_v58 = vadd.f32 %v6463_v46, %v8603_v49  ;;  %v3865_v52 = vadd.f32 %v6464_v13, %v8605_v50 }
 0x76f   : > { %v8607_v59 = vpop.f32.mrf.mxu1  ;;  %v8609_v61 = vpop.f32.mrf.mxu0 }
 0x770   : > { %v5015_v50 = vpack.c.bf16 %v3865_v52, %v3865_v52 }
 0x771   : > { %v7158_v62 = vpop.f32.mrf.mxu1  ;;  %v7166_v63 = vpop.f32.mrf.mxu0 }
 0x773   : > { %v3919_v0 = vpop.f32.mrf.mxu1  ;;  %v3971_v2 = vpop.f32.mrf.mxu0 }
 0x775   : > { %v7159_v3 = vpop.f32.mrf.mxu1  ;;  %v7167_v8 = vpop.f32.mrf.mxu0 }
 0x776   : > { %v5014_v8 = vpack.c.bf16 %v3813_v58, %v3813_v58 }
 0x777   : > { %v8611_v9 = vpop.f32.mrf.mxu1  ;;  %v8613_v10 = vpop.f32.mrf.mxu0 }
 0x779   : > { %v7174_v11 = vpop.f32.mrf.mxu1  ;;  %v7182_v12 = vpop.f32.mrf.mxu0 }
 0x77b   : > { %v4023_v51 = vpop.f32.mrf.mxu1  ;;  %v4075_v60 = vpop.f32.mrf.mxu0 }
 0x77c   : > { %v6465_v51 = vld [vmem:[%s8922_s23 + $0x4] ss:$0 sm:$0xff]  ;;  %v6466_v60 = vld [vmem:[%s8922_s23 + $0x5] ss:$0 sm:$0xff] }
 0x77d   : > { %v7175_v16 = vpop.f32.mrf.mxu1  ;;  %v7183_v7 = vpop.f32.mrf.mxu0 }
 0x77f   : > { %v4175_v56 = vpop.f32.mrf.mxu1  ;;  %v4227_v19 = vpop.f32.mrf.mxu0 }
 0x780   : > { %v4176_v20 = vadd.f32 %v6493_v17, %v4175_v56  ;;  %v4228_v22 = vadd.f32 %v6494_v18, %v4227_v19 }
 0x781   : > { %v7190_v23 = vpop.f32.mrf.mxu1  ;;  %v7198_v24 = vpop.f32.mrf.mxu0 }
 0x782   : > { %v5020_v15 = vpack.c.bf16 %v4176_v20, %v4176_v20  ;;  %v5021_v25 = vpack.c.bf16 %v4228_v22, %v4228_v22  ;;  %v6499_v20 = vld [vmem:[%s8921_s3 + $0x6] ss:$0 sm:$0xff]  ;;  %v6500_v22 = vld [vmem:[%s8921_s3 + $0x7] ss:$0 sm:$0xff]  ;;  %v3917_v23 = vadd.f32 %v6465_v51, %v8607_v59  ;;  %v3969_v24 = vadd.f32 %v6466_v60, %v8609_v61  ;;  %s8926_s3 = smov 8  }
 0x783   : > { %v4178_v29 = vpop.f32.mrf.mxu1  ;;  %v4230_v30 = vpop.f32.mrf.mxu0 }
 0x784   : > { %v5032_v6 = vsel %vm2501_vm2, %v5020_v15, 0  ;;  %v5078_v31 = vsel %vm2501_vm2, %v5021_v25, 0  ;;  %v5016_v30 = vpack.c.bf16 %v3917_v23, %v3917_v23 }
 0x785   : > { %v7191_v4 = vpop.f32.mrf.mxu1  ;;  %v7199_v32 = vpop.f32.mrf.mxu0  ;;  %7313 = vmatpush3.bf16.xpose.msra.mxu1 %v5032_v6  ;;  %7319 = vmatpush3.bf16.xpose.msra.mxu0 %v5078_v31  ;;  %v5017_v6 = vpack.c.bf16 %v3969_v24, %v3969_v24 }
 0x786   : > { %7324 = vmatprep.subr.bf16.mxu1 %v7795_v1  ;;  %7330 = vmatprep.subr.bf16.mxu0 %v7795_v1  ;;  %v6467_v4 = vld [vmem:[%s8922_s23 + $0x6] ss:$0 sm:$0xff]  ;;  %v6468_v32 = vld [vmem:[%s8922_s23 + $0x7] ss:$0 sm:$0xff] }
 0x787   : > { %v4279_v36 = vpop.f32.mrf.mxu1  ;;  %v4331_v37 = vpop.f32.mrf.mxu0 }
 0x788   : > { %v4280_v38 = vadd.f32 %v6495_v5, %v4279_v36  ;;  %v4332_v21 = vadd.f32 %v6496_v33, %v4331_v37 }
 0x789   : > { %v7206_v39 = vpop.f32.mrf.mxu1  ;;  %v7214_v40 = vpop.f32.mrf.mxu0 }
 0x78a   : > { %v5022_v44 = vpack.c.bf16 %v4280_v38, %v4280_v38  ;;  %v5023_v45 = vpack.c.bf16 %v4332_v21, %v4332_v21  ;;  %v4021_v38 = vadd.f32 %v6467_v4, %v8611_v9  ;;  %v4073_v21 = vadd.f32 %v6468_v32, %v8613_v10  ;;  %v6525_v9 = vld [vmem:[%s8923_s28] ss:$0 sm:$0xff] }
 0x78b   : > { %v4282_v42 = vpop.f32.mrf.mxu1  ;;  %v4334_v43 = vpop.f32.mrf.mxu0 }
 0x78c   : > { %v5124_v47 = vsel %vm2501_vm2, %v5022_v44, 0  ;;  %v5170_v48 = vsel %vm2501_vm2, %v5023_v45, 0  ;;  %7315 = vmatmul.mubr.msk.bf16.vlgmr.msra.gmra.mxu1 %vm2501_vm2, %v5012_v41  ;;  %7321 = vmatmul.mubr.msk.bf16.vlgmr.msra.gmra.mxu0 %vm2501_vm2, %v5013_v14  ;;  %v5018_v39 = vpack.c.bf16 %v4021_v38, %v4021_v38  ;;  %v5019_v40 = vpack.c.bf16 %v4073_v21, %v4073_v21  ;;  %v6526_v44 = vld [vmem:[%s8923_s28 + $0x1] ss:$0 sm:$0xff] }
 0x78d   : > { %v7207_v54 = vpop.f32.mrf.mxu1  ;;  %v7215_v53 = vpop.f32.mrf.mxu0  ;;  %7325 = vmatpush3.bf16.xpose.msra.mxu1 %v5124_v47  ;;  %7331 = vmatpush3.bf16.xpose.msra.mxu0 %v5170_v48 }
 0x78e   : > { %7326 = vmatprep.mubr.msk.bf16.mxu1 %vm7796_vm0, %v7795_v1  ;;  %7332 = vmatprep.mubr.msk.bf16.mxu0 %vm7796_vm0, %v7795_v1 }
 0x78f   : > { %v4383_v62 = vpop.f32.mrf.mxu1  ;;  %v4435_v63 = vpop.f32.mrf.mxu0  ;;  %7336 = vmatprep.subr.bf16.mxu1 %v7795_v1  ;;  %7342 = vmatprep.subr.bf16.mxu0 %v7795_v1 }
 0x790   : > { %v4384_v0 = vadd.f32 %v6497_v55, %v4383_v62  ;;  %v4436_v2 = vadd.f32 %v6498_v27, %v4435_v63 }
 0x791   : > { %v7222_v3 = vpop.f32.mrf.mxu1  ;;  %v7230_v49 = vpop.f32.mrf.mxu0 }
 0x792   : > { %v5024_v11 = vpack.c.bf16 %v4384_v0, %v4384_v0  ;;  %v5025_v12 = vpack.c.bf16 %v4436_v2, %v4436_v2 }
 0x793   : > { %v4386_v16 = vpop.f32.mrf.mxu1  ;;  %v4438_v7 = vpop.f32.mrf.mxu0 }
 0x794   : > { %v5216_v17 = vsel %vm2501_vm2, %v5024_v11, 0  ;;  %v5262_v18 = vsel %vm2501_vm2, %v5025_v12, 0  ;;  %7327 = vmatmul.mubr.msk.bf16.vlgmr.msra.gmra.mxu1 %vm2501_vm2, %v5014_v8  ;;  %7333 = vmatmul.mubr.msk.bf16.vlgmr.msra.gmra.mxu0 %vm2501_vm2, %v5015_v50 }
 0x795   : > { %v7223_v56 = vpop.f32.mrf.mxu1  ;;  %v7231_v19 = vpop.f32.mrf.mxu0  ;;  %7337 = vmatpush3.bf16.xpose.msra.mxu1 %v5216_v17  ;;  %7343 = vmatpush3.bf16.xpose.msra.mxu0 %v5262_v18 }
 0x796   : > { %7338 = vmatprep.mubr.msk.bf16.mxu1 %vm7796_vm0, %v7795_v1  ;;  %7344 = vmatprep.mubr.msk.bf16.mxu0 %vm7796_vm0, %v7795_v1 }
 0x797   : > { %v4487_v15 = vpop.f32.mrf.mxu1  ;;  %v4539_v25 = vpop.f32.mrf.mxu0  ;;  %7348 = vmatprep.subr.bf16.mxu1 %v7795_v1  ;;  %7354 = vmatprep.subr.bf16.mxu0 %v7795_v1 }
 0x798   : > { %v4488_v26 = vadd.f32 %v6499_v20, %v4487_v15  ;;  %v4540_v28 = vadd.f32 %v6500_v22, %v4539_v25 }
 0x799   : > { %v7238_v29 = vpop.f32.mrf.mxu1  ;;  %v7246_v59 = vpop.f32.mrf.mxu0 }
 0x79a   : > { %v5026_v61 = vpack.c.bf16 %v4488_v26, %v4488_v26  ;;  %v5027_v31 = vpack.c.bf16 %v4540_v28, %v4540_v28 }
 0x79b   : > { %v4490_v5 = vpop.f32.mrf.mxu1  ;;  %v4542_v33 = vpop.f32.mrf.mxu0 }
 0x79c   : > { %v5308_v34 = vsel %vm2501_vm2, %v5026_v61, 0  ;;  %v5354_v35 = vsel %vm2501_vm2, %v5027_v31, 0  ;;  %7339 = vmatmul.mubr.msk.bf16.vlgmr.msra.gmra.mxu1 %vm2501_vm2, %v5016_v30  ;;  %7345 = vmatmul.mubr.msk.bf16.vlgmr.msra.gmra.mxu0 %vm2501_vm2, %v5017_v6 }
 0x79d   : > { %v7239_v36 = vpop.f32.mrf.mxu1  ;;  %v7247_v37 = vpop.f32.mrf.mxu0  ;;  %7349 = vmatpush3.bf16.xpose.msra.mxu1 %v5308_v34  ;;  %7355 = vmatpush3.bf16.xpose.msra.mxu0 %v5354_v35 }
 0x79e   : > { %7350 = vmatprep.mubr.msk.bf16.mxu1 %vm7796_vm0, %v7795_v1  ;;  %7356 = vmatprep.mubr.msk.bf16.mxu0 %vm7796_vm0, %v7795_v1 }
 0x79f   : > { %7360 = vmatprep.subr.bf16.mxu1 %v7795_v1  ;;  %7366 = vmatprep.subr.bf16.mxu0 %v7795_v1 }
 0x7a0   : > { %v4642_v10 = vpop.f32.mrf.mxu1  ;;  %v4694_v13 = vpop.f32.mrf.mxu0 }
 0x7a1   : > { %v4643_v41 = vadd.f32 %v6525_v9, %v4642_v10  ;;  %v4695_v43 = vadd.f32 %v6526_v44, %v4694_v13 }
 0x7a2   : > { %v7254_v14 = vpop.f32.mrf.mxu1  ;;  %v7262_v48 = vpop.f32.mrf.mxu0 }
 0x7a3   : > { %v5492_v45 = vpack.c.bf16 %v4643_v41, %v4643_v41  ;;  %v5493_v54 = vpack.c.bf16 %v4695_v43, %v4695_v43 }
 0x7a4   : > { %7351 = vmatmul.mubr.msk.bf16.vlgmr.msra.gmra.mxu1 %vm2501_vm2, %v5018_v39  ;;  %7357 = vmatmul.mubr.msk.bf16.vlgmr.msra.gmra.mxu0 %vm2501_vm2, %v5019_v40  ;;  %v4645_v46 = vpop.f32.mrf.mxu1  ;;  %v4697_v53 = vpop.f32.mrf.mxu0 }
 0x7a5   : > { %7362 = vmatprep.mubr.msk.bf16.mxu1 %vm7796_vm0, %v7795_v1  ;;  %7368 = vmatprep.mubr.msk.bf16.mxu0 %vm7796_vm0, %v7795_v1  ;;  %v5504_v42 = vsel %vm2978_vm3, %v5492_v45, 0  ;;  %v5550_v27 = vsel %vm2978_vm3, %v5493_v54, 0 }
 0x7a6   : > { %v7255_v47 = vpop.f32.mrf.mxu1  ;;  %7361 = vmatpush3.bf16.msra.mxu1 %v5504_v42  ;;  %v7263_v58 = vpop.f32.mrf.mxu0  ;;  %7367 = vmatpush3.bf16.msra.mxu0 %v5550_v27 }
 0x7a7   : > { %7372 = vmatprep.subr.bf16.mxu1 %v7795_v1  ;;  %7378 = vmatprep.subr.bf16.mxu0 %v7795_v1 }
 0x7a8   : > { %v8681_v55 = vpop.f32.mrf.mxu1 }
 0x7aa   : > { %v7270_v52 = vpop.f32.mrf.mxu1  ;;  %v8685_v63 = vpop.f32.mrf.mxu0 }
 0x7ac   : > { %v4749_v62 = vpop.f32.mrf.mxu1  ;;  %v7278_v2 = vpop.f32.mrf.mxu0 }
 0x7ae   : > { %v7271_v0 = vpop.f32.mrf.mxu1  ;;  %v4801_v3 = vpop.f32.mrf.mxu0 }
 0x7b0   : > { %v8687_v49 = vpop.f32.mrf.mxu1  ;;  %v7279_v8 = vpop.f32.mrf.mxu0 }
 0x7b2   : > { %v7286_v50 = vpop.f32.mrf.mxu1  ;;  %v8689_v12 = vpop.f32.mrf.mxu0 }
 0x7b4   : > { %v4853_v11 = vpop.f32.mrf.mxu1  ;;  %v7294_v60 = vpop.f32.mrf.mxu0 }
 0x7b6   : > { %v7287_v51 = vpop.f32.mrf.mxu1  ;;  %v4905_v16 = vpop.f32.mrf.mxu0 }
 0x7b8   : > { %v8691_v7 = vpop.f32.mrf.mxu1  ;;  %v7295_v17 = vpop.f32.mrf.mxu0 }
 0x7ba   : > { %v7302_v18 = vpop.f32.mrf.mxu1  ;;  %v8693_v19 = vpop.f32.mrf.mxu0 }
 0x7bc   : > { %v4957_v56 = vpop.f32.mrf.mxu1  ;;  %v7310_v22 = vpop.f32.mrf.mxu0 }
 0x7be   : > { %v7303_v20 = vpop.f32.mrf.mxu1  ;;  %v5009_v23 = vpop.f32.mrf.mxu0 }
 0x7c0   : > { %v7311_v24 = vpop.f32.mrf.mxu0 }
 0x84c   : > { %v5068_v15 = vpop.f32.mrf.mxu1  ;;  %v5114_v25 = vpop.f32.mrf.mxu0 }
 0x84d   : > { %v5396_v26 = vsel %vm2870_vm4, %v5068_v15, -inf  ;;  %v5399_v6 = vsel %vm2870_vm4, %v5114_v25, -inf }
 0x84e   : > { %5397 = vmax.xlane.f32.xlu0 %v5396_v26  ;;  %v7316_v28 = vpop.f32.mrf.mxu1  ;;  %v7322_v29 = vpop.f32.mrf.mxu0 }
 0x850   : > { %v5071_v59 = vpop.f32.mrf.mxu1  ;;  %v5117_v30 = vpop.f32.mrf.mxu0 }
 0x852   : > { %v7317_v61 = vpop.f32.mrf.mxu1  ;;  %5400 = vmax.xlane.f32.xlu0 %v5399_v6  ;;  %v7323_v31 = vpop.f32.mrf.mxu0 }
 0x854   : > { %v5160_v4 = vpop.f32.mrf.mxu1  ;;  %v5206_v32 = vpop.f32.mrf.mxu0 }
 0x855   : > { %v5402_v5 = vsel %vm2870_vm4, %v5160_v4, -inf  ;;  %v5405_v33 = vsel %vm2870_vm4, %v5206_v32, -inf }
 0x856   : > { %5403 = vmax.xlane.f32.xlu1 %v5402_v5  ;;  %v7328_v34 = vpop.f32.mrf.mxu1  ;;  %5406 = vmax.xlane.f32.xlu0 %v5405_v33  ;;  %v7334_v35 = vpop.f32.mrf.mxu0 }
 0x858   : > { %v5163_v36 = vpop.f32.mrf.mxu1  ;;  %v5209_v37 = vpop.f32.mrf.mxu0 }
 0x85a   : > { %v7329_v38 = vpop.f32.mrf.mxu1  ;;  %v7335_v21 = vpop.f32.mrf.mxu0 }
 0x85c   : > { %v5252_v39 = vpop.f32.mrf.mxu1  ;;  %v5298_v40 = vpop.f32.mrf.mxu0 }
 0x85d   : > { %v5408_v9 = vsel %vm2870_vm4, %v5252_v39, -inf  ;;  %v5411_v10 = vsel %vm2870_vm4, %v5298_v40, -inf }
 0x85e   : > { %5409 = vmax.xlane.f32.xlu1 %v5408_v9  ;;  %v7340_v41 = vpop.f32.mrf.mxu1  ;;  %5412 = vmax.xlane.f32.xlu0 %v5411_v10  ;;  %v7346_v14 = vpop.f32.mrf.mxu0 }
 0x860   : > { %v5255_v44 = vpop.f32.mrf.mxu1  ;;  %v5301_v45 = vpop.f32.mrf.mxu0 }
 0x861   : > { %v6527_v44 = vld [vmem:[%s8923_s28 + $0x2] ss:$0 sm:$0xff] }
 0x862   : > { %v7341_v46 = vpop.f32.mrf.mxu1  ;;  %v7347_v13 = vpop.f32.mrf.mxu0 }
 0x863   : > { %v4747_v13 = vadd.f32 %v6527_v44, %v8681_v55 }
 0x864   : > { %v5344_v42 = vpop.f32.mrf.mxu1  ;;  %v5390_v43 = vpop.f32.mrf.mxu0 }
 0x865   : > { %v5414_v47 = vsel %vm2870_vm4, %v5344_v42, -inf  ;;  %v5417_v48 = vsel %vm2870_vm4, %v5390_v43, -inf }
 0x866   : > { %5415 = vmax.xlane.f32.xlu1 %v5414_v47  ;;  %v7352_v54 = vpop.f32.mrf.mxu1  ;;  %5418 = vmax.xlane.f32.xlu0 %v5417_v48  ;;  %v7358_v53 = vpop.f32.mrf.mxu0  ;;  %v5494_v47 = vpack.c.bf16 %v4747_v13, %v4747_v13 }
 0x867   : > { %v6529_v53 = vld [vmem:[%s8923_s28 + $0x4] ss:$0 sm:$0xff] }
 0x868   : > { %v5347_v27 = vpop.f32.mrf.mxu1  ;;  %v5393_v58 = vpop.f32.mrf.mxu0  ;;  %v4851_v55 = vadd.f32 %v6529_v53, %v8687_v49  ;;  %v6531_v49 = vld [vmem:[%s8923_s28 + $0x6] ss:$0 sm:$0xff] }
 0x86a   : > { %v7353_v52 = vpop.f32.mrf.mxu1  ;;  %v7359_v62 = vpop.f32.mrf.mxu0 }
 0x8d7   : > { %v5398_v0 = vpop.xlane.xlu0 %5397 }
 0x8d8   : > { %v5420_v2 = vsub.f32 %v5068_v15, %v5398_v0  ;;  %v5596_v0 = vsel %vm2978_vm3, %v5494_v47, 0 }
 0x8da   : > { %v5428_v3 = vmul.f32 1.442695, %v5420_v2 }
 0x8db   : > { %v5401_v8 = vpop.xlane.xlu0 %5400 }
 0x8dc   : > { %7666 = vpow2.f32 %v5428_v3  ;;  %v5421_v50 = vsub.f32 %v5114_v25, %v5401_v8  ;;  %v6530_v8 = vld [vmem:[%s8923_s28 + $0x5] ss:$0 sm:$0xff] }
 0x8de   : > { %v5430_v11 = vmul.f32 1.442695, %v5421_v50 }
 0x8df   : > { %v5404_v51 = vpop.xlane.xlu1 %5403  ;;  %v5407_v60 = vpop.xlane.xlu0 %5406 }
 0x8e0   : > { %7668 = vpow2.f32 %v5430_v11  ;;  %v5422_v16 = vsub.f32 %v5160_v4, %v5404_v51  ;;  %v5423_v17 = vsub.f32 %v5206_v32, %v5407_v60  ;;  %v5496_v60 = vpack.c.bf16 %v4851_v55, %v4851_v55 }
 0x8e2   : > { %v5432_v18 = vmul.f32 1.442695, %v5422_v16  ;;  %v5434_v56 = vmul.f32 1.442695, %v5423_v17  ;;  %v4903_v16 = vadd.f32 %v6530_v8, %v8689_v12  ;;  %v5688_v12 = vsel %vm2978_vm3, %v5496_v60, 0 }
 0x8e4   : > { %7670 = vpow2.f32 %v5432_v18 }
 0x8e5   : > { %7672 = vpow2.f32 %v5434_v56 }
 0x8e7   : > { %v5410_v20 = vpop.xlane.xlu1 %5409  ;;  %v5413_v22 = vpop.xlane.xlu0 %5412 }
 0x8e8   : > { %v5424_v23 = vsub.f32 %v5252_v39, %v5410_v20  ;;  %v5425_v24 = vsub.f32 %v5298_v40, %v5413_v22 }
 0x8e9   : > { %v7667_v26 = vpop.eup %7666 }
 0x8ea   : > { %v5436_v15 = vmul.f32 1.442695, %v5424_v23  ;;  %v5438_v28 = vmul.f32 1.442695, %v5425_v24  ;;  %v5444_v29 = vsel %vm2870_vm4, %v7667_v26, 0.0  ;;  %v5497_v23 = vpack.c.bf16 %v4903_v16, %v4903_v16 }
 0x8eb   : > { %5445 = vadd.xlane.f32.xlu1 %v5444_v29  ;;  %v4955_v24 = vadd.f32 %v6531_v49, %v8691_v7 }
 0x8ec   : > { %7674 = vpow2.f32 %v5436_v15 }
 0x8ed   : > { %v7669_v25 = vpop.eup %7668  ;;  %7676 = vpow2.f32 %v5438_v28 }
 0x8ee   : > { %v5447_v59 = vsel %vm2870_vm4, %v7669_v25, 0.0 }
 0x8ef   : > { %v5416_v30 = vpop.xlane.xlu1 %5415  ;;  %5448 = vadd.xlane.f32.xlu0 %v5447_v59  ;;  %v5419_v6 = vpop.xlane.xlu0 %5418  ;;  %v5498_v59 = vpack.c.bf16 %v4955_v24, %v4955_v24 }
 0x8f0   : > { %v5426_v61 = vsub.f32 %v5344_v42, %v5416_v30  ;;  %v5427_v31 = vsub.f32 %v5390_v43, %v5419_v6  ;;  %v6528_v42 = vld [vmem:[%s8923_s28 + $0x3] ss:$0 sm:$0xff] }
 0x8f1   : > { %v7671_v4 = vpop.eup %7670  ;;  %v4799_v48 = vadd.f32 %v6528_v42, %v8685_v63 }
 0x8f2   : > { %v8705_v32 = vpop.eup %7672  ;;  %v5440_v5 = vmul.f32 1.442695, %v5426_v61  ;;  %v5442_v33 = vmul.f32 1.442695, %v5427_v31  ;;  %v5450_v34 = vsel %vm2870_vm4, %v7671_v4, 0.0  ;;  %v5780_v31 = vsel %vm2978_vm3, %v5498_v59, 0 }
 0x8f3   : > { %5451 = vadd.xlane.f32.xlu1 %v5450_v34  ;;  %v5453_v35 = vsel %vm2870_vm4, %v8705_v32, 0.0  ;;  %v5495_v2 = vpack.c.bf16 %v4799_v48, %v4799_v48 }
 0x8f4   : > { %7678 = vpow2.f32 %v5440_v5  ;;  %5454 = vadd.xlane.f32.xlu0 %v5453_v35 }
 0x8f5   : > { %7680 = vpow2.f32 %v5442_v33  ;;  %v5642_v51 = vsel %vm2978_vm3, %v5495_v2, 0 }
 0x8f9   : > { %v8710_v36 = vpop.eup %7674 }
 0x8fa   : > { %v8712_v37 = vpop.eup %7676  ;;  %v5456_v38 = vsel %vm2870_vm4, %v8710_v36, 0.0 }
 0x8fb   : > { %5457 = vadd.xlane.f32.xlu1 %v5456_v38  ;;  %v5459_v21 = vsel %vm2870_vm4, %v8712_v37, 0.0 }
 0x8fc   : > { %5460 = vadd.xlane.f32.xlu0 %v5459_v21 }
 0x901   : > { %v8718_v39 = vpop.eup %7678 }
 0x902   : > { %v8720_v40 = vpop.eup %7680  ;;  %v5462_v9 = vsel %vm2870_vm4, %v8718_v39, 0.0 }
 0x903   : > { %5463 = vadd.xlane.f32.xlu1 %v5462_v9  ;;  %v5465_v10 = vsel %vm2870_vm4, %v8720_v40, 0.0 }
 0x904   : > { %5466 = vadd.xlane.f32.xlu0 %v5465_v10 }
 0x974   : > { %v5446_v41 = vpop.xlane.xlu1 %5445 }
 0x975   : > { %7682 = vrcp.f32 %v5446_v41 }
 0x978   : > { %v5449_v14 = vpop.xlane.xlu0 %5448 }
 0x979   : > { %7684 = vrcp.f32 %v5449_v14 }
 0x97c   : > { %v5452_v45 = vpop.xlane.xlu1 %5451 }
 0x97d   : > { %7686 = vrcp.f32 %v5452_v45  ;;  %v5455_v46 = vpop.xlane.xlu0 %5454 }
 0x97e   : > { %7688 = vrcp.f32 %v5455_v46 }
 0x982   : > { %v7683_v43 = vpop.eup %7682 }
 0x983   : > { %v5476_v54 = vmul.f32 %v7683_v43, %v7667_v26  ;;  %v6532_v26 = vld [vmem:[%s8923_s28 + $0x7] ss:$0 sm:$0xff] }
 0x984   : > { %v5458_v27 = vpop.xlane.xlu1 %5457  ;;  %v5007_v30 = vadd.f32 %v6532_v26, %v8693_v19 }
 0x985   : > { %v5484_v58 = vpack.c.bf16 %v5476_v54, %v5476_v54  ;;  %7690 = vrcp.f32 %v5458_v27  ;;  %v5461_v52 = vpop.xlane.xlu0 %5460  ;;  %v7620_v54 = vld [vmem:[%s8925_s11 + $0x8] sm:$0xff]  }
 0x986   : > { %v7685_v62 = vpop.eup %7684  ;;  %7692 = vrcp.f32 %v5461_v52 }
 0x987   : > { %v5477_v3 = vmul.f32 %v7685_v62, %v7669_v25  ;;  %7363 = vmatmul.mubr.msk.bf16.vlgmr.msra.gmra.mxu1 %vm2870_vm4, %v5484_v58  ;;  %v5734_v25 = vsel %vm2978_vm3, %v5497_v23, 0  ;;  %v7621_v58 = vld [vmem:[%s8925_s11] sm:$0xff]  }
 0x988   : > { %7373 = vmatpush3.bf16.msra.mxu1 %v5596_v0  ;;  %7374 = vmatprep.mubr.msk.bf16.mxu1 %vm7796_vm0, %v7795_v1 }
 0x989   : > { %v5485_v63 = vpack.c.bf16 %v5477_v3, %v5477_v3  ;;  %7384 = vmatprep.subr.bf16.mxu1 %v7795_v1 }
 0x98a   : > { %v7687_v50 = vpop.eup %7686 }
 0x98b   : > { %v7689_v11 = vpop.eup %7688  ;;  %v5478_v17 = vmul.f32 %v7687_v50, %v7671_v4  ;;  %7369 = vmatmul.mubr.msk.bf16.vlgmr.msra.gmra.mxu0 %vm2870_vm4, %v5485_v63  ;;  %v5499_v4 = vpack.c.bf16 %v5007_v30, %v5007_v30 }
 0x98c   : > { %7379 = vmatpush3.bf16.msra.mxu0 %v5642_v51  ;;  %v5464_v18 = vpop.xlane.xlu1 %5463  ;;  %7380 = vmatprep.mubr.msk.bf16.mxu0 %vm7796_vm0, %v7795_v1  ;;  %v5479_v20 = vmul.f32 %v7689_v11, %v8705_v32 }
 0x98d   : > { %v5486_v56 = vpack.c.bf16 %v5478_v17, %v5478_v17  ;;  %7694 = vrcp.f32 %v5464_v18  ;;  %v5467_v22 = vpop.xlane.xlu0 %5466  ;;  %7390 = vmatprep.subr.bf16.mxu0 %v7795_v1  ;;  %v5826_v33 = vsel %vm2978_vm3, %v5499_v4, 0 }
 0x98e   : > { %7696 = vrcp.f32 %v5467_v22  ;;  %v5487_v15 = vpack.c.bf16 %v5479_v20, %v5479_v20 }
 0x98f   : > { %7375 = vmatmul.mubr.msk.bf16.vlgmr.msra.gmra.mxu1 %vm2870_vm4, %v5486_v56 }
 0x990   : > { %7385 = vmatpush3.bf16.msra.mxu1 %v5688_v12  ;;  %7386 = vmatprep.mubr.msk.bf16.mxu1 %vm7796_vm0, %v7795_v1 }
 0x991   : > { %7396 = vmatprep.subr.bf16.mxu1 %v7795_v1 }
 0x992   : > { %v7691_v28 = vpop.eup %7690 }
 0x993   : > { %v7693_v29 = vpop.eup %7692  ;;  %v5480_v6 = vmul.f32 %v7691_v28, %v8710_v36  ;;  %7381 = vmatmul.mubr.msk.bf16.vlgmr.msra.gmra.mxu0 %vm2870_vm4, %v5487_v15 }
 0x994   : > { %7391 = vmatpush3.bf16.msra.mxu0 %v5734_v25  ;;  %7392 = vmatprep.mubr.msk.bf16.mxu0 %vm7796_vm0, %v7795_v1  ;;  %v5481_v61 = vmul.f32 %v7693_v29, %v8712_v37 }
 0x995   : > { %v5488_v7 = vpack.c.bf16 %v5480_v6, %v5480_v6  ;;  %7402 = vmatprep.subr.bf16.mxu0 %v7795_v1 }
 0x996   : > { %v5489_v19 = vpack.c.bf16 %v5481_v61, %v5481_v61 }
 0x997   : > { %7387 = vmatmul.mubr.msk.bf16.vlgmr.msra.gmra.mxu1 %vm2870_vm4, %v5488_v7 }
 0x998   : > { %7397 = vmatpush3.bf16.msra.mxu1 %v5780_v31  ;;  %7398 = vmatprep.mubr.msk.bf16.mxu1 %vm7796_vm0, %v7795_v1 }
 0x999   : > { %7408 = vmatprep.subr.bf16.mxu1 %v7795_v1 }
 0x99a   : > { %v7695_v32 = vpop.eup %7694 }
 0x99b   : > { %v7697_v5 = vpop.eup %7696  ;;  %v5482_v34 = vmul.f32 %v7695_v32, %v8718_v39  ;;  %7393 = vmatmul.mubr.msk.bf16.vlgmr.msra.gmra.mxu0 %vm2870_vm4, %v5489_v19 }
 0x99c   : > { %7403 = vmatpush3.bf16.msra.mxu0 %v5826_v33  ;;  %7404 = vmatprep.mubr.msk.bf16.mxu0 %vm7796_vm0, %v7795_v1  ;;  %v5483_v36 = vmul.f32 %v7697_v5, %v8720_v40 }
 0x99d   : > { %v5490_v35 = vpack.c.bf16 %v5482_v34, %v5482_v34  ;;  %7416 = vmatprep.subr.bf16.mxu0 %v7795_v1 }
 0x99e   : > { %v5491_v37 = vpack.c.bf16 %v5483_v36, %v5483_v36 }
 0x99f   : > { %7399 = vmatmul.mubr.msk.bf16.vlgmr.msra.gmra.mxu1 %vm2870_vm4, %v5490_v35 }
 0x9a0   : > { %7412 = vmatprep.mubr.msk.bf16.mxu1 %vm7796_vm0, %v7795_v1  ;;  %7409 = vmatpush3.bf16.msra.mxu1 %v7620_v54 }
 0x9a1   : > { %7410 = vmatprep.subr.bf16.mxu1 %v7795_v1 }
 0x9a3   : > { %7405 = vmatmul.mubr.msk.bf16.vlgmr.msra.gmra.mxu0 %vm2870_vm4, %v5491_v37 }
 0x9a4   : > { %7420 = vmatprep.mubr.msk.bf16.mxu0 %vm7796_vm0, %v7795_v1  ;;  %7411 = vmatpush3.bf16.msra.mxu1 %v7621_v58 }
 0x9a5   : > { %7424 = vmatprep.subr.bf16.mxu1 %v7795_v1 }
 0xa47   : > { %v5540_v38 = vpop.f32.mrf.mxu1 }
 0xa48   : > { %5868 = vst.msk [vmem:[#allocation2] sm:$0xff] %vm2501_vm2, %v5540_v38 }
 0xa49   : > { %v7364_v21 = vpop.f32.mrf.mxu1 }
 0xa4b   : > { %v5543_v39 = vpop.f32.mrf.mxu1  ;;  %v5586_v9 = vpop.f32.mrf.mxu0 }
 0xa4c   : > { %5870 = vrot.lane.b32.xlu1 %v5586_v9, %s8924_s1  ;;  %s8929_s1 = smov 20  }
 0xa4d   : > { %v7365_v40 = vpop.f32.mrf.mxu1  ;;  %v7370_v10 = vpop.f32.mrf.mxu0 }
 0xa4f   : > { %v5589_v41 = vpop.f32.mrf.mxu0  ;;  %v5632_v14 = vpop.f32.mrf.mxu1 }
 0xa50   : > { %5875 = vrot.lane.b32.xlu0 %v5632_v14, %s8926_s3  ;;  %s8932_s3 = sld [smem:[#allocation21_spill]] }
 0xa51   : > { %v7371_v44 = vpop.f32.mrf.mxu0  ;;  %v7376_v45 = vpop.f32.mrf.mxu1 }
 0xa53   : > { %v5635_v46 = vpop.f32.mrf.mxu1  ;;  %v5678_v13 = vpop.f32.mrf.mxu0 }
 0xa54   : > { %5880 = vrot.lane.b32.xlu1 %v5678_v13, %s8927_s5  ;;  %s8930_s5 = smov 24  }
 0xa55   : > { %v7377_v42 = vpop.f32.mrf.mxu1  ;;  %v7382_v43 = vpop.f32.mrf.mxu0 }
 0xa56   : > { %v6573_v15 = vld [vmem:[%s8932_s3] ss:$0 sm:$0xff]  ;;  %s8936_s3 = sld [smem:[#allocation23_spill]] }
 0xa57   : > { %v5681_v47 = vpop.f32.mrf.mxu0  ;;  %v5724_v48 = vpop.f32.mrf.mxu1 }
 0xa58   : > { %5885 = vrot.lane.b32.xlu1 %v5724_v48, %s8928_s6  ;;  %s8931_s6 = smov 28  }
 0xa59   : > { %v7383_v53 = vpop.f32.mrf.mxu0  ;;  %v7388_v27 = vpop.f32.mrf.mxu1 }
 0xa5b   : > { %v5727_v52 = vpop.f32.mrf.mxu1  ;;  %v5770_v62 = vpop.f32.mrf.mxu0 }
 0xa5c   : > { %5890 = vrot.lane.b32.xlu1 %v5770_v62, %s8929_s1  ;;  %s8933_s1 = sld [smem:[#allocation24_spill]]  ;;  %v6578_v14 = vld [vmem:[%s8936_s3] ss:$0 sm:$0xff]  ;;  %s6595_s3 = sshll.u32 %s7986_s0, 7 }
 0xa5d   : > { %v7389_v0 = vpop.f32.mrf.mxu1  ;;  %v7394_v2 = vpop.f32.mrf.mxu0  ;;  %v6583_v62 = vld [vmem:[%s7948_s20] ss:$0 sm:$0xff]  ;;  %s6220_s11 = scalar_lea.hbm %s7963_s13, %s6595_s3 }
 0xa5f   : > { %v5773_v55 = vpop.f32.mrf.mxu0  ;;  %v5816_v3 = vpop.f32.mrf.mxu1 }
 0xa60   : > { %5895 = vrot.lane.b32.xlu0 %v5816_v3, %s8930_s5  ;;  %s8934_s5 = sld [smem:[#allocation26_spill]] }
 0xa61   : > { %v7395_v8 = vpop.f32.mrf.mxu0  ;;  %v7400_v63 = vpop.f32.mrf.mxu1 }
 0xa62   : > { %v7622_v5 = vld [vmem:[%s8933_s1 + $0x8] sm:$0xff]  }
 0xa63   : > { %v5819_v50 = vpop.f32.mrf.mxu1  ;;  %v5862_v11 = vpop.f32.mrf.mxu0  ;;  %7417 = vmatpush3.bf16.msra.mxu0 %v7622_v5 }
 0xa64   : > { %5900 = vrot.lane.b32.xlu1 %v5862_v11, %s8931_s6  ;;  %7418 = vmatprep.subr.bf16.mxu0 %v7795_v1  ;;  %s8935_s6 = sld [smem:[#allocation22_spill]] }
 0xa65   : > { %v7401_v51 = vpop.f32.mrf.mxu1  ;;  %v7406_v60 = vpop.f32.mrf.mxu0 }
 0xa66   : > { %v7624_v33 = vld [vmem:[%s8934_s5 + $0x38] sm:$0xff]   ;;  %v7625_v34 = vld [vmem:[%s8934_s5 + $0x30] sm:$0xff]   ;;  %v7626_v35 = vld [vmem:[%s8934_s5 + $0x28] sm:$0xff]  }
 0xa67   : > { %v5865_v16 = vpop.f32.mrf.mxu0  ;;  %v7627_v36 = vld [vmem:[%s8934_s5 + $0x20] sm:$0xff]   ;;  %v7628_v37 = vld [vmem:[%s8934_s5 + $0x18] sm:$0xff]   ;;  %v7629_v38 = vld [vmem:[%s8934_s5 + $0x10] sm:$0xff]  }
 0xa68   : > { %v7630_v13 = vld [vmem:[%s8934_s5 + $0x8] sm:$0xff]   ;;  %v7631_v42 = vld [vmem:[%s8934_s5] sm:$0xff]  }
 0xa69   : > { %v7407_v17 = vpop.f32.mrf.mxu0 }
 0xa6a   : > { %v6577_v10 = vld [vmem:[%s8935_s6] ss:$0 sm:$0xff] }
 0xabe   : > { %v5871_v49 = vpop.permute.xlu1 %5870 }
 0xabf   : > { %5873 = vst.msk [vmem:[#allocation2] sm:$0xff] %vm3349_vm5, %v5871_v49 }
 0xac2   : > { %v5876_v18 = vpop.permute.xlu0 %5875 }
 0xac3   : > { %5878 = vst.msk [vmem:[#allocation2] sm:$0xff] %vm3355_vm6, %v5876_v18 }
 0xac6   : > { %v5881_v56 = vpop.permute.xlu1 %5880 }
 0xac7   : > { %5883 = vst.msk [vmem:[#allocation2] sm:$0xff] %vm3361_vm7, %v5881_v56 }
 0xaca   : > { %v5886_v20 = vpop.permute.xlu1 %5885 }
 0xacb   : > { %5888 = vst.msk [vmem:[#allocation2] sm:$0xff] %vm3367_vm8, %v5886_v20  ;;  %v6592_v20 = vld [vmem:[%s8938_s9] ss:$0 sm:$0xff]  ;;  %s7709_s9 = scalar_lea.vmem %s7708_s19, 256 }
 0xace   : > { %v5891_v22 = vpop.permute.xlu1 %5890 }
 0xacf   : > { %5893 = vst.msk [vmem:[#allocation2] sm:$0xff] %vm3373_vm9, %v5891_v22 }
 0xad2   : > { %v5896_v12 = vpop.permute.xlu0 %5895 }
 0xad3   : > { %5898 = vst.msk [vmem:[#allocation2] sm:$0xff] %vm3379_vm10, %v5896_v12  ;;  %v6593_v12 = vld [vmem:[%s7958_s4] ss:$0 sm:$0xff] }
 0xad6   : > { %v5901_v23 = vpop.permute.xlu1 %5900 }
 0xad7   : > { %5903 = vst.msk [vmem:[#allocation2] sm:$0xff] %vm3385_vm11, %v5901_v23 }
 0xade   : > { %v5904_v24 = vld [vmem:[#allocation2] sm:$0xff] }
 0xadf   : > { %v5905_v26 = vpack.c.bf16 %v5904_v24, %v5904_v24 }
 0xae1   : > { %7413 = vmatmul.mubr.msk.bf16.vlgmr.msra.gmra.mxu1 %vm1149_vm1, %v5905_v26 }
 0xae2   : > { %7440 = vmatprep.mubr.msk.bf16.mxu1 %vm7796_vm0, %v7795_v1  ;;  %7425 = vmatpush3.bf16.msra.mxu1 %v7624_v33 }
 0xae3   : > { %7426 = vmatprep.subr.bf16.mxu1 %v7795_v1 }
 0xae6   : > { %7427 = vmatpush3.bf16.msra.mxu1 %v7625_v34 }
 0xae7   : > { %7428 = vmatprep.subr.bf16.mxu1 %v7795_v1 }
 0xaea   : > { %7429 = vmatpush3.bf16.msra.mxu1 %v7626_v35 }
 0xaeb   : > { %7430 = vmatprep.subr.bf16.mxu1 %v7795_v1 }
 0xaee   : > { %7431 = vmatpush3.bf16.msra.mxu1 %v7627_v36 }
 0xaef   : > { %7432 = vmatprep.subr.bf16.mxu1 %v7795_v1 }
 0xaf2   : > { %7433 = vmatpush3.bf16.msra.mxu1 %v7628_v37 }
 0xaf3   : > { %7434 = vmatprep.subr.bf16.mxu1 %v7795_v1 }
 0xaf6   : > { %7435 = vmatpush3.bf16.msra.mxu1 %v7629_v38 }
 0xaf7   : > { %7436 = vmatprep.subr.bf16.mxu1 %v7795_v1 }
 0xafa   : > { %7437 = vmatpush3.bf16.msra.mxu1 %v7630_v13 }
 0xafb   : > { %7438 = vmatprep.subr.bf16.mxu1 %v7795_v1 }
 0xafe   : > { %7439 = vmatpush3.bf16.msra.mxu1 %v7631_v42 }
 0xba1   : > { %v5961_v28 = vpop.f32.mrf.mxu1 }
 0xba2   : > { %v5962_v29 = vadd.f32 %v6573_v15, %v5961_v28 }
 0xba3   : > { %v7414_v25 = vpop.f32.mrf.mxu1 }
 0xba4   : > { %v5969_v59 = vadd.f32 %v5962_v29, %v8435_v57  ;;  %v7623_v57 = vld [vmem:[%s8933_s1] sm:$0xff]   ;;  %s8937_s1 = sld [smem:[#allocation25_spill]] }
 0xba5   : > { %v5964_v30 = vpop.f32.mrf.mxu1  ;;  %7419 = vmatpush3.bf16.msra.mxu0 %v7623_v57 }
 0xba6   : > { %v5970_v6 = vsel %vm1149_vm1, %v5969_v59, 0.0 }
 0xba7   : > { %5971 = vadd.xlane.f32.xlu0 %v5970_v6  ;;  %v7415_v7 = vpop.f32.mrf.mxu1 }
 0xbaa   : > { %v6579_v43 = vld [vmem:[%s8937_s1] ss:$0 sm:$0xff]  ;;  %s945_s1 = sand.u32 1, %s7755_s16  }
 0xbab   : > { %s6339_s6 = sshll.u32 %s945_s1, 3  ;;  %s6209_s12 = scalar_lea.sflag [#allocation4], %s945_s1 }
 0xbac   : > { %s947_s5 = scalar_lea.vmem [#allocation3], %s6339_s6 }
 0xbad   : > { %s6222_s8 = sshll.u32 %s947_s5, 4  ;;  %s6223_s8 = int_to_ptr.vmem [resolvable:$true] %s6222_s8 }
 0xbae   : > { %s7703_s14 = scalar_lea.vmem %s6223_s8, 128  ;;  %p7710_p0 = scmp.lt.s32.totalorder %s6223_s8, %s7708_s19 }
 0xbaf   : > { %p7704_p11 = scmp.ne.s32.totalorder %s6223_s8, %s7703_s14  ;;  %p7711_p1 = scmp.lt.s32.totalorder %s7709_s9, %s7703_s14 }
 0xbb1   : > { %p7705_p12 = pnand %p7704_p11, %p8003_p5  ;;  %p7712_p2 = por %p7711_p1, %p7710_p0 }
 0xbb3   : > { %p7706_p13 = pneg %p7705_p12 }
 0xbb5   : > { %p7713_p3 = pnand %p7712_p2, %p7706_p13 }
 0xc30   : > { %v5972_v61 = vpop.xlane.xlu0 %5971 }
 0xc31   : > { %v5973_v31 = vmul.f32 0.03125, %v5972_v61 }
 0xc33   : > { %v5974_v4 = vsub.f32 %v5969_v59, %v5973_v31 }
 0xc35   : > { %v5975_v19 = vmul.f32 %v5974_v4, %v5974_v4 }
 0xc37   : > { %v5976_v32 = vsel %vm1149_vm1, %v5975_v19, 0.0 }
 0xc38   : > { %5977 = vadd.xlane.f32.xlu1 %v5976_v32 }
 0xcc1   : > { %v5978_v21 = vpop.xlane.xlu1 %5977 }
 0xcc2   : > { %v5979_v39 = vmul.f32 0.03125, %v5978_v21 }
 0xcc4   : > { %v5980_v9 = vadd.f32 1e-05, %v5979_v39 }
 0xcc6   : > { %7698 = vrsqrt.f32 %v5980_v9 }
 0xcd3   : > { %v7699_v40 = vpop.eup %7698 }
 0xcd4   : > { %v5982_v41 = vmul.f32 %v7699_v40, %v5974_v4 }
 0xcd6   : > { %v5989_v44 = vmul.f32 %v6577_v10, %v5982_v41 }
 0xcd8   : > { %v5996_v45 = vadd.f32 %v6578_v14, %v5989_v44 }
 0xcda   : > { %v5997_v46 = vpack.c.bf16 %v5996_v45, %v5996_v45 }
 0xcdc   : > { %7421 = vmatmul.mubr.msk.bf16.vlgmr.msra.gmra.mxu0 %vm1149_vm1, %v5997_v46 }
 0xd9c   : > { %v6058_v47 = vpop.f32.mrf.mxu0 }
 0xd9d   : > { %v6059_v48 = vadd.f32 %v6579_v43, %v6058_v47 }
 0xd9e   : > { %v7422_v54 = vpop.f32.mrf.mxu0 }
 0xd9f   : > { %v6064_v53 = vmax.f32 %v6059_v48, 0.0 }
 0xda0   : > { %v6061_v27 = vpop.f32.mrf.mxu0 }
 0xda1   : > { %v6065_v58 = vpack.c.bf16 %v6064_v53, %v6064_v53 }
 0xda2   : > { %v7423_v52 = vpop.f32.mrf.mxu0 }
 0xda3   : > { %7441 = vmatmul.mubr.bf16.vlgmr.msra.gmra.mxu1 %v6065_v58 }
 0xe63   : > { %v6171_v0 = vpop.f32.mrf.mxu1 }
 0xe64   : > { %v6172_v2 = vadd.f32 %v6583_v62, %v6171_v0 }
 0xe65   : > { %v7442_v55 = vpop.f32.mrf.mxu1 }
 0xe66   : > { %v6179_v3 = vadd.f32 %v6172_v2, %v5996_v45 }
 0xe67   : > { %v6174_v8 = vpop.f32.mrf.mxu1 }
 0xe68   : > { %v6180_v1 = vsel %vm1149_vm1, %v6179_v3, 0.0 }
 0xe69   : > { %6181 = vadd.xlane.f32.xlu0 %v6180_v1  ;;  %v7443_v63 = vpop.f32.mrf.mxu1 }
 0xef2   : > { %v6182_v50 = vpop.xlane.xlu0 %6181 }
 0xef3   : > { %v6183_v11 = vmul.f32 0.03125, %v6182_v50 }
 0xef5   : > { %v6184_v51 = vsub.f32 %v6179_v3, %v6183_v11 }
 0xef7   : > { %v6185_v60 = vmul.f32 %v6184_v51, %v6184_v51 }
 0xef9   : > { %v6186_v16 = vsel %vm1149_vm1, %v6185_v60, 0.0 }
 0xefa   : > { %6187 = vadd.xlane.f32.xlu0 %v6186_v16 }
 0xf83   : > { %v6188_v17 = vpop.xlane.xlu0 %6187 }
 0xf84   : > { %v6189_v49 = vmul.f32 0.03125, %v6188_v17 }
 0xf86   : > { %v6190_v18 = vadd.f32 1e-05, %v6189_v49 }
 0xf88   : > { %7700 = vrsqrt.f32 %v6190_v18 }
 0xf95   : > { %v7701_v56 = vpop.eup %7700 }
 0xf96   : > { %v6192_v22 = vmul.f32 %v7701_v56, %v6184_v51 }
 0xf98   : > { %v6199_v23 = vmul.f32 %v6592_v20, %v6192_v22 }
 0xf9a   : > { %v6206_v24 = vadd.f32 %v6593_v12, %v6199_v23 }
 0xf9c   : > { %6207 = vst.msk [vmem:[%s947_s5] sm:$0xff] %vm1149_vm1, %v6206_v24 }
 0xf9d   : > { %7716 = shalt.err (!%p7713_p3)
}
 0xf9e   : > { %s7717_s0 = scalar_lea.hbm %s6220_s11, 128  ;;  %s7721_s5 = scalar_lea.hbm %s7963_s13, 256 }
 0xf9f   : > { %p7718_p4 = scmp.ne.s32.totalorder %s6220_s11, %s7717_s0  ;;  %p7722_p9 = scmp.lt.s32.totalorder %s6220_s11, %s7963_s13 }
 0xfa0   : > { %p7723_p10 = scmp.lt.s32.totalorder %s7721_s5, %s7717_s0 }
 0xfa1   : > { %p7719_p7 = pnand %p7718_p4, %p8003_p5 }
 0xfa2   : > { %p7724_p11 = por %p7723_p10, %p7722_p9 }
 0xfa3   : > { %p7720_p8 = pneg %p7719_p7 }
 0xfa5   : > { %p7725_p12 = pnand %p7724_p11, %p7720_p8 }
 0xfa7   : > { %7728 = shalt.err (!%p7725_p12)
}
 0xfa8   : > { %7444 = dma.vmem_to_hbm [thread:$0]  (%p8003_p5), %s6223_s8, 128, %s6220_s11, %s6209_s12  }
 0xfa9 PF: > { %p7450_p13 = scmp.ge.s32.totalorder %s7763_s22, 2  ;;  %s6234_s9 = sand.u32 1, %s7751_s15  }
 0xfaa   : > { %s6235_s17 = scalar_lea.sflag [#allocation4], %s6234_s9 }
 0xfab   : > { %p7447_p0 = pnand %p7450_p13, %p8007_p6 }
 0xfad   : > { %p7448_p1 = pneg %p7447_p0 }
 0xfaf   : > { %7746 = dma.done.wait (%p7448_p1), %s6235_s17, 128  }
 0xfb0   : > { %7748 = vsyncadd (%p7448_p1), %s6235_s17, 4294967168  ;;  %p71_p2 = scmp.ge.s32.totalorder %s7990_s26, 4   ;;  %s8939_s15 = smov %s7755_s16 }
 0xfb1   : > { %s8940_s16 = smov %s7759_s18  ;;  %s8941_s18 = smov %s8001_s2 }
 0xfb2   : > { %s8942_s22 = smov %s7990_s26  ;;  %73 = sbr.rel (!%p71_p2) target bundleno = 60 (0x3c), region = 211 }
 0xfb7   :  { %6240 = vsyncpa [#allocation4], 1 }
 0xfb8   :  { %6242 = vsyncpa [#allocation4 + $0x1], 1 }

</bundles_post_ra>
